<compile_context>
chip_gen: v6e
topology: v6e:2x2x1
jax: 0.10.0
libtpu: 0.0.40
codegen_flags: <defaults>
</compile_context>

<pallas_src>
import jax
import jax.numpy as jnp
import numpy as np
from jax import lax
from jax.experimental import pallas as pl
from jax.experimental.pallas import tpu as pltpu

EPS = 1e-5  # nn.BatchNorm3d default eps


def dense_block_kernel(x_ref, g1_ref, bt1_ref, s1_ref, s1t_ref,
                       w1_ref, b1_ref,
                       g2_ref, bt2_ref, s2_ref, s2t_ref,
                       w2_ref, b2_ref,
                       out_ref, hpad_ref):
    # Shapes (lane-folded, channel minor inside each W group):
    #   x_ref    : (N*D*H, W*Cin)          f32
    #   s1_ref   : (Cin,  W*Cin)  "spread"   s1t_ref: (W*Cin,  Cin)  "collect"
    #   w1_ref   : (W*Cin, W*Cmid)         bf16  block-diagonal 1x1x1 conv
    #   s2_ref   : (Cmid, W*Cmid) "spread"   s2t_ref: (W*Cmid, Cmid) "collect"
    #   w2_ref   : (9*W*Cmid, W*Cout)      bf16  W-banded 3x3x3 conv (kd,kh major)
    #   out_ref  : (N*D*H, W*Cout)         f32   (W*Cout == 128 -> lane dense)
    #   hpad_ref : (N, D+2, H+2, W*Cmid)   f32   D/H zero-halo scratch
    f32 = jnp.float32
    bf16 = jnp.bfloat16
    NDH, WCin = x_ref.shape
    N, Dp2, Hp2, WCmid = hpad_ref.shape
    D, H = Dp2 - 2, Hp2 - 2
    Cin = s1_ref.shape[0]
    W = WCin // Cin
    WCout = out_ref.shape[1]
    P = NDH * W
    inv_p = 1.0 / P

    # ---------------- BatchNorm3d #1 (batch stats) + ReLU -------------------
    # One-pass stats: var = E[x^2] - mean^2, clamped at 0 before rsqrt.
    # Row-sums on the VPU, then ONE batched (2,K) MXU "collect" matmul reduces
    # the W groups folded into the lanes, and ONE batched "spread" matmul
    # broadcasts [scale; shift] back to the lane-folded layout.
    x = x_ref[...]
    stat1 = jnp.concatenate(
        [jnp.sum(x, axis=0, keepdims=True),
         jnp.sum(x * x, axis=0, keepdims=True)], axis=0)              # (2, W*Cin)
    red1 = jnp.dot(stat1, s1t_ref[...], preferred_element_type=f32)   # (2, Cin)
    mean1 = red1[0:1, :] * inv_p
    var1 = jnp.maximum(red1[1:2, :] * inv_p - mean1 * mean1, 0.0)
    scale1 = g1_ref[...] * lax.rsqrt(var1 + EPS)                      # (1, Cin)
    shift1 = bt1_ref[...] - mean1 * scale1
    ss1 = jnp.dot(jnp.concatenate([scale1, shift1], axis=0), s1_ref[...],
                  preferred_element_type=f32)                         # (2, W*Cin)
    xn = jnp.maximum(x * ss1[0:1, :] + ss1[1:2, :], 0.0)

    # ---------------- Conv3d 1x1x1: one block-diagonal bf16 matmul ----------
    h = jnp.dot(xn.astype(bf16), w1_ref[...],
                preferred_element_type=f32) + b1_ref[...]             # (NDH, W*Cmid) f32

    # ---------------- BatchNorm3d #2 (batch stats, from f32 h) + ReLU -------
    stat2 = jnp.concatenate(
        [jnp.sum(h, axis=0, keepdims=True),
         jnp.sum(h * h, axis=0, keepdims=True)], axis=0)              # (2, W*Cmid)
    red2 = jnp.dot(stat2, s2t_ref[...], preferred_element_type=f32)   # (2, Cmid)
    mean2 = red2[0:1, :] * inv_p
    var2 = jnp.maximum(red2[1:2, :] * inv_p - mean2 * mean2, 0.0)
    scale2 = g2_ref[...] * lax.rsqrt(var2 + EPS)                      # (1, Cmid)
    shift2 = bt2_ref[...] - mean2 * scale2
    ss2 = jnp.dot(jnp.concatenate([scale2, shift2], axis=0), s2_ref[...],
                  preferred_element_type=f32)                         # (2, W*Cmid)

    # ---------------- Conv3d 3x3x3, padding=1 -------------------------------
    # The W dimension (and its padding) lives inside the banded weight, so the
    # scratch only needs a D/H halo.  Zero just the halo faces, then write the
    # BN2+ReLU result directly into the interior (no separate hn buffer).
    hpad_ref[:, 0:1, :, :] = jnp.zeros((N, 1, Hp2, WCmid), f32)
    hpad_ref[:, D + 1:D + 2, :, :] = jnp.zeros((N, 1, Hp2, WCmid), f32)
    hpad_ref[:, 1:D + 1, 0:1, :] = jnp.zeros((N, D, 1, WCmid), f32)
    hpad_ref[:, 1:D + 1, H + 1:H + 2, :] = jnp.zeros((N, D, 1, WCmid), f32)
    hpad_ref[:, 1:D + 1, 1:H + 1, :] = jnp.maximum(
        h * ss2[0:1, :] + ss2[1:2, :], 0.0).reshape(N, D, H, WCmid)

    # 9 accumulating matmuls over the (kd, kh) taps: each slab slice only
    # touches D/H (lane dim stays contiguous); the matching K-block of the
    # W-banded weight is pl.ds-sliced.  bf16 operands, f32 accumulation.
    # No K=9*W*Cmid concatenated operand is ever materialized.
    acc = jnp.zeros((NDH, WCout), f32)
    t = 0
    for kd in range(3):
        for kh in range(3):
            slab = (hpad_ref[:, kd:kd + D, kh:kh + H, :]
                    .reshape(NDH, WCmid).astype(bf16))
            acc = acc + jnp.dot(slab, w2_ref[pl.ds(t * WCmid, WCmid), :],
                                preferred_element_type=f32)
            t += 1
    out_ref[...] = acc + b2_ref[...]                  # (NDH, W*Cout) lane-dense


def dense_block_layer(x_ncdhw, params):
    """x_ncdhw: (N, Cin, D, H, W) float32 -> (N, Cin + filters, D, H, W)."""
    g1, bt1, w1, b1, g2, bt2, w2, b2 = params
    N, Cin, D, H, W = x_ncdhw.shape
    Cmid = w1.shape[0]
    Cout = w2.shape[0]
    f32 = jnp.float32
    bf16 = jnp.bfloat16

    # Lane-folded input: rows = (n, d, h), lanes = (w, ci).
    x2d = jnp.transpose(x_ncdhw, (0, 2, 3, 4, 1)).reshape(N * D * H, W * Cin)

    # "Spread" matrices mapping per-channel vectors <-> lane-folded vectors.
    s1 = jnp.tile(jnp.eye(Cin, dtype=f32), (1, W))            # (Cin,  W*Cin)
    s2 = jnp.tile(jnp.eye(Cmid, dtype=f32), (1, W))           # (Cmid, W*Cmid)

    # Conv1 (1x1x1) as a block-diagonal matmul weight (W blocks of (Cin,Cmid)),
    # stored as bf16 (f32 accumulation on the MXU).
    w1_mat = jnp.transpose(w1.reshape(Cmid, Cin), (1, 0))     # (Cin, Cmid)
    w1_bd = jnp.kron(jnp.eye(W, dtype=f32), w1_mat).astype(bf16)  # (W*Cin, W*Cmid)
    b1_f = jnp.tile(b1, W).reshape(1, W * Cmid)

    # Conv2 (3x3x3, pad=1) as 9 W-banded blocks stacked along K
    # (kd major, then kh, then input-w, then cm).  W padding is implicit.
    w2_t = jnp.transpose(w2, (2, 3, 4, 1, 0))                 # (3, 3, 3, Cmid, Cout)
    band = jnp.zeros((3, 3, W, Cmid, W, Cout), f32)
    for w_out in range(W):
        for kw in range(3):
            wi = w_out + kw - 1
            if 0 <= wi < W:
                band = band.at[:, :, wi, :, w_out, :].set(w2_t[:, :, kw])
    w2_band = band.reshape(9 * W * Cmid, W * Cout).astype(bf16)
    b2_f = jnp.tile(b2, W).reshape(1, W * Cout)

    out2d = pl.pallas_call(
        dense_block_kernel,
        out_shape=jax.ShapeDtypeStruct((N * D * H, W * Cout), f32),
        in_specs=[pl.BlockSpec(memory_space=pltpu.MemorySpace.VMEM)] * 13,
        out_specs=pl.BlockSpec(memory_space=pltpu.MemorySpace.VMEM),
        scratch_shapes=[pltpu.VMEM((N, D + 2, H + 2, W * Cmid), f32)],
    )(x2d,
      g1.reshape(1, Cin), bt1.reshape(1, Cin), s1, jnp.transpose(s1),
      w1_bd, b1_f,
      g2.reshape(1, Cmid), bt2.reshape(1, Cmid), s2, jnp.transpose(s2),
      w2_band, b2_f)

    y = jnp.transpose(out2d.reshape(N, D, H, W, Cout), (0, 4, 1, 2, 3))
    return jnp.concatenate([x_ncdhw, y], axis=1)


def reference(x, params):
    """Pure-JAX reference mirroring the PyTorch forward (training-mode BN)."""
    g1, bt1, w1, b1, g2, bt2, w2, b2 = params

    def bn_relu(y, g, b):
        m = jnp.mean(y, axis=(0, 2, 3, 4), keepdims=True)
        v = jnp.mean((y - m) ** 2, axis=(0, 2, 3, 4), keepdims=True)
        yn = (y - m) / jnp.sqrt(v + EPS)
        yn = yn * g.reshape(1, -1, 1, 1, 1) + b.reshape(1, -1, 1, 1, 1)
        return jnp.maximum(yn, 0.0)

    def conv3d(y, w, b, pad):
        o = lax.conv_general_dilated(
            y, w, window_strides=(1, 1, 1), padding=[(pad, pad)] * 3,
            dimension_numbers=('NCDHW', 'OIDHW', 'NCDHW'),
            precision=lax.Precision.HIGHEST)
        return o + b.reshape(1, -1, 1, 1, 1)

    y = bn_relu(x, g1, bt1)
    y = conv3d(y, w1, b1, 0)
    y = bn_relu(y, g2, bt2)
    y = conv3d(y, w2, b2, 1)
    return jnp.concatenate([x, y], axis=1)


if __name__ == "__main__":
    N, Cin, D, H, W = 2, 4, 4, 8, 8
    filters, bottleneck = 16, 4
    Cmid, Cout = filters * bottleneck, filters

    ks = jax.random.split(jax.random.PRNGKey(0), 9)
    x = jax.random.normal(ks[0], (N, Cin, D, H, W), jnp.float32)
    g1 = 1.0 + 0.1 * jax.random.normal(ks[1], (Cin,), jnp.float32)
    bt1 = 0.1 * jax.random.normal(ks[2], (Cin,), jnp.float32)
    w1 = 0.2 * jax.random.normal(ks[3], (Cmid, Cin, 1, 1, 1), jnp.float32)
    b1 = 0.1 * jax.random.normal(ks[4], (Cmid,), jnp.float32)
    g2 = 1.0 + 0.1 * jax.random.normal(ks[5], (Cmid,), jnp.float32)
    bt2 = 0.1 * jax.random.normal(ks[6], (Cmid,), jnp.float32)
    w2 = 0.05 * jax.random.normal(ks[7], (Cout, Cmid, 3, 3, 3), jnp.float32)
    b2 = 0.1 * jax.random.normal(ks[8], (Cout,), jnp.float32)
    params = (g1, bt1, w1, b1, g2, bt2, w2, b2)

    out = jax.jit(dense_block_layer)(x, params)
    out = jax.block_until_ready(out)

    ref = reference(x, params)
    assert out.shape == (N, Cin + Cout, D, H, W), out.shape
    # Tolerance reflects bf16 MXU operands in BOTH convs (f32 accumulation);
    # deviation vs the f32 reference is ~1e-2-level on O(1) outputs.
    np.testing.assert_allclose(np.asarray(out), np.asarray(ref), rtol=2e-2, atol=3e-2)
    print("KERNEL_OK")
</pallas_src>

<mosaic_0001>
module attributes {stable_mosaic.version = 11 : i64} {
  func.func @dense_block_kernel(%arg0: memref<64x32xf32, #tpu.memory_space<vmem>>, %arg1: memref<1x4xf32, #tpu.memory_space<vmem>>, %arg2: memref<1x4xf32, #tpu.memory_space<vmem>>, %arg3: memref<4x32xf32, #tpu.memory_space<vmem>>, %arg4: memref<32x4xf32, #tpu.memory_space<vmem>>, %arg5: memref<32x512xbf16, #tpu.memory_space<vmem>>, %arg6: memref<1x512xf32, #tpu.memory_space<vmem>>, %arg7: memref<1x64xf32, #tpu.memory_space<vmem>>, %arg8: memref<1x64xf32, #tpu.memory_space<vmem>>, %arg9: memref<64x512xf32, #tpu.memory_space<vmem>>, %arg10: memref<512x64xf32, #tpu.memory_space<vmem>>, %arg11: memref<4608x128xbf16, #tpu.memory_space<vmem>>, %arg12: memref<1x128xf32, #tpu.memory_space<vmem>>, %arg13: memref<64x128xf32, #tpu.memory_space<vmem>>, %arg14: memref<2x6x10x512xf32, #tpu.memory_space<vmem>>) attributes {dimension_semantics = [], scalar_prefetch = 0 : i64, scratch_operands = 1 : i64, tpu.core_type = #tpu.core_type<tc>} {
    %c0 = arith.constant 0 : index
    %c0_0 = arith.constant 0 : index
    %0 = vector.load %arg0[%c0, %c0_0] : memref<64x32xf32, #tpu.memory_space<vmem>>, vector<64x32xf32>
    %cst = arith.constant dense<0.000000e+00> : vector<32xf32>
    %1 = vector.multi_reduction <add>, %0, %cst [0] : vector<64x32xf32> to vector<32xf32>
    %2 = vector.shape_cast %1 : vector<32xf32> to vector<1x32xf32>
    %3 = arith.mulf %0, %0 : vector<64x32xf32>
    %cst_1 = arith.constant dense<0.000000e+00> : vector<32xf32>
    %4 = vector.multi_reduction <add>, %3, %cst_1 [0] : vector<64x32xf32> to vector<32xf32>
    %5 = vector.shape_cast %4 : vector<32xf32> to vector<1x32xf32>
    %6 = tpu.concatenate %2, %5 in 0 : vector<1x32xf32>, vector<1x32xf32> -> vector<2x32xf32>
    %c0_2 = arith.constant 0 : index
    %c0_3 = arith.constant 0 : index
    %7 = vector.load %arg4[%c0_2, %c0_3] : memref<32x4xf32, #tpu.memory_space<vmem>>, vector<32x4xf32>
    %cst_4 = arith.constant dense<0.000000e+00> : vector<2x4xf32>
    %8 = tpu.matmul %6, %7, %cst_4 {dimension_numbers = #tpu.dot_dimension_numbers<[1], [0], [0], [1], [0, 0, 1, 1], [], []>} : vector<2x32xf32>, vector<32x4xf32>, vector<2x4xf32> -> vector<2x4xf32>
    %9 = vector.extract_strided_slice %8 {offsets = [0, 0], sizes = [1, 4], strides = [1, 1]} : vector<2x4xf32> to vector<1x4xf32>
    %cst_5 = arith.constant 0.001953125 : f32
    %10 = vector.broadcast %cst_5 : f32 to vector<1x4xf32>
    %11 = arith.mulf %9, %10 : vector<1x4xf32>
    %12 = vector.extract_strided_slice %8 {offsets = [1, 0], sizes = [1, 4], strides = [1, 1]} : vector<2x4xf32> to vector<1x4xf32>
    %cst_6 = arith.constant 0.001953125 : f32
    %13 = vector.broadcast %cst_6 : f32 to vector<1x4xf32>
    %14 = arith.mulf %12, %13 : vector<1x4xf32>
    %15 = arith.mulf %11, %11 : vector<1x4xf32>
    %16 = arith.subf %14, %15 : vector<1x4xf32>
    %cst_7 = arith.constant 0.000000e+00 : f32
    %17 = vector.broadcast %cst_7 : f32 to vector<1x4xf32>
    %18 = arith.maximumf %16, %17 : vector<1x4xf32>
    %c0_8 = arith.constant 0 : index
    %c0_9 = arith.constant 0 : index
    %19 = vector.load %arg1[%c0_8, %c0_9] : memref<1x4xf32, #tpu.memory_space<vmem>>, vector<1x4xf32>
    %cst_10 = arith.constant 9.99999974E-6 : f32
    %20 = vector.broadcast %cst_10 : f32 to vector<1x4xf32>
    %21 = arith.addf %18, %20 : vector<1x4xf32>
    %22 = math.rsqrt %21 : vector<1x4xf32>
    %23 = arith.mulf %19, %22 : vector<1x4xf32>
    %c0_11 = arith.constant 0 : index
    %c0_12 = arith.constant 0 : index
    %24 = vector.load %arg2[%c0_11, %c0_12] : memref<1x4xf32, #tpu.memory_space<vmem>>, vector<1x4xf32>
    %25 = arith.mulf %11, %23 : vector<1x4xf32>
    %26 = arith.subf %24, %25 : vector<1x4xf32>
    %27 = tpu.concatenate %23, %26 in 0 : vector<1x4xf32>, vector<1x4xf32> -> vector<2x4xf32>
    %c0_13 = arith.constant 0 : index
    %c0_14 = arith.constant 0 : index
    %28 = vector.load %arg3[%c0_13, %c0_14] : memref<4x32xf32, #tpu.memory_space<vmem>>, vector<4x32xf32>
    %cst_15 = arith.constant dense<0.000000e+00> : vector<2x32xf32>
    %29 = tpu.matmul %27, %28, %cst_15 {dimension_numbers = #tpu.dot_dimension_numbers<[1], [0], [0], [1], [0, 0, 1, 1], [], []>} : vector<2x4xf32>, vector<4x32xf32>, vector<2x32xf32> -> vector<2x32xf32>
    %30 = vector.extract_strided_slice %29 {offsets = [0, 0], sizes = [1, 32], strides = [1, 1]} : vector<2x32xf32> to vector<1x32xf32>
    %31 = vector.broadcast %30 : vector<1x32xf32> to vector<64x32xf32>
    %32 = arith.mulf %0, %31 : vector<64x32xf32>
    %33 = vector.extract_strided_slice %29 {offsets = [1, 0], sizes = [1, 32], strides = [1, 1]} : vector<2x32xf32> to vector<1x32xf32>
    %34 = vector.broadcast %33 : vector<1x32xf32> to vector<64x32xf32>
    %35 = arith.addf %32, %34 : vector<64x32xf32>
    %cst_16 = arith.constant 0.000000e+00 : f32
    %36 = vector.broadcast %cst_16 : f32 to vector<64x32xf32>
    %37 = arith.maximumf %35, %36 : vector<64x32xf32>
    %38 = arith.truncf %37 : vector<64x32xf32> to vector<64x32xbf16>
    %c0_17 = arith.constant 0 : index
    %c0_18 = arith.constant 0 : index
    %39 = vector.load %arg5[%c0_17, %c0_18] : memref<32x512xbf16, #tpu.memory_space<vmem>>, vector<32x512xbf16>
    %cst_19 = arith.constant dense<0.000000e+00> : vector<64x512xf32>
    %40 = tpu.matmul %38, %39, %cst_19 {dimension_numbers = #tpu.dot_dimension_numbers<[1], [0], [0], [1], [0, 0, 1, 1], [], []>} : vector<64x32xbf16>, vector<32x512xbf16>, vector<64x512xf32> -> vector<64x512xf32>
    %c0_20 = arith.constant 0 : index
    %c0_21 = arith.constant 0 : index
    %41 = vector.load %arg6[%c0_20, %c0_21] : memref<1x512xf32, #tpu.memory_space<vmem>>, vector<1x512xf32>
    %42 = vector.broadcast %41 : vector<1x512xf32> to vector<64x512xf32>
    %43 = arith.addf %40, %42 : vector<64x512xf32>
    %cst_22 = arith.constant dense<0.000000e+00> : vector<512xf32>
    %44 = vector.multi_reduction <add>, %43, %cst_22 [0] : vector<64x512xf32> to vector<512xf32>
    %45 = vector.shape_cast %44 : vector<512xf32> to vector<1x512xf32>
    %46 = arith.mulf %43, %43 : vector<64x512xf32>
    %cst_23 = arith.constant dense<0.000000e+00> : vector<512xf32>
    %47 = vector.multi_reduction <add>, %46, %cst_23 [0] : vector<64x512xf32> to vector<512xf32>
    %48 = vector.shape_cast %47 : vector<512xf32> to vector<1x512xf32>
    %49 = tpu.concatenate %45, %48 in 0 : vector<1x512xf32>, vector<1x512xf32> -> vector<2x512xf32>
    %c0_24 = arith.constant 0 : index
    %c0_25 = arith.constant 0 : index
    %50 = vector.load %arg10[%c0_24, %c0_25] : memref<512x64xf32, #tpu.memory_space<vmem>>, vector<512x64xf32>
    %cst_26 = arith.constant dense<0.000000e+00> : vector<2x64xf32>
    %51 = tpu.matmul %49, %50, %cst_26 {dimension_numbers = #tpu.dot_dimension_numbers<[1], [0], [0], [1], [0, 0, 1, 1], [], []>} : vector<2x512xf32>, vector<512x64xf32>, vector<2x64xf32> -> vector<2x64xf32>
    %52 = vector.extract_strided_slice %51 {offsets = [0, 0], sizes = [1, 64], strides = [1, 1]} : vector<2x64xf32> to vector<1x64xf32>
    %cst_27 = arith.constant 0.001953125 : f32
    %53 = vector.broadcast %cst_27 : f32 to vector<1x64xf32>
    %54 = arith.mulf %52, %53 : vector<1x64xf32>
    %55 = vector.extract_strided_slice %51 {offsets = [1, 0], sizes = [1, 64], strides = [1, 1]} : vector<2x64xf32> to vector<1x64xf32>
    %cst_28 = arith.constant 0.001953125 : f32
    %56 = vector.broadcast %cst_28 : f32 to vector<1x64xf32>
    %57 = arith.mulf %55, %56 : vector<1x64xf32>
    %58 = arith.mulf %54, %54 : vector<1x64xf32>
    %59 = arith.subf %57, %58 : vector<1x64xf32>
    %cst_29 = arith.constant 0.000000e+00 : f32
    %60 = vector.broadcast %cst_29 : f32 to vector<1x64xf32>
    %61 = arith.maximumf %59, %60 : vector<1x64xf32>
    %c0_30 = arith.constant 0 : index
    %c0_31 = arith.constant 0 : index
    %62 = vector.load %arg7[%c0_30, %c0_31] : memref<1x64xf32, #tpu.memory_space<vmem>>, vector<1x64xf32>
    %cst_32 = arith.constant 9.99999974E-6 : f32
    %63 = vector.broadcast %cst_32 : f32 to vector<1x64xf32>
    %64 = arith.addf %61, %63 : vector<1x64xf32>
    %65 = math.rsqrt %64 : vector<1x64xf32>
    %66 = arith.mulf %62, %65 : vector<1x64xf32>
    %c0_33 = arith.constant 0 : index
    %c0_34 = arith.constant 0 : index
    %67 = vector.load %arg8[%c0_33, %c0_34] : memref<1x64xf32, #tpu.memory_space<vmem>>, vector<1x64xf32>
    %68 = arith.mulf %54, %66 : vector<1x64xf32>
    %69 = arith.subf %67, %68 : vector<1x64xf32>
    %70 = tpu.concatenate %66, %69 in 0 : vector<1x64xf32>, vector<1x64xf32> -> vector<2x64xf32>
    %c0_35 = arith.constant 0 : index
    %c0_36 = arith.constant 0 : index
    %71 = vector.load %arg9[%c0_35, %c0_36] : memref<64x512xf32, #tpu.memory_space<vmem>>, vector<64x512xf32>
    %cst_37 = arith.constant dense<0.000000e+00> : vector<2x512xf32>
    %72 = tpu.matmul %70, %71, %cst_37 {dimension_numbers = #tpu.dot_dimension_numbers<[1], [0], [0], [1], [0, 0, 1, 1], [], []>} : vector<2x64xf32>, vector<64x512xf32>, vector<2x512xf32> -> vector<2x512xf32>
    %cst_38 = arith.constant 0.000000e+00 : f32
    %73 = vector.broadcast %cst_38 : f32 to vector<2x1x10x512xf32>
    %c0_39 = arith.constant 0 : index
    %c0_40 = arith.constant 0 : index
    %c0_41 = arith.constant 0 : index
    %c0_42 = arith.constant 0 : index
    %74 = vector.load %arg14[%c0_39, %c0_40, %c0_41, %c0_42] : memref<2x6x10x512xf32, #tpu.memory_space<vmem>>, vector<2x1x10x512xf32>
    tpu.vector_store %arg14[%c0_39, %c0_40, %c0_41, %c0_42], %73 {strides = array<i32>} : memref<2x6x10x512xf32, #tpu.memory_space<vmem>>, vector<2x1x10x512xf32>,
    %cst_43 = arith.constant 0.000000e+00 : f32
    %75 = vector.broadcast %cst_43 : f32 to vector<2x1x10x512xf32>
    %c0_44 = arith.constant 0 : index
    %c5 = arith.constant 5 : index
    %c0_45 = arith.constant 0 : index
    %c0_46 = arith.constant 0 : index
    %76 = vector.load %arg14[%c0_44, %c5, %c0_45, %c0_46] : memref<2x6x10x512xf32, #tpu.memory_space<vmem>>, vector<2x1x10x512xf32>
    tpu.vector_store %arg14[%c0_44, %c5, %c0_45, %c0_46], %75 {strides = array<i32>} : memref<2x6x10x512xf32, #tpu.memory_space<vmem>>, vector<2x1x10x512xf32>,
    %cst_47 = arith.constant 0.000000e+00 : f32
    %77 = vector.broadcast %cst_47 : f32 to vector<2x4x1x512xf32>
    %c0_48 = arith.constant 0 : index
    %c1 = arith.constant 1 : index
    %c0_49 = arith.constant 0 : index
    %c0_50 = arith.constant 0 : index
    %78 = vector.load %arg14[%c0_48, %c1, %c0_49, %c0_50] : memref<2x6x10x512xf32, #tpu.memory_space<vmem>>, vector<2x4x1x512xf32>
    tpu.vector_store %arg14[%c0_48, %c1, %c0_49, %c0_50], %77 {strides = array<i32>} : memref<2x6x10x512xf32, #tpu.memory_space<vmem>>, vector<2x4x1x512xf32>,
    %cst_51 = arith.constant 0.000000e+00 : f32
    %79 = vector.broadcast %cst_51 : f32 to vector<2x4x1x512xf32>
    %c0_52 = arith.constant 0 : index
    %c1_53 = arith.constant 1 : index
    %c9 = arith.constant 9 : index
    %c0_54 = arith.constant 0 : index
    %80 = vector.load %arg14[%c0_52, %c1_53, %c9, %c0_54] : memref<2x6x10x512xf32, #tpu.memory_space<vmem>>, vector<2x4x1x512xf32>
    tpu.vector_store %arg14[%c0_52, %c1_53, %c9, %c0_54], %79 {strides = array<i32>} : memref<2x6x10x512xf32, #tpu.memory_space<vmem>>, vector<2x4x1x512xf32>,
    %81 = vector.extract_strided_slice %72 {offsets = [0, 0], sizes = [1, 512], strides = [1, 1]} : vector<2x512xf32> to vector<1x512xf32>
    %82 = vector.broadcast %81 : vector<1x512xf32> to vector<64x512xf32>
    %83 = arith.mulf %43, %82 : vector<64x512xf32>
    %84 = vector.extract_strided_slice %72 {offsets = [1, 0], sizes = [1, 512], strides = [1, 1]} : vector<2x512xf32> to vector<1x512xf32>
    %85 = vector.broadcast %84 : vector<1x512xf32> to vector<64x512xf32>
    %86 = arith.addf %83, %85 : vector<64x512xf32>
    %cst_55 = arith.constant 0.000000e+00 : f32
    %87 = vector.broadcast %cst_55 : f32 to vector<64x512xf32>
    %88 = arith.maximumf %86, %87 : vector<64x512xf32>
    %89 = vector.shape_cast %88 : vector<64x512xf32> to vector<2x4x8x512xf32>
    %c0_56 = arith.constant 0 : index
    %c1_57 = arith.constant 1 : index
    %c1_58 = arith.constant 1 : index
    %c0_59 = arith.constant 0 : index
    %90 = vector.load %arg14[%c0_56, %c1_57, %c1_58, %c0_59] : memref<2x6x10x512xf32, #tpu.memory_space<vmem>>, vector<2x4x8x512xf32>
    tpu.vector_store %arg14[%c0_56, %c1_57, %c1_58, %c0_59], %89 {strides = array<i32>} : memref<2x6x10x512xf32, #tpu.memory_space<vmem>>, vector<2x4x8x512xf32>,
    %cst_60 = arith.constant 0.000000e+00 : f32
    %91 = vector.broadcast %cst_60 : f32 to vector<64x128xf32>
    %c0_61 = arith.constant 0 : index
    %c0_62 = arith.constant 0 : index
    %c0_63 = arith.constant 0 : index
    %c0_64 = arith.constant 0 : index
    %92 = vector.load %arg14[%c0_61, %c0_62, %c0_63, %c0_64] : memref<2x6x10x512xf32, #tpu.memory_space<vmem>>, vector<2x4x8x512xf32>
    %93 = vector.shape_cast %92 : vector<2x4x8x512xf32> to vector<64x512xf32>
    %94 = arith.truncf %93 : vector<64x512xf32> to vector<64x512xbf16>
    %c0_65 = arith.constant 0 : index
    %c0_66 = arith.constant 0 : index
    %95 = vector.load %arg11[%c0_65, %c0_66] : memref<4608x128xbf16, #tpu.memory_space<vmem>>, vector<512x128xbf16>
    %cst_67 = arith.constant dense<0.000000e+00> : vector<64x128xf32>
    %96 = tpu.matmul %94, %95, %cst_67 {dimension_numbers = #tpu.dot_dimension_numbers<[1], [0], [0], [1], [0, 0, 1, 1], [], []>} : vector<64x512xbf16>, vector<512x128xbf16>, vector<64x128xf32> -> vector<64x128xf32>
    %97 = arith.addf %91, %96 : vector<64x128xf32>
    %c0_68 = arith.constant 0 : index
    %c0_69 = arith.constant 0 : index
    %c1_70 = arith.constant 1 : index
    %c0_71 = arith.constant 0 : index
    %98 = vector.load %arg14[%c0_68, %c0_69, %c1_70, %c0_71] : memref<2x6x10x512xf32, #tpu.memory_space<vmem>>, vector<2x4x8x512xf32>
    %99 = vector.shape_cast %98 : vector<2x4x8x512xf32> to vector<64x512xf32>
    %100 = arith.truncf %99 : vector<64x512xf32> to vector<64x512xbf16>
    %c512 = arith.constant 512 : index
    %c0_72 = arith.constant 0 : index
    %101 = vector.load %arg11[%c512, %c0_72] : memref<4608x128xbf16, #tpu.memory_space<vmem>>, vector<512x128xbf16>
    %cst_73 = arith.constant dense<0.000000e+00> : vector<64x128xf32>
    %102 = tpu.matmul %100, %101, %cst_73 {dimension_numbers = #tpu.dot_dimension_numbers<[1], [0], [0], [1], [0, 0, 1, 1], [], []>} : vector<64x512xbf16>, vector<512x128xbf16>, vector<64x128xf32> -> vector<64x128xf32>
    %103 = arith.addf %97, %102 : vector<64x128xf32>
    %c0_74 = arith.constant 0 : index
    %c0_75 = arith.constant 0 : index
    %c2 = arith.constant 2 : index
    %c0_76 = arith.constant 0 : index
    %104 = vector.load %arg14[%c0_74, %c0_75, %c2, %c0_76] : memref<2x6x10x512xf32, #tpu.memory_space<vmem>>, vector<2x4x8x512xf32>
    %105 = vector.shape_cast %104 : vector<2x4x8x512xf32> to vector<64x512xf32>
    %106 = arith.truncf %105 : vector<64x512xf32> to vector<64x512xbf16>
    %c1024 = arith.constant 1024 : index
    %c0_77 = arith.constant 0 : index
    %107 = vector.load %arg11[%c1024, %c0_77] : memref<4608x128xbf16, #tpu.memory_space<vmem>>, vector<512x128xbf16>
    %cst_78 = arith.constant dense<0.000000e+00> : vector<64x128xf32>
    %108 = tpu.matmul %106, %107, %cst_78 {dimension_numbers = #tpu.dot_dimension_numbers<[1], [0], [0], [1], [0, 0, 1, 1], [], []>} : vector<64x512xbf16>, vector<512x128xbf16>, vector<64x128xf32> -> vector<64x128xf32>
    %109 = arith.addf %103, %108 : vector<64x128xf32>
    %c0_79 = arith.constant 0 : index
    %c1_80 = arith.constant 1 : index
    %c0_81 = arith.constant 0 : index
    %c0_82 = arith.constant 0 : index
    %110 = vector.load %arg14[%c0_79, %c1_80, %c0_81, %c0_82] : memref<2x6x10x512xf32, #tpu.memory_space<vmem>>, vector<2x4x8x512xf32>
    %111 = vector.shape_cast %110 : vector<2x4x8x512xf32> to vector<64x512xf32>
    %112 = arith.truncf %111 : vector<64x512xf32> to vector<64x512xbf16>
    %c1536 = arith.constant 1536 : index
    %c0_83 = arith.constant 0 : index
    %113 = vector.load %arg11[%c1536, %c0_83] : memref<4608x128xbf16, #tpu.memory_space<vmem>>, vector<512x128xbf16>
    %cst_84 = arith.constant dense<0.000000e+00> : vector<64x128xf32>
    %114 = tpu.matmul %112, %113, %cst_84 {dimension_numbers = #tpu.dot_dimension_numbers<[1], [0], [0], [1], [0, 0, 1, 1], [], []>} : vector<64x512xbf16>, vector<512x128xbf16>, vector<64x128xf32> -> vector<64x128xf32>
    %115 = arith.addf %109, %114 : vector<64x128xf32>
    %c0_85 = arith.constant 0 : index
    %c1_86 = arith.constant 1 : index
    %c1_87 = arith.constant 1 : index
    %c0_88 = arith.constant 0 : index
    %116 = vector.load %arg14[%c0_85, %c1_86, %c1_87, %c0_88] : memref<2x6x10x512xf32, #tpu.memory_space<vmem>>, vector<2x4x8x512xf32>
    %117 = vector.shape_cast %116 : vector<2x4x8x512xf32> to vector<64x512xf32>
    %118 = arith.truncf %117 : vector<64x512xf32> to vector<64x512xbf16>
    %c2048 = arith.constant 2048 : index
    %c0_89 = arith.constant 0 : index
    %119 = vector.load %arg11[%c2048, %c0_89] : memref<4608x128xbf16, #tpu.memory_space<vmem>>, vector<512x128xbf16>
    %cst_90 = arith.constant dense<0.000000e+00> : vector<64x128xf32>
    %120 = tpu.matmul %118, %119, %cst_90 {dimension_numbers = #tpu.dot_dimension_numbers<[1], [0], [0], [1], [0, 0, 1, 1], [], []>} : vector<64x512xbf16>, vector<512x128xbf16>, vector<64x128xf32> -> vector<64x128xf32>
    %121 = arith.addf %115, %120 : vector<64x128xf32>
    %c0_91 = arith.constant 0 : index
    %c1_92 = arith.constant 1 : index
    %c2_93 = arith.constant 2 : index
    %c0_94 = arith.constant 0 : index
    %122 = vector.load %arg14[%c0_91, %c1_92, %c2_93, %c0_94] : memref<2x6x10x512xf32, #tpu.memory_space<vmem>>, vector<2x4x8x512xf32>
    %123 = vector.shape_cast %122 : vector<2x4x8x512xf32> to vector<64x512xf32>
    %124 = arith.truncf %123 : vector<64x512xf32> to vector<64x512xbf16>
    %c2560 = arith.constant 2560 : index
    %c0_95 = arith.constant 0 : index
    %125 = vector.load %arg11[%c2560, %c0_95] : memref<4608x128xbf16, #tpu.memory_space<vmem>>, vector<512x128xbf16>
    %cst_96 = arith.constant dense<0.000000e+00> : vector<64x128xf32>
    %126 = tpu.matmul %124, %125, %cst_96 {dimension_numbers = #tpu.dot_dimension_numbers<[1], [0], [0], [1], [0, 0, 1, 1], [], []>} : vector<64x512xbf16>, vector<512x128xbf16>, vector<64x128xf32> -> vector<64x128xf32>
    %127 = arith.addf %121, %126 : vector<64x128xf32>
    %c0_97 = arith.constant 0 : index
    %c2_98 = arith.constant 2 : index
    %c0_99 = arith.constant 0 : index
    %c0_100 = arith.constant 0 : index
    %128 = vector.load %arg14[%c0_97, %c2_98, %c0_99, %c0_100] : memref<2x6x10x512xf32, #tpu.memory_space<vmem>>, vector<2x4x8x512xf32>
    %129 = vector.shape_cast %128 : vector<2x4x8x512xf32> to vector<64x512xf32>
    %130 = arith.truncf %129 : vector<64x512xf32> to vector<64x512xbf16>
    %c3072 = arith.constant 3072 : index
    %c0_101 = arith.constant 0 : index
    %131 = vector.load %arg11[%c3072, %c0_101] : memref<4608x128xbf16, #tpu.memory_space<vmem>>, vector<512x128xbf16>
    %cst_102 = arith.constant dense<0.000000e+00> : vector<64x128xf32>
    %132 = tpu.matmul %130, %131, %cst_102 {dimension_numbers = #tpu.dot_dimension_numbers<[1], [0], [0], [1], [0, 0, 1, 1], [], []>} : vector<64x512xbf16>, vector<512x128xbf16>, vector<64x128xf32> -> vector<64x128xf32>
    %133 = arith.addf %127, %132 : vector<64x128xf32>
    %c0_103 = arith.constant 0 : index
    %c2_104 = arith.constant 2 : index
    %c1_105 = arith.constant 1 : index
    %c0_106 = arith.constant 0 : index
    %134 = vector.load %arg14[%c0_103, %c2_104, %c1_105, %c0_106] : memref<2x6x10x512xf32, #tpu.memory_space<vmem>>, vector<2x4x8x512xf32>
    %135 = vector.shape_cast %134 : vector<2x4x8x512xf32> to vector<64x512xf32>
    %136 = arith.truncf %135 : vector<64x512xf32> to vector<64x512xbf16>
    %c3584 = arith.constant 3584 : index
    %c0_107 = arith.constant 0 : index
    %137 = vector.load %arg11[%c3584, %c0_107] : memref<4608x128xbf16, #tpu.memory_space<vmem>>, vector<512x128xbf16>
    %cst_108 = arith.constant dense<0.000000e+00> : vector<64x128xf32>
    %138 = tpu.matmul %136, %137, %cst_108 {dimension_numbers = #tpu.dot_dimension_numbers<[1], [0], [0], [1], [0, 0, 1, 1], [], []>} : vector<64x512xbf16>, vector<512x128xbf16>, vector<64x128xf32> -> vector<64x128xf32>
    %139 = arith.addf %133, %138 : vector<64x128xf32>
    %c0_109 = arith.constant 0 : index
    %c2_110 = arith.constant 2 : index
    %c2_111 = arith.constant 2 : index
    %c0_112 = arith.constant 0 : index
    %140 = vector.load %arg14[%c0_109, %c2_110, %c2_111, %c0_112] : memref<2x6x10x512xf32, #tpu.memory_space<vmem>>, vector<2x4x8x512xf32>
    %141 = vector.shape_cast %140 : vector<2x4x8x512xf32> to vector<64x512xf32>
    %142 = arith.truncf %141 : vector<64x512xf32> to vector<64x512xbf16>
    %c4096 = arith.constant 4096 : index
    %c0_113 = arith.constant 0 : index
    %143 = vector.load %arg11[%c4096, %c0_113] : memref<4608x128xbf16, #tpu.memory_space<vmem>>, vector<512x128xbf16>
    %cst_114 = arith.constant dense<0.000000e+00> : vector<64x128xf32>
    %144 = tpu.matmul %142, %143, %cst_114 {dimension_numbers = #tpu.dot_dimension_numbers<[1], [0], [0], [1], [0, 0, 1, 1], [], []>} : vector<64x512xbf16>, vector<512x128xbf16>, vector<64x128xf32> -> vector<64x128xf32>
    %145 = arith.addf %139, %144 : vector<64x128xf32>
    %c0_115 = arith.constant 0 : index
    %c0_116 = arith.constant 0 : index
    %146 = vector.load %arg12[%c0_115, %c0_116] : memref<1x128xf32, #tpu.memory_space<vmem>>, vector<1x128xf32>
    %147 = vector.broadcast %146 : vector<1x128xf32> to vector<64x128xf32>
    %148 = arith.addf %145, %147 : vector<64x128xf32>
    %c0_117 = arith.constant 0 : index
    %c0_118 = arith.constant 0 : index
    %149 = vector.load %arg13[%c0_117, %c0_118] : memref<64x128xf32, #tpu.memory_space<vmem>>, vector<64x128xf32>
    tpu.vector_store %arg13[%c0_117, %c0_118], %148 {strides = array<i32>} : memref<64x128xf32, #tpu.memory_space<vmem>>, vector<64x128xf32>,
    return
  }
}

</mosaic_0001>

<bundles_post_ra>
// kernel: tile.24
= control target key start
LH: loop header
LB: loop body
LE: loop exit
PB: predicated region body
PF: predicated region fallthrough
CT: control target
= control target key end

     0   :  { %s69_s8 = smov 28   ;;  %s70_s11 = smov 20   ;;  %vm3_vm0 = vcmask 31744   ;;  %vm9_vm1 = vcmask 261344   ;;  %vm15_vm2 = vcmask 228544   ;;  %vm21_vm3 = vcmask 195744   ;;  %s113_s0 = inlined_call_operand.vmem [shape: f32[4,8,4], index: 0, kind: input, shape index: {}]   ;;  %s114_s1 = inlined_call_operand.vmem [shape: f32[4,32], index: 1, kind: output, shape index: {}]  }
   0x1   :  { %v55_v0 = vld [vmem:[%s113_s0 + $0x7] ss:$8 sm:$0xf]   ;;  %v57_v1 = vld [vmem:[%s113_s0 + $0x5] ss:$8 sm:$0xf]  }
   0x2   :  { %7 = vrot.lane.b32.xlu0 %v55_v0, %s69_s8  ;;  %19 = vrot.lane.b32.xlu1 %v57_v1, %s70_s11  ;;  %v56_v2 = vld [vmem:[%s113_s0 + $0x6] ss:$8 sm:$0xf]   ;;  %v58_v3 = vld [vmem:[%s113_s0 + $0x4] ss:$8 sm:$0xf]  }
   0x3   :  { %s71_s16 = smov 24   ;;  %v2_v4 = vld [vmem:[%s113_s0] ss:$8 sm:$0xf]   ;;  %s72_s19 = smov 16   ;;  %vm27_vm4 = vcmask 162944  }
   0x4   :  { %v59_v5 = vld [vmem:[%s113_s0 + $0x3] ss:$8 sm:$0xf]   ;;  %4 = vst.msk [vmem:[#allocation0] sm:$0xf] %vm3_vm0, %v2_v4   ;;  %s73_s24 = smov 12  }
   0x5   :  { %v60_v6 = vld [vmem:[%s113_s0 + $0x2] ss:$8 sm:$0xf]   ;;  %s74_s25 = smov 8   ;;  %vm33_vm5 = vcmask 130144   ;;  %vm39_vm6 = vcmask 97344  }
   0x6   :  { %13 = vrot.lane.b32.xlu0 %v56_v2, %s71_s16  ;;  %25 = vrot.lane.b32.xlu1 %v58_v3, %s72_s19  ;;  %v61_v7 = vld [vmem:[%s113_s0 + $0x1] ss:$8 sm:$0xf]   ;;  %s75_s0 = smov 4   ;;  %vm45_vm7 = vcmask 64544  }
   0xa   :  { %31 = vrot.lane.b32.xlu0 %v59_v5, %s73_s24  ;;  %37 = vrot.lane.b32.xlu1 %v60_v6, %s74_s25 }
   0xe   :  { %43 = vrot.lane.b32.xlu0 %v61_v7, %s75_s0 }
  0x74   :  { %v8_v8 = vpop.permute.xlu0 %7   ;;  %v20_v9 = vpop.permute.xlu1 %19  }
  0x75   :  { %10 = vst.msk [vmem:[#allocation0] sm:$0xf] %vm9_vm1, %v8_v8  }
  0x78   :  { %v14_v10 = vpop.permute.xlu0 %13   ;;  %v26_v11 = vpop.permute.xlu1 %25  }
  0x79   :  { %16 = vst.msk [vmem:[#allocation0] sm:$0xf] %vm15_vm2, %v14_v10  }
  0x7a   :  { %22 = vst.msk [vmem:[#allocation0] sm:$0xf] %vm21_vm3, %v20_v9  }
  0x7b   :  { %28 = vst.msk [vmem:[#allocation0] sm:$0xf] %vm27_vm4, %v26_v11  }
  0x7c   :  { %v32_v12 = vpop.permute.xlu0 %31   ;;  %v38_v13 = vpop.permute.xlu1 %37  }
  0x7d   :  { %34 = vst.msk [vmem:[#allocation0] sm:$0xf] %vm33_vm5, %v32_v12  }
  0x7e   :  { %40 = vst.msk [vmem:[#allocation0] sm:$0xf] %vm39_vm6, %v38_v13  }
  0x80   :  { %v44_v14 = vpop.permute.xlu0 %43  }
  0x81   :  { %46 = vst.msk [vmem:[#allocation0] sm:$0xf] %vm45_vm7, %v44_v14  }
  0x88   :  { %v51_v15 = vld [vmem:[#allocation0] sm:$0xf] }
  0x89   :  { %54 = vst [vmem:[%s114_s1] sm:$0xf] %v51_v15 }

// kernel: tile.33
= control target key start
LH: loop header
LB: loop body
LE: loop exit
PB: predicated region body
PF: predicated region fallthrough
CT: control target
= control target key end

     0   :  { %s22_s0 = inlined_call_operand.vmem [shape: f32[64], index: 0, kind: input, shape index: {}]   ;;  %s23_s1 = inlined_call_operand.vmem [shape: f32[8,64], index: 1, kind: output, shape index: {}]  }
   0x1   :  { %v4_v0 = vld [vmem:[%s22_s0] ss:$0 sm:$0xff] }
   0x2   :  { %5 = vst [vmem:[%s23_s1] sm:$0xff] %v4_v0 }

// kernel: tile.34
= control target key start
LH: loop header
LB: loop body
LE: loop exit
PB: predicated region body
PF: predicated region fallthrough
CT: control target
= control target key end

     0   :  { %vm3_vm0 = vcmask 523264   ;;  %s46_s8 = smov 64   ;;  %vm9_vm1 = vcmask 1048064   ;;  %s75_s0 = inlined_call_operand.vmem [shape: f32[8,64], index: 0, kind: input, shape index: {}]   ;;  %s76_s1 = inlined_call_operand.vmem [shape: f32[1,512], index: 1, kind: output, shape index: {}]  }
   0x1   :  { %v41_v0 = vld [vmem:[%s75_s0 + $0x1] ss:$2 sm:$0xf]   ;;  %v2_v1 = vld [vmem:[%s75_s0] ss:$2 sm:$0xf]  }
   0x2   :  { %7 = vrot.lane.b32.xlu0 %v41_v0, %s46_s8  ;;  %4 = vst.msk [vmem:[#allocation0] ss:$8 sm:$0xf] %vm3_vm0, %v2_v1  }
  0x74   :  { %v8_v2 = vpop.permute.xlu0 %7  }
  0x75   :  { %10 = vst.msk [vmem:[#allocation0] ss:$8 sm:$0xf] %vm9_vm1, %v8_v2  }
  0x7c   :  { %v15_v3 = vld [vmem:[#allocation0] sm:$0x1]  ;;  %v20_v4 = vld [vmem:[#allocation0 + $0x8] sm:$0x1]  ;;  %v26_v5 = vld [vmem:[#allocation0 + $0x10] sm:$0x1] }
  0x7d   :  { %18 = vst [vmem:[%s76_s1] sm:$0x1] %v15_v3  ;;  %42 = vst [vmem:[%s76_s1 + $0x1] sm:$0x1] %v20_v4  ;;  %v33_v6 = vld [vmem:[#allocation0 + $0x18] sm:$0x1] }
  0x7e   :  { %43 = vst [vmem:[%s76_s1 + $0x2] sm:$0x1] %v26_v5  ;;  %44 = vst [vmem:[%s76_s1 + $0x3] sm:$0x1] %v33_v6 }

// kernel: tile.38
= control target key start
LH: loop header
LB: loop body
LE: loop exit
PB: predicated region body
PF: predicated region fallthrough
CT: control target
= control target key end

     0   :  { %s22_s0 = inlined_call_operand.vmem [shape: f32[16], index: 0, kind: input, shape index: {}]   ;;  %s23_s1 = inlined_call_operand.vmem [shape: f32[8,16], index: 1, kind: output, shape index: {}]  }
   0x1   :  { %v4_v0 = vld [vmem:[%s22_s0] ss:$0 sm:$0xff] }
   0x2   :  { %5 = vst [vmem:[%s23_s1] sm:$0xff] %v4_v0 }

// kernel: tile.39
= control target key start
LH: loop header
LB: loop body
LE: loop exit
PB: predicated region body
PF: predicated region fallthrough
CT: control target
= control target key end

     0   :  { %s69_s10 = smov 112   ;;  %s70_s11 = smov 80   ;;  %vm3_vm0 = vcmask 130048   ;;  %vm9_vm1 = vcmask 1048448   ;;  %vm15_vm2 = vcmask 917248   ;;  %vm21_vm3 = vcmask 786048   ;;  %s113_s0 = inlined_call_operand.vmem [shape: f32[8,16], index: 0, kind: input, shape index: {}]   ;;  %s114_s1 = inlined_call_operand.vmem [shape: f32[1,128], index: 1, kind: output, shape index: {}]  }
   0x1   :  { %v55_v0 = vld [vmem:[%s113_s0 + $0x7] sm:$0x1]   ;;  %v57_v1 = vld [vmem:[%s113_s0 + $0x5] sm:$0x1]   ;;  %v56_v2 = vld [vmem:[%s113_s0 + $0x6] sm:$0x1]  }
   0x2   :  { %7 = vrot.lane.b32.xlu0 %v55_v0, %s69_s10  ;;  %19 = vrot.lane.b32.xlu1 %v57_v1, %s70_s11  ;;  %v58_v3 = vld [vmem:[%s113_s0 + $0x4] sm:$0x1]   ;;  %v2_v4 = vld [vmem:[%s113_s0] sm:$0x1]   ;;  %s71_s18 = smov 96   ;;  %s72_s19 = smov 64  }
   0x3   :  { %4 = vst.msk [vmem:[#allocation0] sm:$0x1] %vm3_vm0, %v2_v4   ;;  %v59_v5 = vld [vmem:[%s113_s0 + $0x3] sm:$0x1]   ;;  %v60_v6 = vld [vmem:[%s113_s0 + $0x2] sm:$0x1]  }
   0x4   :  { %s73_s24 = smov 48   ;;  %s74_s25 = smov 32   ;;  %v61_v7 = vld [vmem:[%s113_s0 + $0x1] sm:$0x1]   ;;  %vm27_vm4 = vcmask 654848   ;;  %vm33_vm5 = vcmask 523648  }
   0x5   :  { %s75_s0 = smov 16   ;;  %vm39_vm6 = vcmask 392448   ;;  %vm45_vm7 = vcmask 261248  }
   0x6   :  { %13 = vrot.lane.b32.xlu0 %v56_v2, %s71_s18  ;;  %25 = vrot.lane.b32.xlu1 %v58_v3, %s72_s19 }
   0xa   :  { %31 = vrot.lane.b32.xlu0 %v59_v5, %s73_s24  ;;  %37 = vrot.lane.b32.xlu1 %v60_v6, %s74_s25 }
   0xe   :  { %43 = vrot.lane.b32.xlu0 %v61_v7, %s75_s0 }
  0x74   :  { %v8_v8 = vpop.permute.xlu0 %7   ;;  %v20_v9 = vpop.permute.xlu1 %19  }
  0x75   :  { %10 = vst.msk [vmem:[#allocation0] sm:$0x1] %vm9_vm1, %v8_v8  }
  0x78   :  { %v14_v10 = vpop.permute.xlu0 %13   ;;  %v26_v11 = vpop.permute.xlu1 %25  }
  0x79   :  { %16 = vst.msk [vmem:[#allocation0] sm:$0x1] %vm15_vm2, %v14_v10  }
  0x7a   :  { %22 = vst.msk [vmem:[#allocation0] sm:$0x1] %vm21_vm3, %v20_v9  }
  0x7b   :  { %28 = vst.msk [vmem:[#allocation0] sm:$0x1] %vm27_vm4, %v26_v11  }
  0x7c   :  { %v32_v12 = vpop.permute.xlu0 %31   ;;  %v38_v13 = vpop.permute.xlu1 %37  }
  0x7d   :  { %34 = vst.msk [vmem:[#allocation0] sm:$0x1] %vm33_vm5, %v32_v12  }
  0x7e   :  { %40 = vst.msk [vmem:[#allocation0] sm:$0x1] %vm39_vm6, %v38_v13  }
  0x80   :  { %v44_v14 = vpop.permute.xlu0 %43  }
  0x81   :  { %46 = vst.msk [vmem:[#allocation0] sm:$0x1] %vm45_vm7, %v44_v14  }
  0x88   :  { %v51_v15 = vld [vmem:[#allocation0] sm:$0x1] }
  0x89   :  { %54 = vst [vmem:[%s114_s1] sm:$0x1] %v51_v15 }

// kernel: dense_block_layer.1
= control target key start
LH: loop header
LB: loop body
LE: loop exit
PB: predicated region body
PF: predicated region fallthrough
CT: control target
= control target key end

     0   :  { %vm53_vm0 = vcmask 261120   ;;  %v8282_v0 = vmov 0.0   ;;  %vm8283_vm1 = vmmov 0   ;;  %vm104_vm2 = vcmask 1040384   ;;  %s11616_s4 = inlined_call_operand.vmem [shape: f32[32,4], index: 4, kind: input, shape index: {}]   ;;  %s11617_s0 = inlined_call_operand.vmem [shape: f32[64,32], index: 0, kind: input, shape index: {}]   ;;  %s11618_s3 = inlined_call_operand.vmem [shape: f32[4,32], index: 3, kind: input, shape index: {}]   ;;  %s11619_s1 = inlined_call_operand.vmem [shape: f32[1,4], index: 1, kind: input, shape index: {}]   ;;  %s11620_s2 = inlined_call_operand.vmem [shape: f32[1,4], index: 2, kind: input, shape index: {}]   ;;  %s11621_s5 = inlined_call_operand.vmem [shape: bf16[32,512], index: 5, kind: input, shape index: {}]   ;;  %s11622_s10 = inlined_call_operand.vmem [shape: f32[512,64], index: 10, kind: input, shape index: {}]   ;;  %s11623_s6 = inlined_call_operand.vmem [shape: f32[1,512], index: 6, kind: input, shape index: {}]   ;;  %s11624_s9 = inlined_call_operand.vmem [shape: f32[64,512], index: 9, kind: input, shape index: {}]   ;;  %s11625_s11 = inlined_call_operand.vmem [shape: bf16[4608,128], index: 11, kind: input, shape index: {}]   ;;  %s11626_s7 = inlined_call_operand.vmem [shape: f32[1,64], index: 7, kind: input, shape index: {}]   ;;  %s11627_s8 = inlined_call_operand.vmem [shape: f32[1,64], index: 8, kind: input, shape index: {}]   ;;  %s11628_s12 = inlined_call_operand.vmem [shape: f32[1,128], index: 12, kind: input, shape index: {}]   ;;  %s11629_s13 = inlined_call_operand.vmem [shape: f32[64,128], index: 13, kind: output, shape index: {}]  }
   0x1   :  { %7955 = vmatprep.subr.mxu0 %v8282_v0  ;;  %1124 = vst [vmem:[#allocation2] sm:$0xff] %v8282_v0  ;;  %1125 = vst [vmem:[#allocation2 + $0x8] sm:$0xff] %v8282_v0  ;;  %v109_v1 = vld [vmem:[%s11616_s4 + $0x18] sm:$0xff]  ;;  %v108_v2 = vld [vmem:[%s11616_s4 + $0x10] sm:$0xff]  ;;  %7963 = vmatprep.mubr.msk.f32.mxu0 %vm8283_vm1, %v8282_v0  ;;  %vm226_vm4 = vcmask 1043456   ;;  %vm222_vm5 = vcmask 31744  }
   0x2   :  { %1126 = vst [vmem:[#allocation2 + $0x10] sm:$0xff] %v8282_v0  ;;  %1127 = vst [vmem:[#allocation2 + $0x18] sm:$0xff] %v8282_v0  ;;  %7956 = vmatpush3.msra.mxu0 %v109_v1  ;;  %v8399_v3 = vld [vmem:[%s11617_s0] sm:$0xff]  ;;  %v8404_v4 = vld [vmem:[%s11617_s0 + $0x8] sm:$0xff]  ;;  %7966 = vmatprep.subr.mxu1 %v8282_v0  ;;  %v197_v1 = vlaneseq  ;;  %vm978_vm6 = vcmask 523264   ;;  %vm1737_vm7 = vcmask 1046528  }
   0x3   :  { %1128 = vst [vmem:[#allocation2 + $0x20] sm:$0x3] %v8282_v0  ;;  %1129 = vst [vmem:[#allocation2 + $0x28] sm:$0x3] %v8282_v0  ;;  %7957 = vmatprep.subr.mxu0 %v8282_v0  ;;  %v107_v5 = vld [vmem:[%s11616_s4 + $0x8] sm:$0xff]  ;;  %v8414_v6 = vld [vmem:[%s11617_s0 + $0x10] sm:$0xff]  ;;  %v75_v10 = vmul.f32 %v8399_v3, %v8399_v3  ;;  %v76_v11 = vmul.f32 %v8404_v4, %v8404_v4  ;;  %7968 = vmatprep.mubr.msk.f32.mxu1 %vm8283_vm1, %v8282_v0 }
   0x4   :  { %1130 = vst [vmem:[#allocation2 + $0x30] sm:$0x3] %v8282_v0  ;;  %1131 = vst [vmem:[#allocation2 + $0x38] sm:$0x3] %v8282_v0  ;;  %v8419_v7 = vld [vmem:[%s11617_s0 + $0x18] sm:$0xff]  ;;  %v54_v8 = vsel %vm53_vm0, %v8399_v3, 0.0  ;;  %7958 = vmatpush3.msra.mxu0 %v108_v2  ;;  %v77_v17 = vmul.f32 %v8414_v6, %v8414_v6 }
   0x5   :  { %1132 = vst [vmem:[#allocation2 + $0x180] sm:$0xff] %v8282_v0  ;;  %1133 = vst [vmem:[#allocation2 + $0x188] sm:$0xff] %v8282_v0  ;;  %v55_v9 = vsel %vm53_vm0, %v8404_v4, 0.0  ;;  %v8433_v12 = vld [vmem:[%s11617_s0 + $0x20] sm:$0xff]  ;;  %v57_v14 = vsel %vm53_vm0, %v8414_v6, 0.0  ;;  %7959 = vmatprep.subr.mxu0 %v8282_v0  ;;  %v59_v16 = vsel %vm53_vm0, %v8419_v7, 0.0  ;;  %v78_v20 = vmul.f32 %v8419_v7, %v8419_v7 }
   0x6   :  { %1134 = vst [vmem:[#allocation2 + $0x190] sm:$0xff] %v8282_v0  ;;  %1135 = vst [vmem:[#allocation2 + $0x198] sm:$0xff] %v8282_v0  ;;  %v56_v13 = vadd.f32 %v55_v9, %v54_v8  ;;  %v106_v15 = vld [vmem:[%s11616_s4] sm:$0xff]  ;;  %7960 = vmatpush3.msra.mxu0 %v107_v5  ;;  %v8448_v18 = vld [vmem:[%s11617_s0 + $0x28] sm:$0xff]  ;;  %v61_v21 = vsel %vm53_vm0, %v8433_v12, 0.0  ;;  %v79_v22 = vmul.f32 %v8433_v12, %v8433_v12  ;;  %v83_v23 = vsel %vm53_vm0, %v75_v10, 0.0 }
   0x7   :  { %1136 = vst [vmem:[#allocation2 + $0x1a0] sm:$0x3] %v8282_v0  ;;  %1137 = vst [vmem:[#allocation2 + $0x1a8] sm:$0x3] %v8282_v0  ;;  %7961 = vmatprep.subr.mxu0 %v8282_v0  ;;  %v84_v24 = vsel %vm53_vm0, %v76_v11, 0.0  ;;  %v8462_v25 = vld [vmem:[%s11617_s0 + $0x30] sm:$0xff]  ;;  %v80_v30 = vmul.f32 %v8448_v18, %v8448_v18 }
   0x8   :  { %1138 = vst [vmem:[#allocation2 + $0x1b0] sm:$0x3] %v8282_v0  ;;  %1139 = vst [vmem:[#allocation2 + $0x1b8] sm:$0x3] %v8282_v0  ;;  %v58_v19 = vadd.f32 %v57_v14, %v56_v13  ;;  %7962 = vmatpush3.msra.mxu0 %v106_v15  ;;  %v85_v27 = vadd.f32 %v84_v24, %v83_v23  ;;  %v86_v28 = vsel %vm53_vm0, %v77_v17, 0.0  ;;  %v63_v29 = vsel %vm53_vm0, %v8448_v18, 0.0 }
   0x9   :  { %1141 = vst [vmem:[#allocation2 + $0x140] sm:$0xff] %v8282_v0  ;;  %1142 = vst [vmem:[#allocation2 + $0x148] sm:$0xff] %v8282_v0  ;;  %v88_v31 = vsel %vm53_vm0, %v78_v20, 0.0  ;;  %v8473_v32 = vld [vmem:[%s11617_s0 + $0x38] sm:$0xff]  ;;  %v65_v35 = vsel %vm53_vm0, %v8462_v25, 0.0  ;;  %v81_v36 = vmul.f32 %v8462_v25, %v8462_v25  ;;  %v90_v37 = vsel %vm53_vm0, %v79_v22, 0.0 }
   0xa   :  { %1143 = vst [vmem:[#allocation2 + $0x150] sm:$0xff] %v8282_v0  ;;  %1144 = vst [vmem:[#allocation2 + $0x158] sm:$0xff] %v8282_v0  ;;  %v60_v26 = vadd.f32 %v59_v16, %v58_v19  ;;  %v87_v34 = vadd.f32 %v86_v28, %v85_v27  ;;  %v67_v40 = vsel %vm53_vm0, %v8473_v32, 0.0  ;;  %v82_v41 = vmul.f32 %v8473_v32, %v8473_v32  ;;  %v221_v5 = vld [vmem:[%s11618_s3] sm:$0xf] }
   0xb   :  { %1145 = vst [vmem:[#allocation2 + $0x160] sm:$0x3] %v8282_v0  ;;  %1146 = vst [vmem:[#allocation2 + $0x168] sm:$0x3] %v8282_v0  ;;  %v92_v42 = vsel %vm53_vm0, %v80_v30, 0.0  ;;  %v94_v45 = vsel %vm53_vm0, %v81_v36, 0.0  ;;  %7967 = vmatpush3.msk.msra.mxu1 %vm226_vm4, %v221_v5 }
   0xc   :  { %1147 = vst [vmem:[#allocation2 + $0x170] sm:$0x3] %v8282_v0  ;;  %1148 = vst [vmem:[#allocation2 + $0x178] sm:$0x3] %v8282_v0  ;;  %v62_v33 = vadd.f32 %v61_v21, %v60_v26  ;;  %v89_v39 = vadd.f32 %v88_v31, %v87_v34  ;;  %v96_v48 = vsel %vm53_vm0, %v82_v41, 0.0  ;;  %vm8489_vm3 = vcmp.lt.s32.totalorder %v197_v1, 512 }
   0xd   :  { %1149 = vst [vmem:[#allocation2 + $0x2c0] sm:$0xff] %v8282_v0  ;;  %1150 = vst [vmem:[#allocation2 + $0x2c8] sm:$0xff] %v8282_v0  ;;  %v8284_v17 = vmov 1966171168   ;;  %v8545_v21 = vshrl.u32 %v197_v1, 7  ;;  %vm2718_vm8 = vcmask 1045504  }
   0xe   :  { %1151 = vst [vmem:[#allocation2 + $0x2d0] sm:$0xff] %v8282_v0  ;;  %1152 = vst [vmem:[#allocation2 + $0x2d8] sm:$0xff] %v8282_v0  ;;  %v64_v38 = vadd.f32 %v63_v29, %v62_v33  ;;  %v91_v44 = vadd.f32 %v90_v37, %v89_v39  ;;  %v195_v19 = vunpack.c.l.s4 %v8284_v17  ;;  %v190_v26 = vld [vmem:[%s11619_s1] sm:$0x1]  ;;  %v7977_v36 = vld [vmem:[%s11621_s5 + $0x24] ss:$16 sps:$4 sm:$0xff]  }
   0xf   :  { %1153 = vst [vmem:[#allocation2 + $0x2e0] sm:$0x3] %v8282_v0  ;;  %1154 = vst [vmem:[#allocation2 + $0x2e8] sm:$0x3] %v8282_v0  ;;  %v211_v29 = vld [vmem:[%s11620_s2] sm:$0x1]  ;;  %430 = vmatprep.subr.bf16.mxu1 %v7977_v36 }
  0x10   :  { %1155 = vst [vmem:[#allocation2 + $0x2f0] sm:$0x3] %v8282_v0  ;;  %1156 = vst [vmem:[#allocation2 + $0x2f8] sm:$0x3] %v8282_v0  ;;  %v66_v43 = vadd.f32 %v65_v35, %v64_v38  ;;  %v93_v47 = vadd.f32 %v92_v42, %v91_v44  ;;  %v196_v20 = vunpack.c.0.s8 %v195_v19  ;;  %v8559_v31 = vsub.s32 0, %v8545_v21  ;;  %v766_v17 = vld [vmem:[%s11622_s10 + $0x1f0] sm:$0xff] }
  0x11   :  { %1162 = vst.msk [vmem:[#allocation2 + $0x40] ss:$8 sm:$0xf] %vm8489_vm3, %v8282_v0  ;;  %1165 = vst.msk [vmem:[#allocation2 + $0x80] ss:$8 sm:$0xf] %vm8489_vm3, %v8282_v0 }
  0x12   :  { %v68_v46 = vadd.f32 %v67_v40, %v66_v43  ;;  %v95_v50 = vadd.f32 %v94_v45, %v93_v47  ;;  %1168 = vst.msk [vmem:[#allocation2 + $0xc0] ss:$8 sm:$0xf] %vm8489_vm3, %v8282_v0  ;;  %1171 = vst.msk [vmem:[#allocation2 + $0x100] ss:$8 sm:$0xf] %vm8489_vm3, %v8282_v0 }
  0x13   :  { %1174 = vst.msk [vmem:[#allocation2 + $0x1c0] ss:$8 sm:$0xf] %vm8489_vm3, %v8282_v0  ;;  %1177 = vst.msk [vmem:[#allocation2 + $0x200] ss:$8 sm:$0xf] %vm8489_vm3, %v8282_v0 }
  0x14   :  { %v69_v49 = vrot.slane %v68_v46, 4  ;;  %v97_v52 = vadd.f32 %v96_v48, %v95_v50  ;;  %1180 = vst.msk [vmem:[#allocation2 + $0x240] ss:$8 sm:$0xf] %vm8489_vm3, %v8282_v0  ;;  %v7975_v37 = vld [vmem:[%s11621_s5 + $0x20] ss:$16 sps:$4 sm:$0xff]  }
  0x15   :  { %1183 = vst.msk [vmem:[#allocation2 + $0x280] ss:$8 sm:$0xf] %vm8489_vm3, %v8282_v0  ;;  %1186 = vst.msk [vmem:[#allocation2 + $0x61] ss:$8 sm:$0xf] %vm8489_vm3, %v8282_v0 }
  0x16   :  { %v70_v51 = vadd.f32 %v69_v49, %v68_v46  ;;  %v98_v54 = vrot.slane %v97_v52, 4  ;;  %1189 = vst.msk [vmem:[#allocation2 + $0xa1] ss:$8 sm:$0xf] %vm8489_vm3, %v8282_v0  ;;  %v7978_v38 = vld [vmem:[%s11621_s5 + $0x28] ss:$16 sps:$4 sm:$0xff]  }
  0x17   :  { %1192 = vst.msk [vmem:[#allocation2 + $0xe1] ss:$8 sm:$0xf] %vm8489_vm3, %v8282_v0  ;;  %1195 = vst.msk [vmem:[#allocation2 + $0x121] ss:$8 sm:$0xf] %vm8489_vm3, %v8282_v0 }
  0x18   :  { %v71_v53 = vrot.slane %v70_v51, 2  ;;  %v99_v56 = vadd.f32 %v98_v54, %v97_v52  ;;  %1198 = vst.msk [vmem:[#allocation2 + $0x1e1] ss:$8 sm:$0xf] %vm8489_vm3, %v8282_v0  ;;  %v7980_v39 = vld [vmem:[%s11621_s5 + $0x2c] ss:$16 sps:$4 sm:$0xff]  }
  0x19   :  { %1201 = vst.msk [vmem:[#allocation2 + $0x221] ss:$8 sm:$0xf] %vm8489_vm3, %v8282_v0  ;;  %1204 = vst.msk [vmem:[#allocation2 + $0x261] ss:$8 sm:$0xf] %vm8489_vm3, %v8282_v0  ;;  %503 = vmatprep.subr.bf16.mxu0 %v7980_v39 }
  0x1a   :  { %v72_v55 = vadd.f32 %v71_v53, %v70_v51  ;;  %v100_v58 = vrot.slane %v99_v56, 2  ;;  %1207 = vst.msk [vmem:[#allocation2 + $0x2a1] ss:$8 sm:$0xf] %vm8489_vm3, %v8282_v0  ;;  %v8548_v0 = vsub.s32 %v196_v20, %v8545_v21  ;;  %v8285_v40 = vmov 0   ;;  %v718_v19 = vld [vmem:[%s11622_s10 + $0x70] sm:$0xff] }
  0x1b   :  { %v7981_v41 = vld [vmem:[%s11621_s5] ss:$16 sps:$4 sm:$0xff]   ;;  %v7983_v42 = vld [vmem:[%s11621_s5 + $0x4] ss:$16 sps:$4 sm:$0xff]   ;;  %v7984_v43 = vld [vmem:[%s11621_s5 + $0x8] ss:$16 sps:$4 sm:$0xff]  }
  0x1c   :  { %v73_v57 = vrot.slane %v72_v55, 1  ;;  %v101_v59 = vadd.f32 %v100_v58, %v99_v56  ;;  %v7986_v44 = vld [vmem:[%s11621_s5 + $0xc] ss:$16 sps:$4 sm:$0xff]   ;;  %v8588_v45 = vsub.s32 1, %v8545_v21  ;;  %v750_v20 = vld [vmem:[%s11622_s10 + $0x170] sm:$0xff] }
  0x1d   :  { %v747_v36 = vld [vmem:[%s11622_s10 + $0x158] sm:$0xff]  ;;  %v714_v39 = vld [vmem:[%s11622_s10 + $0x50] sm:$0xff] }
  0x1e   :  { %v74_v60 = vadd.f32 %v73_v57, %v72_v55  ;;  %v102_v61 = vrot.slane %v101_v59, 1 }
  0x20   :  { %v103_v62 = vadd.f32 %v102_v61, %v101_v59 }
  0x22   :  { %v105_v63 = vsel %vm104_vm2, %v74_v60, %v103_v62 }
  0x23   :  { %7964 = vmatmul.mubr.msk.f32.vlgmr.msra.gmra.mxu0 %vm53_vm0, %v105_v63 }
  0x24   :  { %523 = vmatprep.mubr.bf16.mxu0 %v8285_v40  ;;  %504 = vmatpush1.bf16.msra.mxu0 %v7978_v38  ;;  %v762_v38 = vld [vmem:[%s11622_s10 + $0x1d0] sm:$0xff] }
  0x25   :  { %505 = vmatprep.subr.bf16.mxu0 %v7986_v44  ;;  %v745_v44 = vld [vmem:[%s11622_s10 + $0x148] sm:$0xff] }
  0x28   :  { %506 = vmatpush1.bf16.msra.mxu0 %v7984_v43  ;;  %v713_v43 = vld [vmem:[%s11622_s10 + $0x48] sm:$0xff] }
  0xe3   :  { %v179_v8 = vpop.f32.mrf.mxu0 }
  0xe4   :  { %v183_v9 = vmul.f32 0.001953125, %v179_v8 }
  0xe5   :  { %v7965_v10 = vpop.f32.mrf.mxu0 }
  0xe6   :  { %v184_v11 = vmul.f32 %v183_v9, %v183_v9 }
  0xe8   :  { %v186_v13 = vrot.slane %v184_v11, 7 }
  0xea   :  { %v188_v14 = vsub.f32 %v183_v9, %v186_v13 }
  0xec   :  { %v189_v15 = vmax.f32 %v188_v14, 0.0  ;;  %v719_v14 = vld [vmem:[%s11622_s10 + $0x78] sm:$0xff] }
  0xee   :  { %v191_v16 = vadd.f32 1e-05, %v189_v15  ;;  %v751_v15 = vld [vmem:[%s11622_s10 + $0x178] sm:$0xff] }
  0xf0   :  { %8275 = vrsqrt.f32 %v191_v16  ;;  %v734_v16 = vld [vmem:[%s11622_s10 + $0xf0] sm:$0xff] }
  0xfd   :  { %v8276_v22 = vpop.eup %8275 }
  0xfe   :  { %v200_v23 = vrot.slane %v8276_v22, %v8548_v0  ;;  %v733_v22 = vld [vmem:[%s11622_s10 + $0xe8] sm:$0xff] }
 0x100   :  { %v201_v24 = vcombine.high %v200_v23, %v200_v23  ;;  %v765_v23 = vld [vmem:[%s11622_s10 + $0x1e8] sm:$0xff] }
 0x102   :  { %v208_v27 = vrot.slane %v201_v24, %v8548_v0  ;;  %v717_v24 = vld [vmem:[%s11622_s10 + $0x68] sm:$0xff] }
 0x104   :  { %v210_v28 = vmul.f32 %v208_v27, %v190_v26  ;;  %v749_v26 = vld [vmem:[%s11622_s10 + $0x168] sm:$0xff]  ;;  %v732_v27 = vld [vmem:[%s11622_s10 + $0xe0] sm:$0xff] }
 0x106   :  { %v212_v30 = vmul.f32 %v210_v28, %v183_v9 }
 0x108   :  { %v213_v33 = vsub.f32 %v211_v29, %v212_v30  ;;  %v716_v29 = vld [vmem:[%s11622_s10 + $0x60] sm:$0xff] }
 0x109   :  { %v748_v30 = vld [vmem:[%s11622_s10 + $0x160] sm:$0xff] }
 0x10a   :  { %v218_v34 = vrot.slane %v213_v33, %v8559_v31  ;;  %v731_v33 = vld [vmem:[%s11622_s10 + $0xd8] sm:$0xff] }
 0x10c   :  { %v220_v35 = vsel %vm104_vm2, %v210_v28, %v218_v34  ;;  %v764_v28 = vld [vmem:[%s11622_s10 + $0x1e0] sm:$0xff]  ;;  %v763_v34 = vld [vmem:[%s11622_s10 + $0x1d8] sm:$0xff] }
 0x10d   :  { %7969 = vmatmul.mubr.msk.f32.vlgmr.msra.gmra.mxu1 %vm222_vm5, %v220_v35  ;;  %v715_v35 = vld [vmem:[%s11622_s10 + $0x58] sm:$0xff] }
 0x10e   :  { %450 = vmatprep.mubr.bf16.mxu1 %v8285_v40  ;;  %431 = vmatpush1.bf16.msra.mxu1 %v7975_v37  ;;  %v730_v37 = vld [vmem:[%s11622_s10 + $0xd0] sm:$0xff] }
 0x10f   :  { %432 = vmatprep.subr.bf16.mxu1 %v7983_v42  ;;  %v761_v42 = vld [vmem:[%s11622_s10 + $0x1c8] sm:$0xff] }
 0x112   :  { %433 = vmatpush1.bf16.msra.mxu1 %v7981_v41  ;;  %v729_v41 = vld [vmem:[%s11622_s10 + $0xc8] sm:$0xff] }
 0x1cd   :  { %v296_v46 = vpop.f32.mrf.mxu1 }
 0x1ce   :  { %v303_v47 = vrot.slane %v296_v46, %v8559_v31  ;;  %v315_v49 = vrot.slane %v296_v46, %v8588_v45  ;;  %v728_v46 = vld [vmem:[%s11622_s10 + $0xc0] sm:$0xff] }
 0x1cf   :  { %v7970_v48 = vpop.f32.mrf.mxu1 }
 0x1d0   :  { %v304_v50 = vmul.f32 %v303_v47, %v8399_v3  ;;  %v305_v51 = vmul.f32 %v303_v47, %v8404_v4  ;;  %v306_v54 = vmul.f32 %v303_v47, %v8414_v6  ;;  %v307_v55 = vmul.f32 %v303_v47, %v8419_v7  ;;  %v712_v48 = vld [vmem:[%s11622_s10 + $0x40] sm:$0xff] }
 0x1d1   :  { %v308_v4 = vmul.f32 %v303_v47, %v8433_v12  ;;  %v309_v62 = vmul.f32 %v303_v47, %v8448_v18  ;;  %v310_v5 = vmul.f32 %v303_v47, %v8462_v25  ;;  %v311_v8 = vmul.f32 %v303_v47, %v8473_v32  ;;  %v735_v25 = vld [vmem:[%s11622_s10 + $0xf8] sm:$0xff]  ;;  %v760_v47 = vld [vmem:[%s11622_s10 + $0x1c0] sm:$0xff] }
 0x1d2   :  { %v316_v52 = vadd.f32 %v315_v49, %v304_v50  ;;  %v317_v53 = vadd.f32 %v315_v49, %v305_v51  ;;  %v318_v59 = vadd.f32 %v315_v49, %v306_v54  ;;  %v319_v60 = vadd.f32 %v315_v49, %v307_v55  ;;  %v767_v32 = vld [vmem:[%s11622_s10 + $0x1f8] sm:$0xff]  ;;  %7165 = vmatprep.subr.mxu1 %v735_v25  ;;  %v726_v54 = vld [vmem:[%s11622_s10 + $0xb0] sm:$0xff]  ;;  %v720_v25 = vld [vmem:[%s11622_s10 + $0x80] sm:$0xff] }
 0x1d3   :  { %v320_v63 = vadd.f32 %v315_v49, %v308_v4  ;;  %v321_v7 = vadd.f32 %v315_v49, %v309_v62  ;;  %v322_v10 = vadd.f32 %v315_v49, %v310_v5  ;;  %v323_v12 = vadd.f32 %v315_v49, %v311_v8  ;;  %7200 = vmatprep.subr.mxu0 %v767_v32  ;;  %v744_v49 = vld [vmem:[%s11622_s10 + $0x140] sm:$0xff]  ;;  %v727_v50 = vld [vmem:[%s11622_s10 + $0xb8] sm:$0xff]  ;;  %v758_v55 = vld [vmem:[%s11622_s10 + $0x1b0] sm:$0xff] }
 0x1d4   :  { %v324_v56 = vmax.f32 %v316_v52, 0.0  ;;  %v325_v57 = vmax.f32 %v317_v53, 0.0  ;;  %v326_v3 = vmax.f32 %v318_v59, 0.0  ;;  %v327_v61 = vmax.f32 %v319_v60, 0.0  ;;  %v759_v51 = vld [vmem:[%s11622_s10 + $0x1b8] sm:$0xff]  ;;  %v757_v59 = vld [vmem:[%s11622_s10 + $0x1a8] sm:$0xff] }
 0x1d5   :  { %v328_v1 = vmax.f32 %v320_v63, 0.0  ;;  %v329_v2 = vmax.f32 %v321_v7, 0.0  ;;  %v330_v18 = vmax.f32 %v322_v10, 0.0  ;;  %v331_v11 = vmax.f32 %v323_v12, 0.0  ;;  %v711_v52 = vld [vmem:[%s11622_s10 + $0x38] sm:$0xff]  ;;  %v709_v60 = vld [vmem:[%s11622_s10 + $0x28] sm:$0xff] }
 0x1d6   :  { %v332_v58 = vpack.c.bf16 %v325_v57, %v324_v56  ;;  %v333_v6 = vpack.c.bf16 %v327_v61, %v326_v3  ;;  %v743_v53 = vld [vmem:[%s11622_s10 + $0x138] sm:$0xff]  ;;  %v710_v56 = vld [vmem:[%s11622_s10 + $0x30] sm:$0xff]  ;;  %v741_v3 = vld [vmem:[%s11622_s10 + $0x128] sm:$0xff] }
 0x1d7   :  { %v334_v9 = vpack.c.bf16 %v329_v2, %v328_v1  ;;  %v335_v13 = vpack.c.bf16 %v331_v11, %v330_v18  ;;  %v742_v57 = vld [vmem:[%s11622_s10 + $0x130] sm:$0xff]  ;;  %v724_v61 = vld [vmem:[%s11622_s10 + $0xa0] sm:$0xff]  ;;  %v723_v63 = vld [vmem:[%s11622_s10 + $0x98] sm:$0xff] }
 0x1d8   :  { %6859 = vmatmul.mubr.msk.bf16.vlgmr.msra.gmra.mxu1 %vm53_vm0, %v332_v58  ;;  %6863 = vmatmul.mubr.msk.bf16.vlgmr.msra.gmra.mxu0 %vm53_vm0, %v332_v58  ;;  %v725_v58 = vld [vmem:[%s11622_s10 + $0xa8] sm:$0xff]  ;;  %v756_v4 = vld [vmem:[%s11622_s10 + $0x1a0] sm:$0xff]  ;;  %v755_v7 = vld [vmem:[%s11622_s10 + $0x198] sm:$0xff] }
 0x1d9   :  { %460 = vmatprep.mubr.bf16.mxu1 %v8285_v40  ;;  %533 = vmatprep.mubr.bf16.mxu0 %v8285_v40  ;;  %v708_v62 = vld [vmem:[%s11622_s10 + $0x20] sm:$0xff]  ;;  %v707_v1 = vld [vmem:[%s11622_s10 + $0x18] sm:$0xff]  ;;  %v722_v5 = vld [vmem:[%s11622_s10 + $0x90] sm:$0xff] }
 0x1da   :  { %7166 = vmatpush3.msra.mxu1 %v719_v14  ;;  %7201 = vmatpush3.msra.mxu0 %v751_v15  ;;  %v739_v2 = vld [vmem:[%s11622_s10 + $0x118] sm:$0xff]  ;;  %v754_v8 = vld [vmem:[%s11622_s10 + $0x190] sm:$0xff]  ;;  %v721_v12 = vld [vmem:[%s11622_s10 + $0x88] sm:$0xff] }
 0x1db   :  { %7167 = vmatprep.subr.mxu1 %v734_v16  ;;  %7202 = vmatprep.subr.mxu0 %v766_v17  ;;  %v738_v10 = vld [vmem:[%s11622_s10 + $0x110] sm:$0xff]  ;;  %v753_v18 = vld [vmem:[%s11622_s10 + $0x188] sm:$0xff]  ;;  %v752_v32 = vld [vmem:[%s11622_s10 + $0x180] sm:$0xff]  ;;  %v356_v16 = vsub.s32 2, %v8545_v21 }
 0x1dc   :  { %7168 = vmatpush3.msra.mxu1 %v718_v19  ;;  %7203 = vmatpush3.msra.mxu0 %v750_v20  ;;  %v705_v11 = vld [vmem:[%s11622_s10 + $0x8] sm:$0xff]  ;;  %v704_v14 = vld [vmem:[%s11622_s10] sm:$0xff]  ;;  %v360_v19 = vsub.s32 3, %v8545_v21 }
 0x1dd   :  { %7169 = vmatprep.subr.mxu1 %v733_v22  ;;  %7204 = vmatprep.subr.mxu0 %v765_v23  ;;  %v736_v15 = vld [vmem:[%s11622_s10 + $0x100] sm:$0xff] }
 0x1de   :  { %7170 = vmatpush3.msra.mxu1 %v717_v24  ;;  %7205 = vmatpush3.msra.mxu0 %v749_v26  ;;  %v344_v17 = vld [vmem:[%s11623_s6] sm:$0xf] }
 0x1df   :  { %7171 = vmatprep.subr.mxu1 %v732_v27  ;;  %7206 = vmatprep.subr.mxu0 %v764_v28  ;;  %v8806_v20 = vrot.slane %v344_v17, %v8559_v31  ;;  %v8808_v22 = vrot.slane %v344_v17, %v356_v16  ;;  %v8811_v23 = vrot.slane %v344_v17, %v8588_v45 }
 0x1e0   :  { %6860 = vmatmul.mubr.msk.bf16.gmra.mxu1 %vm53_vm0, %v333_v6  ;;  %6864 = vmatmul.mubr.msk.bf16.gmra.mxu0 %vm53_vm0, %v333_v6  ;;  %v740_v6 = vld [vmem:[%s11622_s10 + $0x120] sm:$0xff]  ;;  %v8813_v24 = vrot.slane %v344_v17, %v360_v19 }
 0x1e1   :  { %470 = vmatprep.mubr.bf16.mxu1 %v8285_v40  ;;  %543 = vmatprep.mubr.bf16.mxu0 %v8285_v40 }
 0x1e2   :  { %7172 = vmatpush3.msra.mxu1 %v716_v29  ;;  %7207 = vmatpush3.msra.mxu0 %v748_v30 }
 0x1e3   :  { %7173 = vmatprep.subr.mxu1 %v731_v33  ;;  %7208 = vmatprep.subr.mxu0 %v763_v34 }
 0x1e4   :  { %7174 = vmatpush3.msra.mxu1 %v715_v35  ;;  %7209 = vmatpush3.msra.mxu0 %v747_v36 }
 0x1e5   :  { %7175 = vmatprep.subr.mxu1 %v730_v37  ;;  %7210 = vmatprep.subr.mxu0 %v762_v38 }
 0x1e6   :  { %7176 = vmatpush3.msra.mxu1 %v714_v39 }
 0x1e7   :  { %7177 = vmatprep.subr.mxu1 %v729_v41 }
 0x1e8   :  { %6861 = vmatmul.mubr.msk.bf16.gmra.mxu1 %vm53_vm0, %v334_v9  ;;  %6865 = vmatmul.mubr.msk.bf16.gmra.mxu0 %vm53_vm0, %v334_v9  ;;  %v706_v9 = vld [vmem:[%s11622_s10 + $0x10] sm:$0xff] }
 0x1e9   :  { %480 = vmatprep.mubr.bf16.mxu1 %v8285_v40  ;;  %553 = vmatprep.mubr.bf16.mxu0 %v8285_v40  ;;  %v746_v40 = vld [vmem:[%s11622_s10 + $0x150] sm:$0xff] }
 0x1ea   :  { %7211 = vmatpush3.msra.mxu0 %v746_v40  ;;  %7178 = vmatpush3.msra.mxu1 %v713_v43 }
 0x1eb   :  { %7212 = vmatprep.subr.mxu0 %v761_v42  ;;  %7179 = vmatprep.subr.mxu1 %v728_v46 }
 0x1ec   :  { %7213 = vmatpush3.msra.mxu0 %v745_v44  ;;  %7180 = vmatpush3.msra.mxu1 %v712_v48 }
 0x1ed   :  { %7214 = vmatprep.subr.mxu0 %v760_v47  ;;  %7181 = vmatprep.subr.mxu1 %v727_v50 }
 0x1ee   :  { %7215 = vmatpush3.msra.mxu0 %v744_v49  ;;  %7182 = vmatpush3.msra.mxu1 %v711_v52 }
 0x1ef   :  { %7216 = vmatprep.subr.mxu0 %v759_v51  ;;  %7183 = vmatprep.subr.mxu1 %v726_v54 }
 0x1f0   :  { %6862 = vmatmul.mubr.msk.bf16.gmra.mxu1 %vm53_vm0, %v335_v13  ;;  %6866 = vmatmul.mubr.msk.bf16.gmra.mxu0 %vm53_vm0, %v335_v13  ;;  %v737_v13 = vld [vmem:[%s11622_s10 + $0x108] sm:$0xff] }
 0x1f1   :  { %7217 = vmatpush3.msra.mxu0 %v743_v53  ;;  %7184 = vmatpush3.msra.mxu1 %v710_v56 }
 0x1f2   :  { %7218 = vmatprep.subr.mxu0 %v758_v55  ;;  %7185 = vmatprep.subr.mxu1 %v725_v58 }
 0x1f3   :  { %7219 = vmatpush3.msra.mxu0 %v742_v57  ;;  %7186 = vmatpush3.msra.mxu1 %v709_v60 }
 0x1f4   :  { %7220 = vmatprep.subr.mxu0 %v757_v59  ;;  %7187 = vmatprep.subr.mxu1 %v724_v61 }
 0x1f5   :  { %7221 = vmatpush3.msra.mxu0 %v741_v3  ;;  %7188 = vmatpush3.msra.mxu1 %v708_v62 }
 0x1f6   :  { %7222 = vmatprep.subr.mxu0 %v756_v4  ;;  %7189 = vmatprep.subr.mxu1 %v723_v63 }
 0x1f7   :  { %7223 = vmatpush3.msra.mxu0 %v740_v6  ;;  %7190 = vmatpush3.msra.mxu1 %v707_v1 }
 0x1f8   :  { %7224 = vmatprep.subr.mxu0 %v755_v7  ;;  %7191 = vmatprep.subr.mxu1 %v722_v5 }
 0x1f9   :  { %7225 = vmatpush3.msra.mxu0 %v739_v2  ;;  %7192 = vmatpush3.msra.mxu1 %v706_v9 }
 0x1fa   :  { %7226 = vmatprep.subr.mxu0 %v754_v8  ;;  %7193 = vmatprep.subr.mxu1 %v721_v12 }
 0x1fb   :  { %7227 = vmatpush3.msra.mxu0 %v738_v10  ;;  %7194 = vmatpush3.msra.mxu1 %v705_v11 }
 0x1fc   :  { %7228 = vmatprep.subr.mxu0 %v753_v18  ;;  %7195 = vmatprep.subr.mxu1 %v720_v25 }
 0x1fd   :  { %7229 = vmatpush3.msra.mxu0 %v737_v13  ;;  %7196 = vmatpush3.msra.mxu1 %v704_v14 }
 0x1fe   :  { %7230 = vmatprep.subr.mxu0 %v752_v32 }
 0x1ff   :  { %7231 = vmatpush3.msra.mxu0 %v736_v15 }
 0x298   :  { %v452_v26 = vpop.f32.mrf.mxu1  ;;  %v525_v27 = vpop.f32.mrf.mxu0 }
 0x299   :  { %v8816_v28 = vadd.f32 %v452_v26, %v8806_v20  ;;  %v8819_v29 = vadd.f32 %v525_v27, %v8808_v22 }
 0x29a   :  { %v454_v30 = vpop.f32.mrf.mxu1  ;;  %v527_v21 = vpop.f32.mrf.mxu0 }
 0x29b   :  { %v8822_v33 = vadd.f32 %v454_v30, %v8811_v23  ;;  %v8825_v34 = vadd.f32 %v527_v21, %v8813_v24  ;;  %v616_v39 = vmul.f32 %v8816_v28, %v8816_v28  ;;  %v618_v40 = vmul.f32 %v8819_v29, %v8819_v29 }
 0x29c   :  { %v456_v35 = vpop.f32.mrf.mxu1  ;;  %v529_v36 = vpop.f32.mrf.mxu0 }
 0x29d   :  { %v8828_v37 = vadd.f32 %v456_v35, %v8806_v20  ;;  %v8831_v38 = vadd.f32 %v529_v36, %v8808_v22  ;;  %v617_v43 = vmul.f32 %v8822_v33, %v8822_v33  ;;  %v619_v44 = vmul.f32 %v8825_v34, %v8825_v34 }
 0x29e   :  { %v458_v41 = vpop.f32.mrf.mxu1  ;;  %v531_v42 = vpop.f32.mrf.mxu0 }
 0x29f   :  { %v620_v46 = vmul.f32 %v8828_v37, %v8828_v37  ;;  %v622_v47 = vmul.f32 %v8831_v38, %v8831_v38  ;;  %v564_v48 = vadd.f32 %v8828_v37, %v8816_v28  ;;  %v590_v49 = vadd.f32 %v8831_v38, %v8819_v29 }
 0x2a0   :  { %v8850_v50 = vadd.f32 %v458_v41, %v8811_v23  ;;  %v8853_v51 = vadd.f32 %v531_v42, %v8813_v24  ;;  %v462_v52 = vpop.f32.mrf.mxu1  ;;  %v535_v53 = vpop.f32.mrf.mxu0 }
 0x2a1   :  { %v648_v54 = vadd.f32 %v620_v46, %v616_v39  ;;  %v674_v55 = vadd.f32 %v622_v47, %v618_v40  ;;  %v8856_v56 = vadd.f32 %v462_v52, %v8806_v20  ;;  %v8859_v57 = vadd.f32 %v535_v53, %v8808_v22 }
 0x2a2   :  { %v577_v58 = vadd.f32 %v8850_v50, %v8822_v33  ;;  %v621_v59 = vmul.f32 %v8850_v50, %v8850_v50  ;;  %v603_v60 = vadd.f32 %v8853_v51, %v8825_v34  ;;  %v623_v3 = vmul.f32 %v8853_v51, %v8853_v51  ;;  %v464_v61 = vpop.f32.mrf.mxu1  ;;  %v537_v4 = vpop.f32.mrf.mxu0 }
 0x2a3   :  { %v565_v62 = vadd.f32 %v564_v48, %v8856_v56  ;;  %v624_v6 = vmul.f32 %v8856_v56, %v8856_v56  ;;  %v591_v63 = vadd.f32 %v590_v49, %v8859_v57  ;;  %v626_v7 = vmul.f32 %v8859_v57, %v8859_v57 }
 0x2a4   :  { %v661_v1 = vadd.f32 %v621_v59, %v617_v43  ;;  %v687_v2 = vadd.f32 %v623_v3, %v619_v44  ;;  %v8876_v5 = vadd.f32 %v464_v61, %v8811_v23  ;;  %v8879_v8 = vadd.f32 %v537_v4, %v8813_v24  ;;  %v466_v9 = vpop.f32.mrf.mxu1  ;;  %v539_v10 = vpop.f32.mrf.mxu0 }
 0x2a5   :  { %v649_v12 = vadd.f32 %v648_v54, %v624_v6  ;;  %v675_v18 = vadd.f32 %v674_v55, %v626_v7  ;;  %v8882_v11 = vadd.f32 %v466_v9, %v8806_v20  ;;  %v8885_v13 = vadd.f32 %v539_v10, %v8808_v22 }
 0x2a6   :  { %11640 = vst [vmem:[#allocation3_spill] sm:$0xff] %v8879_v8  ;;  %v578_v25 = vadd.f32 %v577_v58, %v8876_v5  ;;  %v625_v32 = vmul.f32 %v8876_v5, %v8876_v5  ;;  %v604_v14 = vadd.f32 %v603_v60, %v8879_v8  ;;  %v627_v15 = vmul.f32 %v8879_v8, %v8879_v8  ;;  %v468_v16 = vpop.f32.mrf.mxu1  ;;  %v541_v17 = vpop.f32.mrf.mxu0 }
 0x2a7   :  { %v566_v19 = vadd.f32 %v565_v62, %v8882_v11  ;;  %v628_v26 = vmul.f32 %v8882_v11, %v8882_v11  ;;  %v592_v27 = vadd.f32 %v591_v63, %v8885_v13  ;;  %v630_v30 = vmul.f32 %v8885_v13, %v8885_v13 }
 0x2a8   :  { %v662_v21 = vadd.f32 %v661_v1, %v625_v32  ;;  %v688_v35 = vadd.f32 %v687_v2, %v627_v15  ;;  %v8900_v36 = vadd.f32 %v468_v16, %v8811_v23  ;;  %v8903_v39 = vadd.f32 %v541_v17, %v8813_v24  ;;  %v472_v40 = vpop.f32.mrf.mxu1  ;;  %v545_v41 = vpop.f32.mrf.mxu0 }
 0x2a9   :  { %v650_v42 = vadd.f32 %v649_v12, %v628_v26  ;;  %v676_v43 = vadd.f32 %v675_v18, %v630_v30  ;;  %v8906_v44 = vadd.f32 %v472_v40, %v8806_v20  ;;  %v8909_v46 = vadd.f32 %v545_v41, %v8808_v22 }
 0x2aa   :  { %11641 = vst [vmem:[#allocation4_spill] sm:$0xff] %v8903_v39  ;;  %v579_v47 = vadd.f32 %v578_v25, %v8900_v36  ;;  %v629_v48 = vmul.f32 %v8900_v36, %v8900_v36  ;;  %v605_v49 = vadd.f32 %v604_v14, %v8903_v39  ;;  %v631_v52 = vmul.f32 %v8903_v39, %v8903_v39  ;;  %v474_v53 = vpop.f32.mrf.mxu1  ;;  %v547_v54 = vpop.f32.mrf.mxu0 }
 0x2ab   :  { %v567_v55 = vadd.f32 %v566_v19, %v8906_v44  ;;  %v632_v58 = vmul.f32 %v8906_v44, %v8906_v44  ;;  %v593_v59 = vadd.f32 %v592_v27, %v8909_v46  ;;  %v634_v60 = vmul.f32 %v8909_v46, %v8909_v46 }
 0x2ac   :  { %v663_v3 = vadd.f32 %v662_v21, %v629_v48  ;;  %v689_v61 = vadd.f32 %v688_v35, %v631_v52  ;;  %v8924_v4 = vadd.f32 %v474_v53, %v8811_v23  ;;  %v8927_v62 = vadd.f32 %v547_v54, %v8813_v24  ;;  %v476_v6 = vpop.f32.mrf.mxu1  ;;  %v549_v63 = vpop.f32.mrf.mxu0 }
 0x2ad   :  { %v651_v7 = vadd.f32 %v650_v42, %v632_v58  ;;  %v677_v1 = vadd.f32 %v676_v43, %v634_v60  ;;  %v8930_v2 = vadd.f32 %v476_v6, %v8806_v20  ;;  %v8933_v9 = vadd.f32 %v549_v63, %v8808_v22 }
 0x2ae   :  { %11642 = vst [vmem:[#allocation5_spill] sm:$0xff] %v8927_v62  ;;  %v580_v10 = vadd.f32 %v579_v47, %v8924_v4  ;;  %v633_v12 = vmul.f32 %v8924_v4, %v8924_v4  ;;  %v606_v18 = vadd.f32 %v605_v49, %v8927_v62  ;;  %v635_v25 = vmul.f32 %v8927_v62, %v8927_v62  ;;  %v478_v32 = vpop.f32.mrf.mxu1  ;;  %v551_v14 = vpop.f32.mrf.mxu0 }
 0x2af   :  { %v568_v15 = vadd.f32 %v567_v55, %v8930_v2  ;;  %v636_v16 = vmul.f32 %v8930_v2, %v8930_v2  ;;  %v594_v17 = vadd.f32 %v593_v59, %v8933_v9  ;;  %v638_v19 = vmul.f32 %v8933_v9, %v8933_v9 }
 0x2b0   :  { %v664_v26 = vadd.f32 %v663_v3, %v633_v12  ;;  %v690_v27 = vadd.f32 %v689_v61, %v635_v25  ;;  %v8948_v30 = vadd.f32 %v478_v32, %v8811_v23  ;;  %v8951_v21 = vadd.f32 %v551_v14, %v8813_v24  ;;  %v482_v35 = vpop.f32.mrf.mxu1  ;;  %v555_v40 = vpop.f32.mrf.mxu0 }
 0x2b1   :  { %v652_v41 = vadd.f32 %v651_v7, %v636_v16  ;;  %v678_v42 = vadd.f32 %v677_v1, %v638_v19  ;;  %v8954_v43 = vadd.f32 %v482_v35, %v8806_v20  ;;  %v8957_v47 = vadd.f32 %v555_v40, %v8808_v22 }
 0x2b2   :  { %11643 = vst [vmem:[#allocation6_spill] sm:$0xff] %v8951_v21  ;;  %v581_v48 = vadd.f32 %v580_v10, %v8948_v30  ;;  %v637_v49 = vmul.f32 %v8948_v30, %v8948_v30  ;;  %v607_v52 = vadd.f32 %v606_v18, %v8951_v21  ;;  %v639_v53 = vmul.f32 %v8951_v21, %v8951_v21  ;;  %v484_v54 = vpop.f32.mrf.mxu1  ;;  %v557_v55 = vpop.f32.mrf.mxu0 }
 0x2b3   :  { %v569_v58 = vadd.f32 %v568_v15, %v8954_v43  ;;  %v640_v59 = vmul.f32 %v8954_v43, %v8954_v43  ;;  %v595_v60 = vadd.f32 %v594_v17, %v8957_v47  ;;  %v642_v3 = vmul.f32 %v8957_v47, %v8957_v47 }
 0x2b4   :  { %v665_v61 = vadd.f32 %v664_v26, %v637_v49  ;;  %v691_v6 = vadd.f32 %v690_v27, %v639_v53  ;;  %v8972_v63 = vadd.f32 %v484_v54, %v8811_v23  ;;  %v8975_v7 = vadd.f32 %v557_v55, %v8813_v24  ;;  %v486_v1 = vpop.f32.mrf.mxu1  ;;  %v559_v10 = vpop.f32.mrf.mxu0 }
 0x2b5   :  { %v653_v12 = vadd.f32 %v652_v41, %v640_v59  ;;  %v679_v18 = vadd.f32 %v678_v42, %v642_v3  ;;  %v8978_v25 = vadd.f32 %v486_v1, %v8806_v20  ;;  %v8981_v32 = vadd.f32 %v559_v10, %v8808_v22 }
 0x2b6   :  { %11644 = vst [vmem:[#allocation7_spill] sm:$0xff] %v8975_v7  ;;  %v582_v14 = vadd.f32 %v581_v48, %v8972_v63  ;;  %v641_v15 = vmul.f32 %v8972_v63, %v8972_v63  ;;  %v608_v16 = vadd.f32 %v607_v52, %v8975_v7  ;;  %v643_v17 = vmul.f32 %v8975_v7, %v8975_v7  ;;  %v488_v19 = vpop.f32.mrf.mxu1  ;;  %v561_v26 = vpop.f32.mrf.mxu0 }
 0x2b7   :  { %v570_v27 = vadd.f32 %v569_v58, %v8978_v25  ;;  %v644_v20 = vmul.f32 %v8978_v25, %v8978_v25  ;;  %v596_v22 = vadd.f32 %v595_v60, %v8981_v32  ;;  %v646_v35 = vmul.f32 %v8981_v32, %v8981_v32 }
 0x2b8   :  { %v666_v40 = vadd.f32 %v665_v61, %v641_v15  ;;  %v692_v41 = vadd.f32 %v691_v6, %v643_v17  ;;  %v8996_v42 = vadd.f32 %v488_v19, %v8811_v23  ;;  %v8999_v48 = vadd.f32 %v561_v26, %v8813_v24 }
 0x2b9   :  { %v571_v49 = vrot.slane %v570_v27, 4  ;;  %v654_v52 = vadd.f32 %v653_v12, %v644_v20  ;;  %v597_v53 = vrot.slane %v596_v22, 4  ;;  %v680_v54 = vadd.f32 %v679_v18, %v646_v35 }
 0x2ba   :  { %11645 = vst [vmem:[#allocation8_spill] sm:$0xff] %v8999_v48  ;;  %v583_v55 = vadd.f32 %v582_v14, %v8996_v42  ;;  %v645_v58 = vmul.f32 %v8996_v42, %v8996_v42  ;;  %v609_v59 = vadd.f32 %v608_v16, %v8999_v48  ;;  %v647_v60 = vmul.f32 %v8999_v48, %v8999_v48 }
 0x2bb   :  { %v572_v3 = vadd.f32 %v571_v49, %v570_v27  ;;  %v655_v23 = vrot.slane %v654_v52, 4  ;;  %v598_v61 = vadd.f32 %v597_v53, %v596_v22  ;;  %v681_v6 = vrot.slane %v680_v54, 4 }
 0x2bc   :  { %v584_v24 = vrot.slane %v583_v55, 4  ;;  %v667_v1 = vadd.f32 %v666_v40, %v645_v58  ;;  %v610_v10 = vrot.slane %v609_v59, 4  ;;  %v693_v12 = vadd.f32 %v692_v41, %v647_v60 }
 0x2bd   :  { %v573_v15 = vrot.slane %v572_v3, 2  ;;  %v656_v18 = vadd.f32 %v655_v23, %v654_v52  ;;  %v599_v17 = vrot.slane %v598_v61, 2  ;;  %v682_v14 = vadd.f32 %v681_v6, %v680_v54 }
 0x2be   :  { %v585_v19 = vadd.f32 %v584_v24, %v583_v55  ;;  %v668_v26 = vrot.slane %v667_v1, 4  ;;  %v611_v20 = vadd.f32 %v610_v10, %v609_v59  ;;  %v694_v35 = vrot.slane %v693_v12, 4 }
 0x2bf   :  { %v657_v16 = vrot.slane %v656_v18, 2  ;;  %v683_v7 = vrot.slane %v682_v14, 2  ;;  %v574_v22 = vadd.f32 %v573_v15, %v572_v3  ;;  %v600_v62 = vadd.f32 %v599_v17, %v598_v61 }
 0x2c0   :  { %v586_v21 = vrot.slane %v585_v19, 2  ;;  %v669_v48 = vadd.f32 %v668_v26, %v667_v1  ;;  %v612_v27 = vrot.slane %v611_v20, 2  ;;  %v695_v49 = vadd.f32 %v694_v35, %v693_v12  ;;  %v976_v35 = vld [vmem:[%s11624_s9 + $0xf0] sm:$0xff] }
 0x2c1   :  { %v658_v53 = vadd.f32 %v657_v16, %v656_v18  ;;  %v684_v40 = vadd.f32 %v683_v7, %v682_v14  ;;  %v575_v10 = vrot.slane %v574_v22, 1  ;;  %v601_v39 = vrot.slane %v600_v62, 1  ;;  %v971_v16 = vld [vmem:[%s11624_s9 + $0xc8] sm:$0xff] }
 0x2c2   :  { %v587_v58 = vadd.f32 %v586_v21, %v585_v19  ;;  %v670_v41 = vrot.slane %v669_v48, 2  ;;  %v613_v60 = vadd.f32 %v612_v27, %v611_v20  ;;  %v696_v52 = vrot.slane %v695_v49, 2  ;;  %v8279_v20 = vld [vmem:[#allocation2] sm:$0xff]  ;;  %v973_v27 = vld [vmem:[%s11624_s9 + $0xd8] sm:$0xff] }
 0x2c3   :  { %v659_v23 = vrot.slane %v658_v53, 1  ;;  %v685_v54 = vrot.slane %v684_v40, 1  ;;  %v576_v21 = vadd.f32 %v575_v10, %v574_v22  ;;  %v602_v18 = vadd.f32 %v601_v39, %v600_v62  ;;  %v977_v39 = vld [vmem:[%s11624_s9 + $0xf8] sm:$0xff]  ;;  %v974_v62 = vld [vmem:[%s11624_s9 + $0xe0] sm:$0xff]  ;;  %v972_v22 = vld [vmem:[%s11624_s9 + $0xd0] sm:$0xff] }
 0x2c4   :  { %v588_v55 = vrot.slane %v587_v58, 1  ;;  %v671_v6 = vadd.f32 %v670_v41, %v669_v48  ;;  %v614_v59 = vrot.slane %v613_v60, 1  ;;  %v697_v24 = vadd.f32 %v696_v52, %v695_v49  ;;  %1069 = vmatprep.subr.mxu0 %v977_v39  ;;  %v970_v49 = vld [vmem:[%s11624_s9 + $0xc0] sm:$0xff]  ;;  %v968_v41 = vld [vmem:[%s11624_s9 + $0xb0] sm:$0xff]  ;;  %v965_v52 = vld [vmem:[%s11624_s9 + $0x98] sm:$0xff] }
 0x2c5   :  { %v660_v26 = vadd.f32 %v659_v23, %v658_v53  ;;  %v686_v12 = vadd.f32 %v685_v54, %v684_v40  ;;  %v967_v53 = vld [vmem:[%s11624_s9 + $0xa8] sm:$0xff]  ;;  %v969_v40 = vld [vmem:[%s11624_s9 + $0xb8] sm:$0xff]  ;;  %v962_v23 = vld [vmem:[%s11624_s9 + $0x80] sm:$0xff] }
 0x2c6   :  { %v672_v8 = vrot.slane %v671_v6, 1  ;;  %v698_v1 = vrot.slane %v697_v24, 1  ;;  %v589_v3 = vadd.f32 %v588_v55, %v587_v58  ;;  %v615_v61 = vadd.f32 %v614_v59, %v613_v60  ;;  %v966_v58 = vld [vmem:[%s11624_s9 + $0xa0] sm:$0xff]  ;;  %v963_v60 = vld [vmem:[%s11624_s9 + $0x88] sm:$0xff]  ;;  %v964_v54 = vld [vmem:[%s11624_s9 + $0x90] sm:$0xff] }
 0x2c7   :  { %v700_v48 = vsel %vm104_vm2, %v576_v21, %v660_v26  ;;  %v702_v19 = vsel %vm104_vm2, %v602_v18, %v686_v12  ;;  %v959_v55 = vld [vmem:[%s11624_s9 + $0x68] sm:$0xff]  ;;  %v958_v59 = vld [vmem:[%s11624_s9 + $0x60] sm:$0xff]  ;;  %v956_v12 = vld [vmem:[%s11624_s9 + $0x50] sm:$0xff] }
 0x2c8   :  { %v673_v15 = vadd.f32 %v672_v8, %v671_v6  ;;  %v699_v7 = vadd.f32 %v698_v1, %v697_v24  ;;  %v975_v8 = vld [vmem:[%s11624_s9 + $0xe8] sm:$0xff]  ;;  %v961_v6 = vld [vmem:[%s11624_s9 + $0x78] sm:$0xff]  ;;  %v960_v24 = vld [vmem:[%s11624_s9 + $0x70] sm:$0xff] }
 0x2c9   :  { %998 = vmatprep.subr.mxu1 %v975_v8  ;;  %v955_v10 = vld [vmem:[%s11624_s9 + $0x48] sm:$0xff]  ;;  %v957_v1 = vld [vmem:[%s11624_s9 + $0x58] sm:$0xff]  ;;  %v954_v26 = vld [vmem:[%s11624_s9 + $0x40] sm:$0xff] }
 0x2ca   :  { %v701_v17 = vsel %vm104_vm2, %v589_v3, %v673_v15  ;;  %v703_v14 = vsel %vm104_vm2, %v615_v61, %v699_v7  ;;  %v951_v3 = vld [vmem:[%s11624_s9 + $0x28] sm:$0xff]  ;;  %v953_v15 = vld [vmem:[%s11624_s9 + $0x38] sm:$0xff]  ;;  %v950_v61 = vld [vmem:[%s11624_s9 + $0x20] sm:$0xff] }
 0x2cb   :  { %832 = vmatprep.mubr.f32.mxu1 %v701_v17  ;;  %902 = vmatprep.mubr.f32.mxu0 %v703_v14  ;;  %v952_v7 = vld [vmem:[%s11624_s9 + $0x30] sm:$0xff]  ;;  %v947_v21 = vld [vmem:[%s11624_s9 + $0x8] sm:$0xff]  ;;  %v949_v18 = vld [vmem:[%s11624_s9 + $0x18] sm:$0xff] }
 0x2cc   :  { %833 = vmatmul.mubr.f32.vlgmr.msra.gmra.mxu1 %v700_v48  ;;  %903 = vmatmul.mubr.f32.vlgmr.msra.gmra.mxu0 %v702_v19  ;;  %v946_v17 = vld [vmem:[%s11624_s9] sm:$0xff]  ;;  %v948_v14 = vld [vmem:[%s11624_s9 + $0x10] sm:$0xff]  ;;  %v7987_v48 = vld [vmem:[%s11625_s11 + $0x178] sm:$0xff]  }
 0x2cd   :  { %1046 = vmatprep.mubr.f32.mxu1 %v8279_v20  ;;  %1117 = vmatprep.mubr.f32.mxu0 %v8279_v20  ;;  %v7988_v19 = vld [vmem:[%s11625_s11 + $0x1f8] sm:$0xff]  }
 0x2ce   :  { %999 = vmatpush1.msra.mxu1 %v974_v62  ;;  %1070 = vmatpush1.msra.mxu0 %v976_v35 }
 0x2cf   :  { %1000 = vmatprep.subr.mxu1 %v971_v16  ;;  %1071 = vmatprep.subr.mxu0 %v973_v27 }
 0x2d0   :  { %1001 = vmatpush1.msra.mxu1 %v970_v49  ;;  %1072 = vmatpush1.msra.mxu0 %v972_v22 }
 0x2d1   :  { %1002 = vmatprep.subr.mxu1 %v967_v53  ;;  %1073 = vmatprep.subr.mxu0 %v969_v40 }
 0x2d2   :  { %1003 = vmatpush1.msra.mxu1 %v966_v58  ;;  %1074 = vmatpush1.msra.mxu0 %v968_v41 }
 0x2d3   :  { %1004 = vmatprep.subr.mxu1 %v963_v60  ;;  %1075 = vmatprep.subr.mxu0 %v965_v52 }
 0x2d4   :  { %1005 = vmatpush1.msra.mxu1 %v962_v23  ;;  %1076 = vmatpush1.msra.mxu0 %v964_v54  ;;  %v915_v23 = vld [vmem:[%s11626_s7] sm:$0x1] }
 0x2d5   :  { %1006 = vmatprep.subr.mxu1 %v959_v55  ;;  %1077 = vmatprep.subr.mxu0 %v961_v6  ;;  %v936_v6 = vld [vmem:[%s11627_s8] sm:$0x1] }
 0x2d6   :  { %1007 = vmatpush1.msra.mxu1 %v958_v59  ;;  %1078 = vmatpush1.msra.mxu0 %v960_v24 }
 0x2d7   :  { %1008 = vmatprep.subr.mxu1 %v955_v10  ;;  %1079 = vmatprep.subr.mxu0 %v957_v1  ;;  %v7989_v1 = vld [vmem:[%s11625_s11 + $0x138] sm:$0xff]  }
 0x2d8   :  { %1009 = vmatpush1.msra.mxu1 %v954_v26  ;;  %1080 = vmatpush1.msra.mxu0 %v956_v12  ;;  %v7990_v26 = vld [vmem:[%s11625_s11 + $0x1b8] sm:$0xff]   ;;  %v7992_v12 = vld [vmem:[%s11625_s11 + $0x1f0] sm:$0xff]  }
 0x2d9   :  { %1010 = vmatprep.subr.mxu1 %v951_v3  ;;  %1081 = vmatprep.subr.mxu0 %v953_v15 }
 0x2da   :  { %1011 = vmatpush1.msra.mxu1 %v950_v61  ;;  %1082 = vmatpush1.msra.mxu0 %v952_v7  ;;  %v7993_v61 = vld [vmem:[%s11625_s11 + $0x130] sm:$0xff]  }
 0x2db   :  { %1012 = vmatprep.subr.mxu1 %v947_v21  ;;  %1083 = vmatprep.subr.mxu0 %v949_v18  ;;  %v7994_v7 = vld [vmem:[%s11625_s11 + $0x1b0] sm:$0xff]   ;;  %v7995_v21 = vld [vmem:[%s11625_s11 + $0x168] sm:$0xff]  }
 0x2dc   :  { %1013 = vmatpush1.msra.mxu1 %v946_v17  ;;  %1084 = vmatpush1.msra.mxu0 %v948_v14  ;;  %v7996_v18 = vld [vmem:[%s11625_s11 + $0x1e8] sm:$0xff]  }
 0x2dd   :  { %7235 = vmatprep.subr.bf16.mxu1 %v7987_v48  ;;  %7275 = vmatprep.subr.bf16.mxu0 %v7988_v19  ;;  %v7997_v17 = vld [vmem:[%s11625_s11 + $0x128] sm:$0xff]   ;;  %v7999_v48 = vld [vmem:[%s11625_s11 + $0x160] sm:$0xff]  }
 0x2de   :  { %v7998_v14 = vld [vmem:[%s11625_s11 + $0x1a8] sm:$0xff]   ;;  %v8000_v19 = vld [vmem:[%s11625_s11 + $0x1e0] sm:$0xff]  }
 0x38c   :  { %v7197_v20 = vpop.f32.mrf.mxu1  ;;  %v7232_v8 = vpop.f32.mrf.mxu0 }
 0x38e   :  { %v7198_v39 = vpop.f32.mrf.mxu1  ;;  %v7233_v62 = vpop.f32.mrf.mxu0 }
 0x38f   :  { %v7199_v35 = vadd.f32 %v7198_v39, %v7197_v20  ;;  %v7234_v16 = vadd.f32 %v7233_v62, %v7232_v8  ;;  %v8001_v20 = vld [vmem:[%s11625_s11 + $0x120] sm:$0xff]   ;;  %v8003_v39 = vld [vmem:[%s11625_s11 + $0x158] sm:$0xff]  }
 0x390   :  { %v8002_v8 = vld [vmem:[%s11625_s11 + $0x1a0] sm:$0xff]   ;;  %v8004_v62 = vld [vmem:[%s11625_s11 + $0x1d8] sm:$0xff]  }
 0x391   :  { %v905_v27 = vadd.f32 %v7234_v16, %v7199_v35  ;;  %v8005_v35 = vld [vmem:[%s11625_s11 + $0x118] sm:$0xff]  }
 0x392   :  { %v8006_v16 = vld [vmem:[%s11625_s11 + $0x198] sm:$0xff]  }
 0x393   :  { %v908_v49 = vmul.f32 0.001953125, %v905_v27  ;;  %v8007_v27 = vld [vmem:[%s11625_s11 + $0x150] sm:$0xff]  }
 0x395   :  { %v909_v22 = vmul.f32 %v908_v49, %v908_v49 }
 0x397   :  { %v911_v53 = vrot.slane %v909_v22, 7  ;;  %v8009_v22 = vld [vmem:[%s11625_s11 + $0x110] sm:$0xff]  }
 0x399   :  { %v913_v40 = vsub.f32 %v908_v49, %v911_v53  ;;  %v8010_v53 = vld [vmem:[%s11625_s11 + $0x190] sm:$0xff]  }
 0x39b   :  { %v914_v58 = vmax.f32 %v913_v40, 0.0  ;;  %v8011_v40 = vld [vmem:[%s11625_s11 + $0x148] sm:$0xff]  }
 0x39d   :  { %v916_v41 = vadd.f32 1e-05, %v914_v58  ;;  %v8012_v58 = vld [vmem:[%s11625_s11 + $0x1c8] sm:$0xff]  }
 0x39f   :  { %8277 = vrsqrt.f32 %v916_v41  ;;  %v8013_v41 = vld [vmem:[%s11625_s11 + $0x108] sm:$0xff]  }
 0x3ac   :  { %v8278_v60 = vpop.eup %8277 }
 0x3ad   :  { %v925_v52 = vrot.slane %v8278_v60, %v8548_v0  ;;  %v8014_v60 = vld [vmem:[%s11625_s11 + $0x188] sm:$0xff]  }
 0x3af   :  { %v926_v54 = vcombine.high %v925_v52, %v925_v52  ;;  %v8015_v52 = vld [vmem:[%s11625_s11 + $0x140] sm:$0xff]  }
 0x3b1   :  { %v933_v55 = vrot.slane %v926_v54, %v8548_v0  ;;  %v7991_v0 = vld [vmem:[%s11625_s11 + $0x170] sm:$0xff]   ;;  %v8017_v54 = vld [vmem:[%s11625_s11 + $0x100] sm:$0xff]  }
 0x3b3   :  { %v935_v59 = vmul.f32 %v933_v55, %v915_v23  ;;  %v8016_v23 = vld [vmem:[%s11625_s11 + $0x1c0] sm:$0xff]  }
 0x3b4   :  { %v8018_v55 = vld [vmem:[%s11625_s11 + $0x180] sm:$0xff]  }
 0x3b5   :  { %v937_v24 = vmul.f32 %v935_v59, %v908_v49  ;;  %v8008_v49 = vld [vmem:[%s11625_s11 + $0x1d0] sm:$0xff]  }
 0x3b7   :  { %v938_v10 = vsub.f32 %v936_v6, %v937_v24  ;;  %v8019_v6 = vld [vmem:[%s11625_s11 + $0x78] sm:$0xff]   ;;  %v9219_v24 = vld [vmem:[#allocation2 + $0x8] sm:$0xfe] }
 0x3b9   :  { %v943_v3 = vrot.slane %v938_v10, %v8559_v31  ;;  %v9221_v10 = vld [vmem:[#allocation2 + $0x28] sm:$0x1] }
 0x3bb   :  { %v945_v15 = vsel %vm104_vm2, %v935_v59, %v943_v3  ;;  %v8020_v59 = vld [vmem:[%s11625_s11 + $0xf8] sm:$0xff]   ;;  %v9231_v3 = vld [vmem:[#allocation2 + $0x10] sm:$0xfe] }
 0x3bc   :  { %6867 = vmatmul.mubr.msk.f32.vlgmr.msra.gmra.mxu1 %vm978_vm6, %v945_v15  ;;  %6868 = vmatmul.mubr.msk.f32.vlgmr.msra.gmra.mxu0 %vm978_vm6, %v945_v15  ;;  %v9233_v15 = vld [vmem:[#allocation2 + $0x30] sm:$0x1] }
 0x3bd   :  { %7236 = vmatpush3.bf16.msra.mxu1 %v7989_v1  ;;  %7276 = vmatpush3.bf16.msra.mxu0 %v7990_v26  ;;  %v9223_v1 = vld [vmem:[#allocation2 + $0x18] sm:$0xfe]  ;;  %v9225_v26 = vld [vmem:[#allocation2 + $0x38] sm:$0x1] }
 0x3be   :  { %7237 = vmatprep.subr.bf16.mxu1 %v7991_v0  ;;  %7277 = vmatprep.subr.bf16.mxu0 %v7992_v12  ;;  %v9227_v0 = vld [vmem:[#allocation2] sm:$0xfe]  ;;  %v9229_v12 = vld [vmem:[#allocation2 + $0x20] sm:$0x1] }
 0x3c1   :  { %7238 = vmatpush3.bf16.msra.mxu1 %v7993_v61  ;;  %7278 = vmatpush3.bf16.msra.mxu0 %v7994_v7  ;;  %v9235_v61 = vld [vmem:[#allocation2 + $0x188] sm:$0xfe]  ;;  %v1741_v7 = vrot.slane %v9219_v24, 1 }
 0x3c2   :  { %7239 = vmatprep.subr.bf16.mxu1 %v7995_v21  ;;  %7279 = vmatprep.subr.bf16.mxu0 %v7996_v18  ;;  %v1742_v21 = vrot.slane %v9221_v10, 1  ;;  %v9239_v18 = vld [vmem:[#allocation2 + $0x1a8] sm:$0x1] }
 0x3c5   :  { %7240 = vmatpush3.bf16.msra.mxu1 %v7997_v17  ;;  %7280 = vmatpush3.bf16.msra.mxu0 %v7998_v14 }
 0x3c6   :  { %7241 = vmatprep.subr.bf16.mxu1 %v7999_v48  ;;  %7281 = vmatprep.subr.bf16.mxu0 %v8000_v19 }
 0x3c9   :  { %7242 = vmatpush3.bf16.msra.mxu1 %v8001_v20  ;;  %7282 = vmatpush3.bf16.msra.mxu0 %v8002_v8 }
 0x3ca   :  { %7243 = vmatprep.subr.bf16.mxu1 %v8003_v39  ;;  %7283 = vmatprep.subr.bf16.mxu0 %v8004_v62 }
 0x3cd   :  { %7244 = vmatpush3.bf16.msra.mxu1 %v8005_v35  ;;  %7284 = vmatpush3.bf16.msra.mxu0 %v8006_v16 }
 0x3ce   :  { %7245 = vmatprep.subr.bf16.mxu1 %v8007_v27  ;;  %7285 = vmatprep.subr.bf16.mxu0 %v8008_v49 }
 0x3d1   :  { %7246 = vmatpush3.bf16.msra.mxu1 %v8009_v22  ;;  %7286 = vmatpush3.bf16.msra.mxu0 %v8010_v53 }
 0x3d2   :  { %7247 = vmatprep.subr.bf16.mxu1 %v8011_v40  ;;  %7287 = vmatprep.subr.bf16.mxu0 %v8012_v58 }
 0x3d5   :  { %7248 = vmatpush3.bf16.msra.mxu1 %v8013_v41  ;;  %7288 = vmatpush3.bf16.msra.mxu0 %v8014_v60 }
 0x3d6   :  { %7249 = vmatprep.subr.bf16.mxu1 %v8015_v52  ;;  %7289 = vmatprep.subr.bf16.mxu0 %v8016_v23 }
 0x3d9   :  { %7250 = vmatpush3.bf16.msra.mxu1 %v8017_v54  ;;  %7290 = vmatpush3.bf16.msra.mxu0 %v8018_v55 }
 0x3da   :  { %7315 = vmatprep.subr.bf16.mxu1 %v8019_v6  ;;  %7355 = vmatprep.subr.bf16.mxu0 %v8020_v59 }
 0x47c   :  { %v1048_v17 = vpop.f32.mrf.mxu1  ;;  %v1119_v14 = vpop.f32.mrf.mxu0 }
 0x47d   :  { %v1212_v39 = vrot.slane %v1048_v17, %v8559_v31  ;;  %v1260_v27 = vrot.slane %v1048_v17, %v8588_v45  ;;  %v1220_v49 = vrot.slane %v1119_v14, %v8559_v31  ;;  %v9252_v22 = vrot.slane %v1119_v14, %v8588_v45 }
 0x47f   :  { %v1225_v40 = vmul.f32 %v1212_v39, %v8816_v28  ;;  %v1229_v58 = vmul.f32 %v1212_v39, %v8828_v37  ;;  %v1233_v41 = vmul.f32 %v1212_v39, %v8856_v56  ;;  %v1237_v60 = vmul.f32 %v1212_v39, %v8882_v11 }
 0x480   :  { %v1241_v52 = vmul.f32 %v1212_v39, %v8906_v44  ;;  %v1245_v23 = vmul.f32 %v1212_v39, %v8930_v2  ;;  %v1249_v54 = vmul.f32 %v1212_v39, %v8954_v43  ;;  %v1253_v55 = vmul.f32 %v1212_v39, %v8978_v25 }
 0x481   :  { %v1273_v6 = vadd.f32 %v1260_v27, %v1225_v40  ;;  %v1277_v59 = vadd.f32 %v1260_v27, %v1229_v58  ;;  %v1281_v17 = vadd.f32 %v1260_v27, %v1233_v41  ;;  %v1285_v14 = vadd.f32 %v1260_v27, %v1237_v60 }
 0x482   :  { %v1289_v16 = vadd.f32 %v1260_v27, %v1241_v52  ;;  %v1293_v28 = vadd.f32 %v1260_v27, %v1245_v23  ;;  %v1297_v53 = vadd.f32 %v1260_v27, %v1249_v54  ;;  %v1301_v37 = vadd.f32 %v1260_v27, %v1253_v55 }
 0x483   :  { %v1305_v62 = vmax.f32 %v1273_v6, 0.0  ;;  %v1309_v56 = vmax.f32 %v1277_v59, 0.0  ;;  %v1313_v35 = vmax.f32 %v1281_v17, 0.0  ;;  %v1317_v11 = vmax.f32 %v1285_v14, 0.0  ;;  %v1050_v17 = vpop.f32.mrf.mxu1  ;;  %v9281_v14 = vld [vmem:[#allocation2 + $0x1b8] sm:$0x1] }
 0x484   :  { %v1321_v48 = vmax.f32 %v1289_v16, 0.0  ;;  %v1325_v44 = vmax.f32 %v1293_v28, 0.0  ;;  %v1329_v19 = vmax.f32 %v1297_v53, 0.0  ;;  %v1333_v2 = vmax.f32 %v1301_v37, 0.0 }
 0x485   :  { %v1369_v20 = vrot.slane %v1305_v62, 7  ;;  %v1373_v43 = vrot.slane %v1309_v56, 7  ;;  %v1377_v8 = vrot.slane %v1313_v35, 7  ;;  %v1381_v25 = vrot.slane %v1317_v11, 7 }
 0x486   :  { %v1385_v39 = vrot.slane %v1321_v48, 7  ;;  %v1389_v40 = vrot.slane %v1325_v44, 7  ;;  %v1393_v58 = vrot.slane %v1329_v19, 7  ;;  %v1397_v41 = vrot.slane %v1333_v2, 7  ;;  %v1121_v44 = vpop.f32.mrf.mxu0 }
 0x487   :  { %1433 = vst [vmem:[#allocation2 + $0x40] sm:$0xfe] %v1369_v20  ;;  %1437 = vst [vmem:[#allocation2 + $0x60] sm:$0x1] %v1369_v20  ;;  %v1227_v16 = vmul.f32 %v1220_v49, %v8819_v29  ;;  %v1231_v27 = vmul.f32 %v1220_v49, %v8831_v38  ;;  %v1235_v62 = vmul.f32 %v1220_v49, %v8859_v57 }
 0x488   :  { %1441 = vst [vmem:[#allocation2 + $0x80] sm:$0xfe] %v1373_v43  ;;  %1445 = vst [vmem:[#allocation2 + $0xa0] sm:$0x1] %v1373_v43  ;;  %v1239_v35 = vmul.f32 %v1220_v49, %v8885_v13  ;;  %v1243_v48 = vmul.f32 %v1220_v49, %v8909_v46  ;;  %v1247_v19 = vmul.f32 %v1220_v49, %v8933_v9 }
 0x489   :  { %1449 = vst [vmem:[#allocation2 + $0xc0] sm:$0xfe] %v1377_v8  ;;  %1453 = vst [vmem:[#allocation2 + $0xe0] sm:$0x1] %v1377_v8  ;;  %v1251_v29 = vmul.f32 %v1220_v49, %v8957_v47  ;;  %v1255_v38 = vmul.f32 %v1220_v49, %v8981_v32  ;;  %v1275_v57 = vadd.f32 %v9252_v22, %v1227_v16  ;;  %v9279_v49 = vld [vmem:[#allocation2 + $0x198] sm:$0xfe] }
 0x48a   :  { %1457 = vst [vmem:[#allocation2 + $0x100] sm:$0xfe] %v1381_v25  ;;  %1461 = vst [vmem:[#allocation2 + $0x120] sm:$0x1] %v1381_v25  ;;  %v1279_v13 = vadd.f32 %v9252_v22, %v1231_v27  ;;  %v1283_v20 = vadd.f32 %v9252_v22, %v1235_v62  ;;  %v1287_v8 = vadd.f32 %v9252_v22, %v1239_v35  ;;  %v1795_v16 = vrot.slane %v9279_v49, 1 }
 0x48b   :  { %1465 = vst [vmem:[#allocation2 + $0x1c0] sm:$0xfe] %v1385_v39  ;;  %1469 = vst [vmem:[#allocation2 + $0x1e0] sm:$0x1] %v1385_v39  ;;  %v1291_v53 = vadd.f32 %v9252_v22, %v1243_v48  ;;  %v1295_v60 = vadd.f32 %v9252_v22, %v1247_v19  ;;  %v1299_v46 = vadd.f32 %v9252_v22, %v1251_v29  ;;  %v1307_v52 = vmax.f32 %v1275_v57, 0.0 }
 0x48c   :  { %1473 = vst [vmem:[#allocation2 + $0x200] sm:$0xfe] %v1389_v40  ;;  %1477 = vst [vmem:[#allocation2 + $0x220] sm:$0x1] %v1389_v40  ;;  %v1303_v9 = vadd.f32 %v9252_v22, %v1255_v38  ;;  %v1311_v47 = vmax.f32 %v1279_v13, 0.0  ;;  %v1315_v23 = vmax.f32 %v1283_v20, 0.0  ;;  %v1216_v40 = vrot.slane %v1050_v17, %v8559_v31 }
 0x48d   :  { %1481 = vst [vmem:[#allocation2 + $0x240] sm:$0xfe] %v1393_v58  ;;  %1485 = vst [vmem:[#allocation2 + $0x260] sm:$0x1] %v1393_v58  ;;  %v1319_v32 = vmax.f32 %v1287_v8, 0.0  ;;  %v1323_v54 = vmax.f32 %v1291_v53, 0.0  ;;  %v1264_v58 = vrot.slane %v1050_v17, %v8588_v45  ;;  %v1224_v62 = vrot.slane %v1121_v44, %v8559_v31 }
 0x48e   :  { %1489 = vst [vmem:[#allocation2 + $0x280] sm:$0xfe] %v1397_v41  ;;  %1493 = vst [vmem:[#allocation2 + $0x2a0] sm:$0x1] %v1397_v41  ;;  %v1327_v55 = vmax.f32 %v1295_v60, 0.0  ;;  %v1331_v6 = vmax.f32 %v1299_v46, 0.0  ;;  %v9293_v35 = vrot.slane %v1121_v44, %v8588_v45  ;;  %v1226_v29 = vmul.f32 %v1216_v40, %v8822_v33 }
 0x48f   :  { %v1335_v59 = vmax.f32 %v1303_v9, 0.0  ;;  %v1371_v28 = vrot.slane %v1307_v52, 7  ;;  %v1375_v37 = vrot.slane %v1311_v47, 7  ;;  %v1379_v56 = vrot.slane %v1315_v23, 7  ;;  %v9283_v39 = vld [vmem:[#allocation2 + $0x40] sm:$0xfe] }
 0x490   :  { %v1383_v11 = vrot.slane %v1319_v32, 7  ;;  %v1387_v2 = vrot.slane %v1323_v54, 7  ;;  %v1391_v22 = vrot.slane %v1327_v55, 7  ;;  %v1395_v43 = vrot.slane %v1331_v6, 7  ;;  %v9287_v41 = vld [vmem:[#allocation2 + $0x60] sm:$0x1] }
 0x491   :  { %v1399_v25 = vrot.slane %v1335_v59, 7  ;;  %1435 = vst [vmem:[#allocation2 + $0x50] sm:$0xfe] %v1371_v28  ;;  %1439 = vst [vmem:[#allocation2 + $0x70] sm:$0x1] %v1371_v28  ;;  %v1796_v27 = vrot.slane %v9281_v14, 1  ;;  %v1230_v38 = vmul.f32 %v1216_v40, %v8850_v50  ;;  %v1234_v57 = vmul.f32 %v1216_v40, %v8876_v5 }
 0x492   :  { %1443 = vst [vmem:[#allocation2 + $0x90] sm:$0xfe] %v1375_v37  ;;  %1447 = vst [vmem:[#allocation2 + $0xb0] sm:$0x1] %v1375_v37  ;;  %v1750_v48 = vrot.slane %v9283_v39, 1  ;;  %v1751_v19 = vrot.slane %v9287_v41, 1  ;;  %v1238_v13 = vmul.f32 %v1216_v40, %v8900_v36  ;;  %v1242_v20 = vmul.f32 %v1216_v40, %v8924_v4 }
 0x493   :  { %1451 = vst [vmem:[#allocation2 + $0xd0] sm:$0xfe] %v1379_v56  ;;  %1455 = vst [vmem:[#allocation2 + $0xf0] sm:$0x1] %v1379_v56  ;;  %v1246_v8 = vmul.f32 %v1216_v40, %v8948_v30  ;;  %v1250_v31 = vmul.f32 %v1216_v40, %v8972_v63  ;;  %v1254_v45 = vmul.f32 %v1216_v40, %v8996_v42  ;;  %v11648_v40 = vld [vmem:[#allocation5_spill] sm:$0xff]  ;;  %v8021_v41 = vld [vmem:[%s11625_s11 + $0x38] sm:$0xff]  }
 0x494   :  { %1459 = vst [vmem:[#allocation2 + $0x110] sm:$0xfe] %v1383_v11  ;;  %1463 = vst [vmem:[#allocation2 + $0x130] sm:$0x1] %v1383_v11  ;;  %v1274_v53 = vadd.f32 %v1264_v58, %v1226_v29  ;;  %v1278_v60 = vadd.f32 %v1264_v58, %v1230_v38  ;;  %v1282_v46 = vadd.f32 %v1264_v58, %v1234_v57  ;;  %v11649_v29 = vld [vmem:[#allocation6_spill] sm:$0xff]  ;;  %v11650_v57 = vld [vmem:[#allocation7_spill] sm:$0xff] }
 0x495   :  { %1467 = vst [vmem:[#allocation2 + $0x1d0] sm:$0xfe] %v1387_v2  ;;  %1471 = vst [vmem:[#allocation2 + $0x1f0] sm:$0x1] %v1387_v2  ;;  %v1286_v9 = vadd.f32 %v1264_v58, %v1238_v13  ;;  %v1290_v52 = vadd.f32 %v1264_v58, %v1242_v20  ;;  %v1294_v33 = vadd.f32 %v1264_v58, %v1246_v8  ;;  %v11646_v2 = vld [vmem:[#allocation3_spill] sm:$0xff]  ;;  %v11651_v13 = vld [vmem:[#allocation8_spill] sm:$0xff] }
 0x496   :  { %1475 = vst [vmem:[#allocation2 + $0x210] sm:$0xfe] %v1391_v22  ;;  %1479 = vst [vmem:[#allocation2 + $0x230] sm:$0x1] %v1391_v22  ;;  %v1298_v47 = vadd.f32 %v1264_v58, %v1250_v31  ;;  %v1302_v50 = vadd.f32 %v1264_v58, %v1254_v45  ;;  %v1306_v23 = vmax.f32 %v1274_v53, 0.0  ;;  %v1310_v5 = vmax.f32 %v1278_v60, 0.0 }
 0x497   :  { %1483 = vst [vmem:[#allocation2 + $0x250] sm:$0xfe] %v1395_v43  ;;  %1487 = vst [vmem:[#allocation2 + $0x270] sm:$0x1] %v1395_v43  ;;  %v1314_v32 = vmax.f32 %v1282_v46, 0.0  ;;  %v1318_v36 = vmax.f32 %v1286_v9, 0.0  ;;  %v1228_v11 = vmul.f32 %v1224_v62, %v8825_v34  ;;  %v1232_v44 = vmul.f32 %v1224_v62, %v8853_v51 }
 0x498   :  { %1491 = vst [vmem:[#allocation2 + $0x290] sm:$0xfe] %v1399_v25  ;;  %1495 = vst [vmem:[#allocation2 + $0x2b0] sm:$0x1] %v1399_v25  ;;  %v1322_v54 = vmax.f32 %v1290_v52, 0.0  ;;  %v1326_v4 = vmax.f32 %v1294_v33, 0.0  ;;  %v1236_v22 = vmul.f32 %v1224_v62, %v11646_v2  ;;  %v1244_v58 = vmul.f32 %v1224_v62, %v11648_v40 }
 0x499   :  { %v1330_v55 = vmax.f32 %v1298_v47, 0.0  ;;  %v1334_v30 = vmax.f32 %v1302_v50, 0.0  ;;  %v1370_v6 = vrot.slane %v1306_v23, 7  ;;  %v1374_v63 = vrot.slane %v1310_v5, 7  ;;  %v11647_v43 = vld [vmem:[#allocation4_spill] sm:$0xff] }
 0x49a   :  { %v1378_v59 = vrot.slane %v1314_v32, 7  ;;  %v1382_v42 = vrot.slane %v1318_v36, 7  ;;  %v1386_v17 = vrot.slane %v1322_v54, 7  ;;  %v1390_v28 = vrot.slane %v1326_v4, 7  ;;  %v9321_v36 = vld [vmem:[#allocation2 + $0x180] sm:$0xfe] }
 0x49b   :  { %v1394_v37 = vrot.slane %v1330_v55, 7  ;;  %v1398_v56 = vrot.slane %v1334_v30, 7  ;;  %1434 = vst [vmem:[#allocation2 + $0x48] sm:$0xfe] %v1370_v6  ;;  %1438 = vst [vmem:[#allocation2 + $0x68] sm:$0x1] %v1370_v6  ;;  %v1240_v25 = vmul.f32 %v1224_v62, %v11647_v43  ;;  %v1248_v38 = vmul.f32 %v1224_v62, %v11649_v29 }
 0x49c   :  { %1442 = vst [vmem:[#allocation2 + $0x88] sm:$0xfe] %v1374_v63  ;;  %1446 = vst [vmem:[#allocation2 + $0xa8] sm:$0x1] %v1374_v63  ;;  %v1252_v34 = vmul.f32 %v1224_v62, %v11650_v57  ;;  %v1256_v51 = vmul.f32 %v1224_v62, %v11651_v13  ;;  %v1276_v20 = vadd.f32 %v9293_v35, %v1228_v11  ;;  %v9323_v6 = vld [vmem:[#allocation2 + $0x50] sm:$0xfe] }
 0x49d   :  { %1450 = vst [vmem:[#allocation2 + $0xc8] sm:$0xfe] %v1378_v59  ;;  %1454 = vst [vmem:[#allocation2 + $0xe8] sm:$0x1] %v1378_v59  ;;  %v1280_v8 = vadd.f32 %v9293_v35, %v1232_v44  ;;  %v1284_v31 = vadd.f32 %v9293_v35, %v1236_v22  ;;  %v1288_v45 = vadd.f32 %v9293_v35, %v1240_v25  ;;  %v1623_v44 = vld [vmem:[#allocation2 + $0x70] sm:$0x1] }
 0x49e   :  { %1462 = vst [vmem:[#allocation2 + $0x128] sm:$0x1] %v1382_v42  ;;  %1458 = vst [vmem:[#allocation2 + $0x108] sm:$0xfe] %v1382_v42  ;;  %v1292_v53 = vadd.f32 %v9293_v35, %v1244_v58  ;;  %v1296_v60 = vadd.f32 %v9293_v35, %v1248_v38  ;;  %v1300_v46 = vadd.f32 %v9293_v35, %v1252_v34  ;;  %v1308_v52 = vmax.f32 %v1276_v20, 0.0 }
 0x49f   :  { %1466 = vst [vmem:[#allocation2 + $0x1c8] sm:$0xfe] %v1386_v17  ;;  %1470 = vst [vmem:[#allocation2 + $0x1e8] sm:$0x1] %v1386_v17  ;;  %v1304_v9 = vadd.f32 %v9293_v35, %v1256_v51  ;;  %v1312_v33 = vmax.f32 %v1280_v8, 0.0  ;;  %v1316_v47 = vmax.f32 %v1284_v31, 0.0  ;;  %v1743_v25 = vsel %vm1737_vm7, %v1741_v7, %v1742_v21 }
 0x4a0   :  { %1474 = vst [vmem:[#allocation2 + $0x208] sm:$0xfe] %v1390_v28  ;;  %1478 = vst [vmem:[#allocation2 + $0x228] sm:$0x1] %v1390_v28  ;;  %v1320_v62 = vmax.f32 %v1288_v45, 0.0  ;;  %v1324_v50 = vmax.f32 %v1292_v53, 0.0  ;;  %v1752_v10 = vsel %vm1737_vm7, %v1750_v48, %v1751_v19 }
 0x4a1   :  { %1482 = vst [vmem:[#allocation2 + $0x248] sm:$0xfe] %v1394_v37  ;;  %1486 = vst [vmem:[#allocation2 + $0x268] sm:$0x1] %v1394_v37  ;;  %v1328_v23 = vmax.f32 %v1296_v60, 0.0  ;;  %v1332_v5 = vmax.f32 %v1300_v46, 0.0 }
 0x4a2   :  { %1494 = vst [vmem:[#allocation2 + $0x2a8] sm:$0x1] %v1398_v56  ;;  %1490 = vst [vmem:[#allocation2 + $0x288] sm:$0xfe] %v1398_v56  ;;  %v1336_v32 = vmax.f32 %v1304_v9, 0.0  ;;  %v1372_v54 = vrot.slane %v1308_v52, 7 }
 0x4a3   :  { %v1376_v4 = vrot.slane %v1312_v33, 7  ;;  %v1380_v55 = vrot.slane %v1316_v47, 7  ;;  %v1384_v30 = vrot.slane %v1320_v62, 7  ;;  %v1388_v63 = vrot.slane %v1324_v50, 7  ;;  %v1618_v17 = vld [vmem:[#allocation2 + $0x48] sm:$0xfe] }
 0x4a4   :  { %v1392_v59 = vrot.slane %v1328_v23, 7  ;;  %v1396_v42 = vrot.slane %v1332_v5, 7  ;;  %v1400_v35 = vrot.slane %v1336_v32, 7  ;;  %v9325_v28 = vld [vmem:[#allocation2 + $0x80] sm:$0xfe]  ;;  %v1753_v11 = vrot.slane %v1618_v17, 1 }
 0x4a5   :  { %v9327_v37 = vld [vmem:[#allocation2 + $0xa0] sm:$0x1]  ;;  %1436 = vst [vmem:[#allocation2 + $0x58] sm:$0xfe] %v1372_v54  ;;  %1440 = vst [vmem:[#allocation2 + $0x78] sm:$0x1] %v1372_v54 }
 0x4a6   :  { %1444 = vst [vmem:[#allocation2 + $0x98] sm:$0xfe] %v1376_v4  ;;  %1448 = vst [vmem:[#allocation2 + $0xb8] sm:$0x1] %v1376_v4  ;;  %v1622_v56 = vld [vmem:[#allocation2 + $0x68] sm:$0x1] }
 0x4a7   :  { %1452 = vst [vmem:[#allocation2 + $0xd8] sm:$0xfe] %v1380_v55  ;;  %1456 = vst [vmem:[#allocation2 + $0xf8] sm:$0x1] %v1380_v55  ;;  %v9329_v2 = vld [vmem:[#allocation2 + $0xc0] sm:$0xfe] }
 0x4a8   :  { %1464 = vst [vmem:[#allocation2 + $0x138] sm:$0x1] %v1384_v30  ;;  %1460 = vst [vmem:[#allocation2 + $0x118] sm:$0xfe] %v1384_v30  ;;  %v9331_v22 = vld [vmem:[#allocation2 + $0xe0] sm:$0x1] }
 0x4a9   :  { %v1786_v43 = vrot.slane %v9321_v36, 1  ;;  %1468 = vst [vmem:[#allocation2 + $0x1d8] sm:$0xfe] %v1388_v63  ;;  %1472 = vst [vmem:[#allocation2 + $0x1f8] sm:$0x1] %v1388_v63  ;;  %v1754_v40 = vrot.slane %v1622_v56, 1 }
 0x4aa   :  { %1476 = vst [vmem:[#allocation2 + $0x218] sm:$0xfe] %v1392_v59  ;;  %1480 = vst [vmem:[#allocation2 + $0x238] sm:$0x1] %v1392_v59  ;;  %v1756_v58 = vrot.slane %v9323_v6, 1  ;;  %v11652_v57 = vrot.slane %v9229_v12, 1 }
 0x4ab   :  { %1484 = vst [vmem:[#allocation2 + $0x258] sm:$0xfe] %v1396_v42  ;;  %1488 = vst [vmem:[#allocation2 + $0x278] sm:$0x1] %v1396_v42  ;;  %v1626_v29 = vld [vmem:[#allocation2 + $0x88] sm:$0xfe]  ;;  %v1755_v20 = vsel %vm1737_vm7, %v1753_v11, %v1754_v40 }
 0x4ac   :  { %1496 = vst [vmem:[#allocation2 + $0x2b8] sm:$0x1] %v1400_v35  ;;  %1492 = vst [vmem:[#allocation2 + $0x298] sm:$0xfe] %v1400_v35  ;;  %v1630_v38 = vld [vmem:[#allocation2 + $0xa8] sm:$0x1] }
 0x4ad   :  { %v11653_v34 = vrot.slane %v9227_v0, 1  ;;  %v1634_v24 = vld [vmem:[#allocation2 + $0xc8] sm:$0xfe]  ;;  %v1638_v51 = vld [vmem:[#allocation2 + $0xe8] sm:$0x1]  ;;  %v1765_v7 = vrot.slane %v1626_v29, 1  ;;  %v1867_v0 = vpack.c.bf16 %v1755_v20, %v1743_v25 }
 0x4ae   :  { %v1766_v21 = vrot.slane %v1630_v38, 1  ;;  %v1757_v8 = vrot.slane %v1623_v44, 1  ;;  %v1777_v31 = vrot.slane %v1634_v24, 1  ;;  %v1778_v45 = vrot.slane %v1638_v51, 1  ;;  %v9351_v12 = vld [vmem:[#allocation2 + $0x1a0] sm:$0x1] }
 0x4af   :  { %v1740_v13 = vsel %vm1737_vm7, %v11653_v34, %v11652_v57  ;;  %v1762_v48 = vrot.slane %v9325_v28, 1  ;;  %v1763_v19 = vrot.slane %v9327_v37, 1  ;;  %v8023_v46 = vld [vmem:[%s11625_s11 + $0x70] sm:$0xff]   ;;  %v1774_v9 = vrot.slane %v9329_v2, 1  ;;  %2170 = vmatprep.mubr.bf16.mxu1 %v1867_v0  ;;  %v1650_v62 = vld [vmem:[#allocation2 + $0x1c8] sm:$0xfe] }
 0x4b0   :  { %v1767_v39 = vsel %vm1737_vm7, %v1765_v7, %v1766_v21  ;;  %v1866_v53 = vpack.c.bf16 %v1752_v10, %v1740_v13  ;;  %v1779_v60 = vsel %vm1737_vm7, %v1777_v31, %v1778_v45  ;;  %v1775_v52 = vrot.slane %v9331_v22, 1  ;;  %v8025_v47 = vld [vmem:[%s11625_s11 + $0x30] sm:$0xff]   ;;  %v1654_v50 = vld [vmem:[#allocation2 + $0x1e8] sm:$0x1]  ;;  %v1620_v5 = vld [vmem:[#allocation2 + $0x58] sm:$0xfe] }
 0x4b1   :  { %v1871_v33 = vpack.c.bf16 %v1779_v60, %v1767_v39  ;;  %v1787_v23 = vrot.slane %v9351_v12, 1  ;;  %v1624_v32 = vld [vmem:[#allocation2 + $0x78] sm:$0x1]  ;;  %v11654_v54 = vrot.slane %v9225_v26, 1  ;;  %v11655_v4 = vrot.slane %v9223_v1, 1  ;;  %v8027_v25 = vld [vmem:[%s11625_s11 + $0x68] sm:$0xff]  }
 0x4b2   :  { %2171 = vmatmul.mubr.bf16.vlgmr.msra.gmra.mxu1 %v1866_v53  ;;  %v11656_v30 = vrot.slane %v9233_v15, 1  ;;  %v11657_v6 = vrot.slane %v9231_v3, 1  ;;  %v1628_v59 = vld [vmem:[#allocation2 + $0x98] sm:$0xfe]  ;;  %v9379_v42 = vld [vmem:[#allocation2 + $0x90] sm:$0xfe]  ;;  %v1758_v26 = vsel %vm1737_vm7, %v1756_v58, %v1757_v8  ;;  %v1764_v56 = vsel %vm1737_vm7, %v1762_v48, %v1763_v19 }
 0x4b3   :  { %v1749_v55 = vsel %vm1737_vm7, %v11655_v4, %v11654_v54  ;;  %v9381_v35 = vld [vmem:[#allocation2 + $0xb0] sm:$0x1]  ;;  %v1759_v17 = vrot.slane %v1620_v5, 1  ;;  %v1760_v28 = vrot.slane %v1624_v32, 1  ;;  %7316 = vmatpush3.bf16.msra.mxu1 %v8021_v41  ;;  %2178 = vmatprep.mubr.bf16.mxu1 %v1871_v33  ;;  %v1632_v1 = vld [vmem:[#allocation2 + $0xb8] sm:$0x1]  ;;  %v1776_v40 = vsel %vm1737_vm7, %v1774_v9, %v1775_v52 }
 0x4b4   :  { %v1746_v63 = vsel %vm1737_vm7, %v11657_v6, %v11656_v30  ;;  %v1636_v37 = vld [vmem:[#allocation2 + $0xd8] sm:$0xfe]  ;;  %v9385_v15 = vld [vmem:[#allocation2 + $0xd0] sm:$0xfe]  ;;  %v1640_v11 = vld [vmem:[#allocation2 + $0xf8] sm:$0x1]  ;;  %7317 = vmatprep.subr.bf16.mxu1 %v8023_v46  ;;  %v1870_v52 = vpack.c.bf16 %v1776_v40, %v1764_v56 }
 0x4b5   :  { %v8022_v3 = vld [vmem:[%s11625_s11 + $0xb8] sm:$0xff]   ;;  %v1771_v44 = vrot.slane %v1628_v59, 1  ;;  %v1772_v2 = vrot.slane %v1632_v1, 1  ;;  %v1783_v22 = vrot.slane %v1636_v37, 1  ;;  %v9394_v58 = vld [vmem:[#allocation2 + $0x1c0] sm:$0xfe]  ;;  %v1761_v29 = vsel %vm1737_vm7, %v1759_v17, %v1760_v28 }
 0x4b6   :  { %v1784_v38 = vrot.slane %v1640_v11, 1  ;;  %v8024_v57 = vld [vmem:[%s11625_s11 + $0xf0] sm:$0xff]   ;;  %v1801_v13 = vrot.slane %v1650_v62, 1  ;;  %v1802_v10 = vrot.slane %v1654_v50, 1  ;;  %v1869_v51 = vpack.c.bf16 %v1761_v29, %v1749_v55  ;;  %v8029_v20 = vld [vmem:[%s11625_s11 + $0x28] sm:$0xff]   ;;  %v8031_v54 = vld [vmem:[%s11625_s11 + $0x60] sm:$0xff]  }
 0x4b7   :  { %v1639_v34 = vld [vmem:[#allocation2 + $0xf0] sm:$0x1]  ;;  %v9400_v24 = vld [vmem:[#allocation2 + $0x190] sm:$0xfe]  ;;  %v1868_v7 = vpack.c.bf16 %v1758_v26, %v1746_v63  ;;  %v1773_v21 = vsel %vm1737_vm7, %v1771_v44, %v1772_v2  ;;  %v11658_v8 = vrot.slane %v9239_v18, 1  ;;  %v11659_v31 = vrot.slane %v9235_v61, 1  ;;  %7318 = vmatpush3.bf16.msra.mxu1 %v8025_v47 }
 0x4b8   :  { %v1652_v0 = vld [vmem:[#allocation2 + $0x1d8] sm:$0xfe]  ;;  %v1656_v41 = vld [vmem:[#allocation2 + $0x1f8] sm:$0x1]  ;;  %v1653_v39 = vld [vmem:[#allocation2 + $0x1e0] sm:$0x1]  ;;  %v1785_v48 = vsel %vm1737_vm7, %v1783_v22, %v1784_v38  ;;  %v1803_v60 = vsel %vm1737_vm7, %v1801_v13, %v1802_v10  ;;  %2235 = vmatprep.mubr.bf16.mxu0 %v1869_v51  ;;  %7319 = vmatprep.subr.bf16.mxu1 %v8027_v25  ;;  %v1797_v2 = vsel %vm1737_vm7, %v1795_v16, %v1796_v27 }
 0x4b9   :  { %v1791_v45 = vsel %vm1737_vm7, %v11659_v31, %v11658_v8  ;;  %v1768_v19 = vrot.slane %v9379_v42, 1  ;;  %v1769_v53 = vrot.slane %v9381_v35, 1  ;;  %v9415_v46 = vld [vmem:[#allocation2 + $0x1b0] sm:$0x1]  ;;  %v1658_v9 = vld [vmem:[#allocation2 + $0x208] sm:$0xfe]  ;;  %v1873_v61 = vpack.c.bf16 %v1785_v48, %v1773_v21  ;;  %2236 = vmatmul.mubr.bf16.vlgmr.msra.gmra.mxu0 %v1868_v7 }
 0x4ba   :  { %v1662_v18 = vld [vmem:[#allocation2 + $0x228] sm:$0x1]  ;;  %v1780_v33 = vrot.slane %v9385_v15, 1  ;;  %v1781_v62 = vrot.slane %v1639_v34, 1  ;;  %v1666_v50 = vld [vmem:[#allocation2 + $0x248] sm:$0xfe]  ;;  %7356 = vmatpush3.bf16.msra.mxu0 %v8022_v3  ;;  %v1875_v6 = vpack.c.bf16 %v1803_v60, %v1791_v45  ;;  %2179 = vmatmul.mubr.bf16.gmra.mxu1 %v1870_v52  ;;  %v1788_v25 = vsel %vm1737_vm7, %v1786_v43, %v1787_v23 }
 0x4bb   :  { %v1670_v5 = vld [vmem:[#allocation2 + $0x268] sm:$0x1]  ;;  %v1807_v47 = vrot.slane %v1652_v0, 1  ;;  %v1808_v32 = vrot.slane %v1656_v41, 1  ;;  %v1798_v4 = vrot.slane %v9394_v58, 1  ;;  %v1799_v55 = vrot.slane %v1653_v39, 1  ;;  %2243 = vmatprep.mubr.bf16.mxu0 %v1873_v61  ;;  %7357 = vmatprep.subr.bf16.mxu0 %v8024_v57 }
 0x4bc   :  { %v8026_v30 = vld [vmem:[%s11625_s11 + $0xb0] sm:$0xff]   ;;  %v1792_v63 = vrot.slane %v9400_v24, 1  ;;  %v8028_v59 = vld [vmem:[%s11625_s11 + $0xe8] sm:$0xff]   ;;  %v8033_v42 = vld [vmem:[%s11625_s11 + $0x20] sm:$0xff]   ;;  %v1813_v35 = vrot.slane %v1658_v9, 1  ;;  %v1814_v17 = vrot.slane %v1662_v18, 1  ;;  %v1770_v1 = vsel %vm1737_vm7, %v1768_v19, %v1769_v53  ;;  %7320 = vmatpush3.bf16.msra.mxu1 %v8029_v20  ;;  %2186 = vmatprep.mubr.bf16.mxu1 %v1875_v6 }
 0x4bd   :  { %v1825_v28 = vrot.slane %v1666_v50, 1  ;;  %v1826_v26 = vrot.slane %v1670_v5, 1  ;;  %v1782_v37 = vsel %vm1737_vm7, %v1780_v33, %v1781_v62  ;;  %v8030_v56 = vld [vmem:[%s11625_s11 + $0xa8] sm:$0xff]   ;;  %v8035_v15 = vld [vmem:[%s11625_s11 + $0x58] sm:$0xff]   ;;  %v1651_v3 = vld [vmem:[#allocation2 + $0x1d0] sm:$0xfe]  ;;  %v1809_v22 = vsel %vm1737_vm7, %v1807_v47, %v1808_v32  ;;  %7321 = vmatprep.subr.bf16.mxu1 %v8031_v54 }
 0x4be   :  { %v1793_v11 = vrot.slane %v9415_v46, 1  ;;  %v1657_v44 = vld [vmem:[#allocation2 + $0x200] sm:$0xfe]  ;;  %v1800_v40 = vsel %vm1737_vm7, %v1798_v4, %v1799_v55  ;;  %v1655_v58 = vld [vmem:[#allocation2 + $0x1f0] sm:$0x1]  ;;  %7358 = vmatpush3.bf16.msra.mxu0 %v8026_v30  ;;  %v1872_v16 = vpack.c.bf16 %v1782_v37, %v1770_v1  ;;  %v1804_v12 = vrot.slane %v1651_v3, 1 }
 0x4bf   :  { %v1660_v29 = vld [vmem:[#allocation2 + $0x218] sm:$0xfe]  ;;  %v1661_v38 = vld [vmem:[#allocation2 + $0x220] sm:$0x1]  ;;  %v1664_v14 = vld [vmem:[#allocation2 + $0x238] sm:$0x1]  ;;  %7359 = vmatprep.subr.bf16.mxu0 %v8028_v59  ;;  %v1815_v36 = vsel %vm1737_vm7, %v1813_v35, %v1814_v17  ;;  %v1827_v43 = vsel %vm1737_vm7, %v1825_v28, %v1826_v26  ;;  %v1877_v13 = vpack.c.bf16 %v1809_v22, %v1797_v2  ;;  %v1874_v10 = vpack.c.bf16 %v1800_v40, %v1788_v25 }
 0x4c0   :  { %v1668_v57 = vld [vmem:[#allocation2 + $0x258] sm:$0xfe]  ;;  %v1672_v49 = vld [vmem:[#allocation2 + $0x278] sm:$0x1]  ;;  %v8032_v27 = vld [vmem:[%s11625_s11 + $0xe0] sm:$0xff]   ;;  %7322 = vmatpush3.bf16.msra.mxu1 %v8033_v42  ;;  %v1805_v24 = vrot.slane %v1655_v58, 1  ;;  %v1879_v41 = vpack.c.bf16 %v1827_v43, %v1815_v36  ;;  %v1794_v60 = vsel %vm1737_vm7, %v1792_v63, %v1793_v11 }
 0x4c1   :  { %v1665_v23 = vld [vmem:[#allocation2 + $0x240] sm:$0xfe]  ;;  %v1669_v34 = vld [vmem:[#allocation2 + $0x260] sm:$0x1]  ;;  %v8037_v51 = vld [vmem:[%s11625_s11 + $0x18] sm:$0xff]   ;;  %v1819_v7 = vrot.slane %v1660_v29, 1  ;;  %2244 = vmatmul.mubr.bf16.gmra.mxu0 %v1872_v16  ;;  %7323 = vmatprep.subr.bf16.mxu1 %v8035_v15 }
 0x4c2   :  { %v1820_v21 = vrot.slane %v1664_v14, 1  ;;  %v1831_v20 = vrot.slane %v1668_v57, 1  ;;  %v1832_v8 = vrot.slane %v1672_v49, 1  ;;  %v8039_v31 = vld [vmem:[%s11625_s11 + $0x50] sm:$0xff]   ;;  %v1810_v45 = vrot.slane %v1657_v44, 1  ;;  %7360 = vmatpush3.bf16.msra.mxu0 %v8030_v56  ;;  %2251 = vmatprep.mubr.bf16.mxu0 %v1877_v13  ;;  %v8034_v0 = vld [vmem:[%s11625_s11 + $0xa0] sm:$0xff]  }
 0x4c3   :  { %v1811_v39 = vrot.slane %v1661_v38, 1  ;;  %v1822_v48 = vrot.slane %v1665_v23, 1  ;;  %v1823_v19 = vrot.slane %v1669_v34, 1  ;;  %7361 = vmatprep.subr.bf16.mxu0 %v8032_v27  ;;  %v8036_v53 = vld [vmem:[%s11625_s11 + $0xd8] sm:$0xff]   ;;  %2187 = vmatmul.mubr.bf16.gmra.mxu1 %v1874_v10  ;;  %v1806_v46 = vsel %vm1737_vm7, %v1804_v12, %v1805_v24  ;;  %v8041_v9 = vld [vmem:[%s11625_s11 + $0x10] sm:$0xff]   ;;  %v8043_v18 = vld [vmem:[%s11625_s11 + $0x48] sm:$0xff]  }
 0x4c4   :  { %7324 = vmatpush3.bf16.msra.mxu1 %v8037_v51  ;;  %2194 = vmatprep.mubr.bf16.mxu1 %v1879_v41  ;;  %v1659_v61 = vld [vmem:[#allocation2 + $0x210] sm:$0xfe]  ;;  %v1821_v52 = vsel %vm1737_vm7, %v1819_v7, %v1820_v21  ;;  %v1833_v33 = vsel %vm1737_vm7, %v1831_v20, %v1832_v8  ;;  %v1663_v62 = vld [vmem:[#allocation2 + $0x230] sm:$0x1]  ;;  %v8038_v47 = vld [vmem:[%s11625_s11 + $0x98] sm:$0xff]   ;;  %v1876_v4 = vpack.c.bf16 %v1806_v46, %v1794_v60 }
 0x4c5   :  { %7325 = vmatprep.subr.bf16.mxu1 %v8039_v31  ;;  %v1667_v50 = vld [vmem:[#allocation2 + $0x250] sm:$0xfe]  ;;  %v1671_v5 = vld [vmem:[#allocation2 + $0x270] sm:$0x1]  ;;  %v1812_v32 = vsel %vm1737_vm7, %v1810_v45, %v1811_v39  ;;  %v1824_v54 = vsel %vm1737_vm7, %v1822_v48, %v1823_v19  ;;  %v1816_v30 = vrot.slane %v1659_v61, 1  ;;  %v9488_v6 = vld [vmem:[#allocation2 + $0x48] sm:$0xff]  ;;  %v1881_v63 = vpack.c.bf16 %v1833_v33, %v1821_v52 }
 0x4c6   :  { %7362 = vmatpush3.bf16.msra.mxu0 %v8034_v0  ;;  %v8040_v55 = vld [vmem:[%s11625_s11 + $0xd0] sm:$0xff]   ;;  %v1817_v59 = vrot.slane %v1663_v62, 1  ;;  %v1828_v42 = vrot.slane %v1667_v50, 1  ;;  %v1829_v35 = vrot.slane %v1671_v5, 1  ;;  %v8045_v17 = vld [vmem:[%s11625_s11 + $0x8] sm:$0xff]   ;;  %v1878_v28 = vpack.c.bf16 %v1824_v54, %v1812_v32  ;;  %v8047_v26 = vld [vmem:[%s11625_s11 + $0x40] sm:$0xff]  }
 0x4c7   :  { %7363 = vmatprep.subr.bf16.mxu0 %v8036_v53  ;;  %v8042_v1 = vld [vmem:[%s11625_s11 + $0x90] sm:$0xff]   ;;  %v9499_v37 = vld [vmem:[#allocation2] sm:$0xff]  ;;  %v8044_v15 = vld [vmem:[%s11625_s11 + $0xc8] sm:$0xff]  }
 0x4c8   :  { %7326 = vmatpush3.bf16.msra.mxu1 %v8041_v9  ;;  %v1530_v56 = vpack.c.bf16 %v9488_v6, %v9499_v37  ;;  %v1818_v3 = vsel %vm1737_vm7, %v1816_v30, %v1817_v59  ;;  %v1830_v11 = vsel %vm1737_vm7, %v1828_v42, %v1829_v35  ;;  %v8049_v44 = vld [vmem:[%s11625_s11] sm:$0xff]   ;;  %v9511_v2 = vld [vmem:[#allocation2 + $0x58] sm:$0xff]  ;;  %v8046_v25 = vld [vmem:[%s11625_s11 + $0x88] sm:$0xff]  }
 0x4c9   :  { %2252 = vmatmul.mubr.bf16.gmra.mxu0 %v1876_v4  ;;  %7327 = vmatprep.subr.bf16.mxu1 %v8043_v18  ;;  %v8051_v22 = vld [vmem:[%s11625_s11 + $0x278] sm:$0xff]   ;;  %v9519_v40 = vld [vmem:[#allocation2 + $0x40] sm:$0xff]  ;;  %v1880_v58 = vpack.c.bf16 %v1830_v11, %v1818_v3  ;;  %v9524_v38 = vld [vmem:[#allocation2 + $0x88] sm:$0xff]  ;;  %v1532_v57 = vpack.c.bf16 %v9511_v2, %v9499_v37 }
 0x4ca   :  { %7364 = vmatpush3.bf16.msra.mxu0 %v8038_v47  ;;  %2259 = vmatprep.mubr.bf16.mxu0 %v1881_v63  ;;  %v8048_v29 = vld [vmem:[%s11625_s11 + $0xc0] sm:$0xff]   ;;  %v9526_v14 = vld [vmem:[#allocation2 + $0xc8] sm:$0xff]  ;;  %v8053_v49 = vld [vmem:[%s11625_s11 + $0x238] sm:$0xff]   ;;  %v1529_v16 = vpack.c.bf16 %v9519_v40, %v9499_v37 }
 0x4cb   :  { %7365 = vmatprep.subr.bf16.mxu0 %v8040_v55  ;;  %2195 = vmatmul.mubr.bf16.gmra.mxu1 %v1878_v28  ;;  %v8055_v27 = vld [vmem:[%s11625_s11 + $0x270] sm:$0xff]   ;;  %v8050_v12 = vld [vmem:[%s11625_s11 + $0x80] sm:$0xff]   ;;  %v1534_v36 = vpack.c.bf16 %v9526_v14, %v9524_v38  ;;  %v8052_v43 = vld [vmem:[%s11625_s11 + $0x2f8] sm:$0xff]  }
 0x4cc   :  { %7328 = vmatpush3.bf16.msra.mxu1 %v8045_v17  ;;  %2492 = vmatprep.mubr.bf16.mxu1 %v1530_v56  ;;  %v9546_v23 = vld [vmem:[#allocation2 + $0x50] sm:$0xff]  ;;  %v9551_v13 = vld [vmem:[#allocation2 + $0x98] sm:$0xff]  ;;  %v8059_v24 = vld [vmem:[%s11625_s11 + $0x268] sm:$0xff]  }
 0x4cd   :  { %7329 = vmatprep.subr.bf16.mxu1 %v8047_v26  ;;  %v8057_v34 = vld [vmem:[%s11625_s11 + $0x230] sm:$0xff]   ;;  %v9553_v10 = vld [vmem:[#allocation2 + $0xd8] sm:$0xff]  ;;  %v9561_v7 = vld [vmem:[#allocation2 + $0x80] sm:$0xff]  ;;  %v1531_v20 = vpack.c.bf16 %v9546_v23, %v9499_v37 }
 0x4ce   :  { %7366 = vmatpush3.bf16.msra.mxu0 %v8042_v1  ;;  %v8054_v51 = vld [vmem:[%s11625_s11 + $0x2b8] sm:$0xff]   ;;  %v9563_v21 = vld [vmem:[#allocation2 + $0xc0] sm:$0xff]  ;;  %v8056_v8 = vld [vmem:[%s11625_s11 + $0x2f0] sm:$0xff]   ;;  %v1536_v45 = vpack.c.bf16 %v9553_v10, %v9551_v13 }
 0x4cf   :  { %7367 = vmatprep.subr.bf16.mxu0 %v8044_v15  ;;  %v9570_v31 = vld [vmem:[#allocation2 + $0x1c8] sm:$0xff]  ;;  %v1533_v41 = vpack.c.bf16 %v9563_v21, %v9561_v7  ;;  %v8063_v39 = vld [vmem:[%s11625_s11 + $0x260] sm:$0xff]   ;;  %v8058_v48 = vld [vmem:[%s11625_s11 + $0x2b0] sm:$0xff]  }
 0x4d0   :  { %7330 = vmatpush3.bf16.msra.mxu1 %v8049_v44  ;;  %v8061_v0 = vld [vmem:[%s11625_s11 + $0x228] sm:$0xff]   ;;  %v1538_v19 = vpack.c.bf16 %v9570_v31, %v9499_v37  ;;  %v9590_v60 = vld [vmem:[#allocation2 + $0x90] sm:$0xff]  ;;  %v8065_v9 = vld [vmem:[%s11625_s11 + $0x220] sm:$0xff]  }
 0x4d1   :  { %2260 = vmatmul.mubr.bf16.gmra.mxu0 %v1880_v58  ;;  %7395 = vmatprep.subr.bf16.mxu1 %v8051_v22  ;;  %v8060_v53 = vld [vmem:[%s11625_s11 + $0x2e8] sm:$0xff]   ;;  %v9592_v46 = vld [vmem:[#allocation2 + $0xd0] sm:$0xff]  ;;  %v9597_v18 = vld [vmem:[#allocation2 + $0x1d8] sm:$0xff] }
 0x4d2   :  { %7368 = vmatpush3.bf16.msra.mxu0 %v8046_v25  ;;  %2557 = vmatprep.mubr.bf16.mxu0 %v1532_v57  ;;  %v8067_v61 = vld [vmem:[%s11625_s11 + $0x258] sm:$0xff]   ;;  %v9602_v52 = vld [vmem:[#allocation2 + $0x8] sm:$0xfc]  ;;  %v9607_v62 = vld [vmem:[#allocation2 + $0x1c0] sm:$0xff]  ;;  %v1535_v5 = vpack.c.bf16 %v9592_v46, %v9590_v60  ;;  %v1540_v55 = vpack.c.bf16 %v9597_v18, %v9499_v37 }
 0x4d3   :  { %7369 = vmatprep.subr.bf16.mxu0 %v8048_v29  ;;  %2493 = vmatmul.mubr.bf16.vlgmr.msra.gmra.mxu1 %v1529_v16  ;;  %v8062_v33 = vld [vmem:[%s11625_s11 + $0x2a8] sm:$0xff]   ;;  %v8064_v47 = vld [vmem:[%s11625_s11 + $0x2e0] sm:$0xff]   ;;  %v8069_v30 = vld [vmem:[%s11625_s11 + $0x218] sm:$0xff]   ;;  %v1537_v17 = vpack.c.bf16 %v9607_v62, %v9499_v37  ;;  %v2722_v44 = vrot.slane %v9602_v52, 2 }
 0x4d4   :  { %7396 = vmatpush3.bf16.msra.mxu1 %v8053_v49  ;;  %2500 = vmatprep.mubr.bf16.mxu1 %v1534_v36  ;;  %v9609_v50 = vld [vmem:[#allocation2 + $0x28] sm:$0x3]  ;;  %v9620_v4 = vld [vmem:[#allocation2] sm:$0xfc]  ;;  %v2599_v63 = vld [vmem:[#allocation2 + $0x48] sm:$0xfc] }
 0x4d5   :  { %7397 = vmatprep.subr.bf16.mxu1 %v8055_v27  ;;  %v9616_v32 = vld [vmem:[#allocation2 + $0x208] sm:$0xff]  ;;  %v9627_v42 = vld [vmem:[#allocation2 + $0x20] sm:$0x3]  ;;  %v9629_v35 = vld [vmem:[#allocation2 + $0x10] sm:$0xfc]  ;;  %v2723_v22 = vrot.slane %v9609_v50, 2 }
 0x4d6   :  { %7370 = vmatpush3.bf16.msra.mxu0 %v8050_v12  ;;  %v9618_v54 = vld [vmem:[#allocation2 + $0x248] sm:$0xff]  ;;  %v8071_v28 = vld [vmem:[%s11625_s11 + $0x250] sm:$0xff]   ;;  %v2593_v26 = vld [vmem:[#allocation2 + $0x18] sm:$0xfc]  ;;  %v2734_v58 = vrot.slane %v2599_v63, 2 }
 0x4d7   :  { %7435 = vmatprep.subr.bf16.mxu0 %v8052_v43  ;;  %v2603_v59 = vld [vmem:[#allocation2 + $0x68] sm:$0x3]  ;;  %v2597_v1 = vld [vmem:[#allocation2 + $0x38] sm:$0x3]  ;;  %v8066_v56 = vld [vmem:[%s11625_s11 + $0x2a0] sm:$0xff]   ;;  %v1542_v3 = vpack.c.bf16 %v9618_v54, %v9616_v32  ;;  %v2728_v43 = vrot.slane %v2593_v26, 2 }
 0x4d8   :  { %7398 = vmatpush3.bf16.msra.mxu1 %v8057_v34  ;;  %v8068_v15 = vld [vmem:[%s11625_s11 + $0x2d8] sm:$0xff]   ;;  %v8073_v11 = vld [vmem:[%s11625_s11 + $0x210] sm:$0xff]   ;;  %v2735_v29 = vrot.slane %v2603_v59, 2  ;;  %v8075_v12 = vld [vmem:[%s11625_s11 + $0x248] sm:$0xff]   ;;  %v2729_v34 = vrot.slane %v2597_v1, 2 }
 0x4d9   :  { %2558 = vmatmul.mubr.bf16.vlgmr.msra.gmra.mxu0 %v1531_v20  ;;  %7399 = vmatprep.subr.bf16.mxu1 %v8059_v24  ;;  %v9649_v25 = vld [vmem:[#allocation2 + $0x30] sm:$0x3]  ;;  %v2601_v57 = vld [vmem:[#allocation2 + $0x58] sm:$0xfc]  ;;  %v2605_v49 = vld [vmem:[#allocation2 + $0x78] sm:$0x3] }
 0x4da   :  { %7436 = vmatpush3.bf16.msra.mxu0 %v8054_v51  ;;  %2565 = vmatprep.mubr.bf16.mxu0 %v1536_v45  ;;  %v9651_v16 = vld [vmem:[#allocation2 + $0x1d0] sm:$0xff]  ;;  %v8070_v27 = vld [vmem:[%s11625_s11 + $0x298] sm:$0xff]   ;;  %v9659_v36 = vld [vmem:[#allocation2 + $0x200] sm:$0xff]  ;;  %v2719_v24 = vrot.slane %v9620_v4, 2 }
 0x4db   :  { %7437 = vmatprep.subr.bf16.mxu0 %v8056_v8  ;;  %2501 = vmatmul.mubr.bf16.gmra.mxu1 %v1533_v41  ;;  %v9662_v51 = vld [vmem:[#allocation2 + $0x180] sm:$0xfc]  ;;  %v9664_v20 = vld [vmem:[#allocation2 + $0x218] sm:$0xff]  ;;  %v1539_v52 = vpack.c.bf16 %v9651_v16, %v9499_v37  ;;  %v8077_v50 = vld [vmem:[%s11625_s11 + $0x208] sm:$0xff]   ;;  %v9690_v37 = vsel %vm2718_vm8, %v2728_v43, %v2729_v34 }
 0x4dc   :  { %7400 = vmatpush3.bf16.msra.mxu1 %v8061_v0  ;;  %2508 = vmatprep.mubr.bf16.mxu1 %v1538_v19  ;;  %v9666_v8 = vld [vmem:[#allocation2 + $0x258] sm:$0xff]  ;;  %v9668_v45 = vld [vmem:[#allocation2 + $0x240] sm:$0xff]  ;;  %v2720_v0 = vrot.slane %v9627_v42, 2  ;;  %v2740_v19 = vrot.slane %v2601_v57, 2  ;;  %v2611_v59 = vld [vmem:[#allocation2 + $0xa8] sm:$0x3] }
 0x4dd   :  { %7401 = vmatprep.subr.bf16.mxu1 %v8063_v39  ;;  %11660 = vst [vmem:[#allocation3_spill] sm:$0xff] %v9668_v45  ;;  %v9672_v39 = vld [vmem:[#allocation2 + $0x188] sm:$0xfc]  ;;  %v1544_v63 = vpack.c.bf16 %v9666_v8, %v9664_v20  ;;  %v1541_v1 = vpack.c.bf16 %v9668_v45, %v9659_v36  ;;  %v8081_v57 = vld [vmem:[%s11625_s11 + $0x200] sm:$0xff]   ;;  %v9719_v34 = vld [vmem:[#allocation2 + $0x70] sm:$0x3] }
 0x4de   :  { %7438 = vmatpush3.bf16.msra.mxu0 %v8058_v48  ;;  %v9674_v48 = vld [vmem:[#allocation2 + $0x1a0] sm:$0x3]  ;;  %v2615_v42 = vld [vmem:[#allocation2 + $0xc8] sm:$0xfc]  ;;  %v9745_v45 = vld [vmem:[#allocation2 + $0x1b8] sm:$0x3] }
 0x4df   :  { %7439 = vmatprep.subr.bf16.mxu0 %v8060_v53  ;;  %v2741_v53 = vrot.slane %v2605_v49, 2  ;;  %v8076_v26 = vld [vmem:[%s11625_s11 + $0x2c8] sm:$0xff]   ;;  %v9712_v49 = vld [vmem:[#allocation2 + $0x50] sm:$0xfc] }
 0x4e0   :  { %7402 = vmatpush3.bf16.msra.mxu1 %v8065_v9  ;;  %v2598_v9 = vld [vmem:[#allocation2 + $0x40] sm:$0xfc]  ;;  %v2737_v4 = vrot.slane %v9712_v49, 2  ;;  %v8085_v49 = vld [vmem:[%s11625_s11 + $0x338] sm:$0xff]  }
 0x4e1   :  { %2566 = vmatmul.mubr.bf16.gmra.mxu0 %v1535_v5  ;;  %7403 = vmatprep.subr.bf16.mxu1 %v8067_v61  ;;  %v2602_v61 = vld [vmem:[#allocation2 + $0x60] sm:$0x3]  ;;  %v2724_v5 = vsel %vm2718_vm8, %v2722_v44, %v2723_v22  ;;  %v9704_v44 = vld [vmem:[#allocation2 + $0x210] sm:$0xff] }
 0x4e2   :  { %7440 = vmatpush3.bf16.msra.mxu0 %v8062_v33  ;;  %2573 = vmatprep.mubr.bf16.mxu0 %v1540_v55  ;;  %v8072_v33 = vld [vmem:[%s11625_s11 + $0x2d0] sm:$0xff]  }
 0x4e3   :  { %7441 = vmatprep.subr.bf16.mxu0 %v8064_v47  ;;  %2509 = vmatmul.mubr.bf16.gmra.mxu1 %v1537_v17  ;;  %v2736_v47 = vsel %vm2718_vm8, %v2734_v58, %v2735_v29  ;;  %v2619_v17 = vld [vmem:[#allocation2 + $0xe8] sm:$0x3]  ;;  %v9706_v22 = vld [vmem:[#allocation2 + $0x250] sm:$0xff]  ;;  %v2742_v29 = vsel %vm2718_vm8, %v2740_v19, %v2741_v53  ;;  %v2747_v19 = vrot.slane %v2611_v59, 2  ;;  %v2758_v53 = vrot.slane %v2615_v42, 2 }
 0x4e4   :  { %7404 = vmatpush3.bf16.msra.mxu1 %v8069_v30  ;;  %2516 = vmatprep.mubr.bf16.mxu1 %v1542_v3  ;;  %v2607_v30 = vld [vmem:[#allocation2 + $0x88] sm:$0xfc]  ;;  %v2732_v3 = vrot.slane %v2602_v61, 2  ;;  %11661 = vst [vmem:[#allocation4_spill] sm:$0xff] %v9706_v22  ;;  %v2848_v58 = vpack.c.bf16 %v2736_v47, %v2724_v5  ;;  %v2759_v61 = vrot.slane %v2619_v17, 2 }
 0x4e5   :  { %7405 = vmatprep.subr.bf16.mxu1 %v8071_v28  ;;  %v8074_v28 = vld [vmem:[%s11625_s11 + $0x290] sm:$0xff]   ;;  %v2609_v5 = vld [vmem:[#allocation2 + $0x98] sm:$0xfc]  ;;  %v2613_v47 = vld [vmem:[#allocation2 + $0xb8] sm:$0x3] }
 0x4e6   :  { %7442 = vmatpush3.bf16.msra.mxu0 %v8066_v56  ;;  %v8079_v56 = vld [vmem:[%s11625_s11 + $0x240] sm:$0xff]   ;;  %v9728_v17 = vld [vmem:[#allocation2 + $0x1a8] sm:$0x3]  ;;  %v2752_v43 = vrot.slane %v2609_v5, 2  ;;  %v2753_v41 = vrot.slane %v2613_v47, 2 }
 0x4e7   :  { %7443 = vmatprep.subr.bf16.mxu0 %v8068_v15  ;;  %v2731_v15 = vrot.slane %v2598_v9, 2  ;;  %v2746_v9 = vrot.slane %v2607_v30, 2  ;;  %v2621_v30 = vld [vmem:[#allocation2 + $0xf8] sm:$0x3]  ;;  %v2606_v59 = vld [vmem:[#allocation2 + $0x80] sm:$0xfc] }
 0x4e8   :  { %7406 = vmatpush3.bf16.msra.mxu1 %v8073_v11  ;;  %v2610_v42 = vld [vmem:[#allocation2 + $0xa0] sm:$0x3]  ;;  %v2760_v11 = vsel %vm2718_vm8, %v2758_v53, %v2759_v61  ;;  %v8084_v61 = vld [vmem:[%s11625_s11 + $0x3f8] sm:$0xff]  }
 0x4e9   :  { %2574 = vmatmul.mubr.bf16.gmra.mxu0 %v1539_v52  ;;  %7407 = vmatprep.subr.bf16.mxu1 %v8075_v12  ;;  %v8078_v52 = vld [vmem:[%s11625_s11 + $0x288] sm:$0xff]   ;;  %v8082_v53 = vld [vmem:[%s11625_s11 + $0x280] sm:$0xff]  }
 0x4ea   :  { %7444 = vmatpush3.bf16.msra.mxu0 %v8070_v27  ;;  %2581 = vmatprep.mubr.bf16.mxu0 %v1544_v63  ;;  %v8083_v27 = vld [vmem:[%s11625_s11 + $0x378] sm:$0xff]   ;;  %v2721_v63 = vsel %vm2718_vm8, %v2719_v24, %v2720_v0  ;;  %v2614_v24 = vld [vmem:[#allocation2 + $0xc0] sm:$0xfc]  ;;  %v2618_v0 = vld [vmem:[#allocation2 + $0xe0] sm:$0x3] }
 0x4eb   :  { %7445 = vmatprep.subr.bf16.mxu0 %v8072_v33  ;;  %2517 = vmatmul.mubr.bf16.gmra.mxu1 %v1541_v1  ;;  %v2617_v33 = vld [vmem:[#allocation2 + $0xd8] sm:$0xfc]  ;;  %v2733_v1 = vsel %vm2718_vm8, %v2731_v15, %v2732_v3  ;;  %v2738_v3 = vrot.slane %v9719_v34, 2  ;;  %v2631_v12 = vld [vmem:[#allocation2 + $0x1c8] sm:$0xfc]  ;;  %v2743_v34 = vrot.slane %v2606_v59, 2 }
 0x4ec   :  { %7408 = vmatpush3.bf16.msra.mxu1 %v8077_v50  ;;  %3151 = vmatprep.mubr.bf16.mxu1 %v2848_v58  ;;  %v1543_v50 = vpack.c.bf16 %v9706_v22, %v9704_v44  ;;  %v2850_v58 = vpack.c.bf16 %v2742_v29, %v9690_v37  ;;  %v9737_v15 = vld [vmem:[#allocation2 + $0x198] sm:$0xfc]  ;;  %v2635_v37 = vld [vmem:[#allocation2 + $0x1e8] sm:$0x3]  ;;  %v2847_v29 = vpack.c.bf16 %v2733_v1, %v2721_v63  ;;  %v2764_v55 = vrot.slane %v2617_v33, 2 }
 0x4ed   :  { %7409 = vmatprep.subr.bf16.mxu1 %v8079_v56  ;;  %v8080_v56 = vld [vmem:[%s11625_s11 + $0x2c0] sm:$0xff]   ;;  %v2765_v22 = vrot.slane %v2621_v30, 2  ;;  %v2782_v47 = vrot.slane %v2631_v12, 2  ;;  %v2783_v33 = vrot.slane %v2635_v37, 2  ;;  %v11662_v63 = vrot.slane %v9649_v25, 2  ;;  %v8089_v30 = vld [vmem:[%s11625_s11 + $0x330] sm:$0xff]  }
 0x4ee   :  { %7446 = vmatpush3.bf16.msra.mxu0 %v8074_v28  ;;  %v2748_v28 = vsel %vm2718_vm8, %v2746_v9, %v2747_v19  ;;  %v2744_v9 = vrot.slane %v2610_v42, 2  ;;  %v2755_v19 = vrot.slane %v2614_v24, 2  ;;  %v2608_v59 = vld [vmem:[#allocation2 + $0x90] sm:$0xfc]  ;;  %v2777_v42 = vrot.slane %v9745_v45, 2 }
 0x4ef   :  { %7447 = vmatprep.subr.bf16.mxu0 %v8076_v26  ;;  %v8087_v26 = vld [vmem:[%s11625_s11 + $0x370] sm:$0xff]   ;;  %v2852_v5 = vpack.c.bf16 %v2760_v11, %v2748_v28  ;;  %v8091_v11 = vld [vmem:[%s11625_s11 + $0x368] sm:$0xff]   ;;  %v2754_v25 = vsel %vm2718_vm8, %v2752_v43, %v2753_v41  ;;  %v2633_v28 = vld [vmem:[#allocation2 + $0x1d8] sm:$0xfc]  ;;  %v11664_v41 = vrot.slane %v9672_v39, 2 }
 0x4f0   :  { %7410 = vmatpush3.bf16.msra.mxu1 %v8081_v57  ;;  %v2756_v57 = vrot.slane %v2618_v0, 2  ;;  %v2620_v24 = vld [vmem:[#allocation2 + $0xf0] sm:$0x3]  ;;  %v2637_v37 = vld [vmem:[#allocation2 + $0x1f8] sm:$0x3]  ;;  %v8093_v39 = vld [vmem:[%s11625_s11 + $0x328] sm:$0xff]  }
 0x4f1   :  { %2582 = vmatmul.mubr.bf16.gmra.mxu0 %v1543_v50  ;;  %7475 = vmatprep.subr.bf16.mxu1 %v8083_v27  ;;  %v2771_v27 = vrot.slane %v9728_v17, 2  ;;  %v2739_v17 = vsel %vm2718_vm8, %v2737_v4, %v2738_v3  ;;  %v2766_v50 = vsel %vm2718_vm8, %v2764_v55, %v2765_v22  ;;  %v8088_v0 = vld [vmem:[%s11625_s11 + $0x3f0] sm:$0xff]   ;;  %v2745_v4 = vsel %vm2718_vm8, %v2743_v34, %v2744_v9  ;;  %v2634_v43 = vld [vmem:[#allocation2 + $0x1e0] sm:$0x3]  ;;  %v2647_v9 = vld [vmem:[#allocation2 + $0x248] sm:$0xfc] }
 0x4f2   :  { %7448 = vmatpush3.bf16.msra.mxu0 %v8078_v52  ;;  %3216 = vmatprep.mubr.bf16.mxu0 %v2850_v58  ;;  %v11663_v52 = vrot.slane %v9629_v35, 2  ;;  %v8086_v35 = vld [vmem:[%s11625_s11 + $0x3b8] sm:$0xff]   ;;  %v2612_v58 = vld [vmem:[#allocation2 + $0xb0] sm:$0x3]  ;;  %v2757_v3 = vsel %vm2718_vm8, %v2755_v19, %v2756_v57  ;;  %v2784_v22 = vsel %vm2718_vm8, %v2782_v47, %v2783_v33  ;;  %v2651_v19 = vld [vmem:[#allocation2 + $0x268] sm:$0x3] }
 0x4f3   :  { %7449 = vmatprep.subr.bf16.mxu0 %v8080_v56  ;;  %3152 = vmatmul.mubr.bf16.vlgmr.msra.gmra.mxu1 %v2847_v29  ;;  %v2616_v56 = vld [vmem:[#allocation2 + $0xd0] sm:$0xfc]  ;;  %v2630_v29 = vld [vmem:[#allocation2 + $0x1c0] sm:$0xfc]  ;;  %v2772_v55 = vsel %vm2718_vm8, %v11664_v41, %v2771_v27  ;;  %v2750_v34 = vrot.slane %v2612_v58, 2  ;;  %v2851_v57 = vpack.c.bf16 %v2757_v3, %v2745_v4  ;;  %v2788_v27 = vrot.slane %v2633_v28, 2 }
 0x4f4   :  { %v2727_v1 = vsel %vm2718_vm8, %v11663_v52, %v11662_v63  ;;  %7476 = vmatpush3.bf16.msra.mxu1 %v8085_v49  ;;  %3159 = vmatprep.mubr.bf16.mxu1 %v2852_v5  ;;  %v2639_v49 = vld [vmem:[#allocation2 + $0x208] sm:$0xfc]  ;;  %v2854_v63 = vpack.c.bf16 %v2766_v50, %v2754_v25  ;;  %v2749_v52 = vrot.slane %v2608_v59, 2  ;;  %v2761_v12 = vrot.slane %v2616_v56, 2  ;;  %v9788_v47 = vld [vmem:[#allocation2 + $0x190] sm:$0xfc] }
 0x4f5   :  { %7477 = vmatprep.subr.bf16.mxu1 %v8087_v26  ;;  %v2643_v26 = vld [vmem:[#allocation2 + $0x228] sm:$0x3]  ;;  %v2849_v5 = vpack.c.bf16 %v2739_v17, %v2727_v1  ;;  %v2789_v33 = vrot.slane %v2637_v37, 2  ;;  %v8095_v1 = vld [vmem:[%s11625_s11 + $0x360] sm:$0xff]   ;;  %v2779_v59 = vrot.slane %v2630_v29, 2  ;;  %v8090_v25 = vld [vmem:[%s11625_s11 + $0x3b0] sm:$0xff]  }
 0x4f6   :  { %7450 = vmatpush3.bf16.msra.mxu0 %v8082_v53  ;;  %v2762_v53 = vrot.slane %v2620_v24, 2  ;;  %v9793_v17 = vld [vmem:[#allocation2 + $0x1b0] sm:$0x3]  ;;  %v2794_v50 = vrot.slane %v2639_v49, 2  ;;  %v2795_v58 = vrot.slane %v2643_v26, 2  ;;  %v2806_v56 = vrot.slane %v2647_v9, 2 }
 0x4f7   :  { %7515 = vmatprep.subr.bf16.mxu0 %v8084_v61  ;;  %v2856_v61 = vpack.c.bf16 %v2784_v22, %v2772_v55  ;;  %v8092_v24 = vld [vmem:[%s11625_s11 + $0x3e8] sm:$0xff]   ;;  %v8097_v4 = vld [vmem:[%s11625_s11 + $0x320] sm:$0xff]   ;;  %v2751_v3 = vsel %vm2718_vm8, %v2749_v52, %v2750_v34  ;;  %v8099_v37 = vld [vmem:[%s11625_s11 + $0x358] sm:$0xff]   ;;  %v2774_v55 = vrot.slane %v9793_v17, 2  ;;  %v11665_v22 = vrot.slane %v9737_v15, 2 }
 0x4f8   :  { %7478 = vmatpush3.bf16.msra.mxu1 %v8089_v30  ;;  %v2780_v30 = vrot.slane %v2634_v43, 2  ;;  %v2763_v28 = vsel %vm2718_vm8, %v2761_v12, %v2762_v53  ;;  %v2632_v29 = vld [vmem:[#allocation2 + $0x1d0] sm:$0xfc]  ;;  %v2636_v41 = vld [vmem:[#allocation2 + $0x1f0] sm:$0x3]  ;;  %v2790_v43 = vsel %vm2718_vm8, %v2788_v27, %v2789_v33  ;;  %v11666_v49 = vrot.slane %v9674_v48, 2 }
 0x4f9   :  { %3217 = vmatmul.mubr.bf16.vlgmr.msra.gmra.mxu0 %v2849_v5  ;;  %7479 = vmatprep.subr.bf16.mxu1 %v8091_v11  ;;  %v2807_v11 = vrot.slane %v2651_v19, 2  ;;  %v2778_v12 = vsel %vm2718_vm8, %v11665_v22, %v2777_v42  ;;  %v11667_v26 = vrot.slane %v9662_v51, 2  ;;  %v2641_v52 = vld [vmem:[#allocation2 + $0x218] sm:$0xfc]  ;;  %v2645_v34 = vld [vmem:[#allocation2 + $0x238] sm:$0x3]  ;;  %v2796_v45 = vsel %vm2718_vm8, %v2794_v50, %v2795_v58 }
 0x4fa   :  { %7516 = vmatpush3.bf16.msra.mxu0 %v8086_v35  ;;  %3224 = vmatprep.mubr.bf16.mxu0 %v2854_v63  ;;  %v2773_v35 = vrot.slane %v9788_v47, 2  ;;  %v2781_v63 = vsel %vm2718_vm8, %v2779_v59, %v2780_v30  ;;  %v2649_v9 = vld [vmem:[#allocation2 + $0x258] sm:$0xfc]  ;;  %v2653_v42 = vld [vmem:[#allocation2 + $0x278] sm:$0x3]  ;;  %v2853_v53 = vpack.c.bf16 %v2763_v28, %v2751_v3  ;;  %v8096_v51 = vld [vmem:[%s11625_s11 + $0x3e0] sm:$0xff]   ;;  %v2858_v47 = vpack.c.bf16 %v2790_v43, %v2778_v12 }
 0x4fb   :  { %7517 = vmatprep.subr.bf16.mxu0 %v8088_v0  ;;  %3160 = vmatmul.mubr.bf16.gmra.mxu1 %v2851_v57  ;;  %v8094_v0 = vld [vmem:[%s11625_s11 + $0x3a8] sm:$0xff]   ;;  %v2769_v5 = vsel %vm2718_vm8, %v11667_v26, %v11666_v49  ;;  %v2808_v15 = vsel %vm2718_vm8, %v2806_v56, %v2807_v11  ;;  %v2638_v19 = vld [vmem:[#allocation2 + $0x200] sm:$0xfc]  ;;  %v2642_v57 = vld [vmem:[#allocation2 + $0x220] sm:$0x3]  ;;  %v2785_v48 = vrot.slane %v2632_v29, 2 }
 0x4fc   :  { %7480 = vmatpush3.bf16.msra.mxu1 %v8093_v39  ;;  %3167 = vmatprep.mubr.bf16.mxu1 %v2856_v61  ;;  %v2646_v39 = vld [vmem:[#allocation2 + $0x240] sm:$0xfc]  ;;  %v2650_v27 = vld [vmem:[#allocation2 + $0x260] sm:$0x3]  ;;  %v2855_v61 = vpack.c.bf16 %v2781_v63, %v2769_v5  ;;  %v2786_v33 = vrot.slane %v2636_v41, 2  ;;  %v2800_v59 = vrot.slane %v2641_v52, 2  ;;  %v2860_v30 = vpack.c.bf16 %v2808_v15, %v2796_v45 }
 0x4fd   :  { %7481 = vmatprep.subr.bf16.mxu1 %v8095_v1  ;;  %v8101_v1 = vld [vmem:[%s11625_s11 + $0x318] sm:$0xff]   ;;  %v2801_v17 = vrot.slane %v2645_v34, 2  ;;  %v2813_v50 = vrot.slane %v2653_v42, 2  ;;  %v8103_v58 = vld [vmem:[%s11625_s11 + $0x350] sm:$0xff]   ;;  %v8098_v56 = vld [vmem:[%s11625_s11 + $0x3a0] sm:$0xff]   ;;  %v2791_v11 = vrot.slane %v2638_v19, 2 }
 0x4fe   :  { %7518 = vmatpush3.bf16.msra.mxu0 %v8090_v25  ;;  %v2812_v25 = vrot.slane %v2649_v9, 2  ;;  %v2804_v3 = vrot.slane %v2650_v27, 2  ;;  %v8100_v28 = vld [vmem:[%s11625_s11 + $0x3d8] sm:$0xff]   ;;  %v2787_v29 = vsel %vm2718_vm8, %v2785_v48, %v2786_v33  ;;  %v8107_v41 = vld [vmem:[%s11625_s11 + $0x348] sm:$0xff]   ;;  %v2640_v22 = vld [vmem:[#allocation2 + $0x210] sm:$0xfc] }
 0x4ff   :  { %7519 = vmatprep.subr.bf16.mxu0 %v8092_v24  ;;  %v2792_v24 = vrot.slane %v2642_v57, 2  ;;  %v2802_v12 = vsel %vm2718_vm8, %v2800_v59, %v2801_v17  ;;  %v2644_v49 = vld [vmem:[#allocation2 + $0x230] sm:$0x3]  ;;  %v8102_v26 = vld [vmem:[%s11625_s11 + $0x398] sm:$0xff]   ;;  %v2797_v9 = vrot.slane %v2640_v22, 2  ;;  %v8109_v57 = vld [vmem:[%s11625_s11 + $0x308] sm:$0xff]   ;;  %v3292_v17 = vpack.c.bf16 %v9551_v13, %v9511_v2 }
 0x500   :  { %7482 = vmatpush3.bf16.msra.mxu1 %v8097_v4  ;;  %v2803_v4 = vrot.slane %v2646_v39, 2  ;;  %v2814_v43 = vsel %vm2718_vm8, %v2812_v25, %v2813_v50  ;;  %v8104_v34 = vld [vmem:[%s11625_s11 + $0x3d0] sm:$0xff]   ;;  %v2798_v15 = vrot.slane %v2644_v49, 2  ;;  %v3290_v39 = vpack.c.bf16 %v9524_v38, %v9488_v6  ;;  %v8108_v27 = vld [vmem:[%s11625_s11 + $0x3c8] sm:$0xff]   ;;  %v8113_v33 = vld [vmem:[%s11625_s11 + $0x300] sm:$0xff]  }
 0x501   :  { %3225 = vmatmul.mubr.bf16.gmra.mxu0 %v2853_v53  ;;  %7483 = vmatprep.subr.bf16.mxu1 %v8099_v37  ;;  %v2775_v37 = vsel %vm2718_vm8, %v2773_v35, %v2774_v55  ;;  %v2648_v35 = vld [vmem:[#allocation2 + $0x250] sm:$0xfc]  ;;  %v2652_v55 = vld [vmem:[#allocation2 + $0x270] sm:$0x3]  ;;  %v2793_v5 = vsel %vm2718_vm8, %v2791_v11, %v2792_v24  ;;  %v2862_v45 = vpack.c.bf16 %v2814_v43, %v2802_v12  ;;  %v8115_v6 = vld [vmem:[%s11625_s11 + $0x478] sm:$0xff]  }
 0x502   :  { %7520 = vmatpush3.bf16.msra.mxu0 %v8094_v0  ;;  %3232 = vmatprep.mubr.bf16.mxu0 %v2858_v47  ;;  %v8105_v0 = vld [vmem:[%s11625_s11 + $0x310] sm:$0xff]   ;;  %v2805_v63 = vsel %vm2718_vm8, %v2803_v4, %v2804_v3  ;;  %v2857_v52 = vpack.c.bf16 %v2787_v29, %v2775_v37  ;;  %v2809_v42 = vrot.slane %v2648_v35, 2  ;;  %v2810_v19 = vrot.slane %v2652_v55, 2  ;;  %v8110_v38 = vld [vmem:[%s11625_s11 + $0x388] sm:$0xff]   ;;  %v8112_v59 = vld [vmem:[%s11625_s11 + $0x3c0] sm:$0xff]  }
 0x503   :  { %7521 = vmatprep.subr.bf16.mxu0 %v8096_v51  ;;  %3168 = vmatmul.mubr.bf16.gmra.mxu1 %v2855_v61  ;;  %v2859_v53 = vpack.c.bf16 %v2805_v63, %v2793_v5  ;;  %v8111_v51 = vld [vmem:[%s11625_s11 + $0x340] sm:$0xff]   ;;  %v8106_v48 = vld [vmem:[%s11625_s11 + $0x390] sm:$0xff]   ;;  %v2799_v47 = vsel %vm2718_vm8, %v2797_v9, %v2798_v15  ;;  %v8117_v25 = vld [vmem:[%s11625_s11 + $0x438] sm:$0xff]   ;;  %v3289_v50 = vpack.c.bf16 %v9561_v7, %v9519_v40 }
 0x504   :  { %7484 = vmatpush3.bf16.msra.mxu1 %v8101_v1  ;;  %3175 = vmatprep.mubr.bf16.mxu1 %v2860_v30  ;;  %v2811_v61 = vsel %vm2718_vm8, %v2809_v42, %v2810_v19  ;;  %v3270_v30 = vld [vmem:[#allocation2 + $0x108] sm:$0xff]  ;;  %v8114_v2 = vld [vmem:[%s11625_s11 + $0x380] sm:$0xff]   ;;  %v8121_v40 = vld [vmem:[%s11625_s11 + $0x430] sm:$0xff]   ;;  %v3291_v4 = vpack.c.bf16 %v9590_v60, %v9546_v23  ;;  %v3300_v55 = vpack.c.bf16 %v9664_v20, %v9597_v18 }
 0x505   :  { %7485 = vmatprep.subr.bf16.mxu1 %v8103_v58  ;;  %v2861_v1 = vpack.c.bf16 %v2811_v61, %v2799_v47  ;;  %v8119_v58 = vld [vmem:[%s11625_s11 + $0x470] sm:$0xff]   ;;  %v3294_v13 = vpack.c.bf16 %v3270_v30, %v9526_v14  ;;  %v3272_v7 = vld [vmem:[#allocation2 + $0x118] sm:$0xff]  ;;  %v8123_v11 = vld [vmem:[%s11625_s11 + $0x468] sm:$0xff]  }
 0x506   :  { %7522 = vmatpush3.bf16.msra.mxu0 %v8098_v56  ;;  %v8116_v56 = vld [vmem:[%s11625_s11 + $0x4f8] sm:$0xff]   ;;  %v3269_v24 = vld [vmem:[#allocation2 + $0x100] sm:$0xff]  ;;  %v8120_v3 = vld [vmem:[%s11625_s11 + $0x4f0] sm:$0xff]  }
 0x507   :  { %7523 = vmatprep.subr.bf16.mxu0 %v8100_v28  ;;  %v8118_v14 = vld [vmem:[%s11625_s11 + $0x4b8] sm:$0xff]   ;;  %v3296_v28 = vpack.c.bf16 %v3272_v7, %v9553_v10  ;;  %v8125_v37 = vld [vmem:[%s11625_s11 + $0x428] sm:$0xff]   ;;  %v3293_v29 = vpack.c.bf16 %v3269_v24, %v9563_v21  ;;  %v8122_v23 = vld [vmem:[%s11625_s11 + $0x4b0] sm:$0xff]   ;;  %v3298_v10 = vpack.c.bf16 %v9616_v32, %v9570_v31 }
 0x508   :  { %7486 = vmatpush3.bf16.msra.mxu1 %v8105_v0  ;;  %v8127_v0 = vld [vmem:[%s11625_s11 + $0x460] sm:$0xff]   ;;  %v8124_v60 = vld [vmem:[%s11625_s11 + $0x4e8] sm:$0xff]   ;;  %v3271_v21 = vld [vmem:[#allocation2 + $0x110] sm:$0xff] }
 0x509   :  { %3233 = vmatmul.mubr.bf16.gmra.mxu0 %v2857_v52  ;;  %7487 = vmatprep.subr.bf16.mxu1 %v8107_v41  ;;  %v8129_v41 = vld [vmem:[%s11625_s11 + $0x420] sm:$0xff]   ;;  %v8131_v22 = vld [vmem:[%s11625_s11 + $0x458] sm:$0xff]   ;;  %v8126_v31 = vld [vmem:[%s11625_s11 + $0x4a8] sm:$0xff]   ;;  %v3295_v12 = vpack.c.bf16 %v3271_v21, %v9592_v46 }
 0x50a   :  { %7524 = vmatpush3.bf16.msra.mxu0 %v8102_v26  ;;  %3240 = vmatprep.mubr.bf16.mxu0 %v2862_v45  ;;  %v8128_v32 = vld [vmem:[%s11625_s11 + $0x4e0] sm:$0xff]   ;;  %v8133_v43 = vld [vmem:[%s11625_s11 + $0x418] sm:$0xff]   ;;  %v3286_v49 = vld [vmem:[#allocation2 + $0x288] sm:$0xff] }
 0x50b   :  { %7525 = vmatprep.subr.bf16.mxu0 %v8104_v34  ;;  %3176 = vmatmul.mubr.bf16.gmra.mxu1 %v2859_v53  ;;  %v3700_v35 = vld [vmem:[#allocation2 + $0x48] sm:$0xfe]  ;;  %v3704_v26 = vld [vmem:[#allocation2 + $0x68] sm:$0x1]  ;;  %v8130_v52 = vld [vmem:[%s11625_s11 + $0x4a0] sm:$0xff]   ;;  %v3297_v34 = vpack.c.bf16 %v9659_v36, %v9607_v62  ;;  %v3302_v20 = vpack.c.bf16 %v3286_v49, %v9618_v54 }
 0x50c   :  { %7488 = vmatpush3.bf16.msra.mxu1 %v8109_v57  ;;  %3593 = vmatprep.mubr.bf16.mxu1 %v3290_v39  ;;  %v3708_v5 = vld [vmem:[#allocation2 + $0x88] sm:$0xfe]  ;;  %v3712_v63 = vld [vmem:[#allocation2 + $0xa8] sm:$0x1]  ;;  %v8132_v46 = vld [vmem:[%s11625_s11 + $0x4d8] sm:$0xff]   ;;  %v3830_v19 = vrot.slane %v3700_v35, 1 }
 0x50d   :  { %7489 = vmatprep.subr.bf16.mxu1 %v8111_v51  ;;  %v8135_v18 = vld [vmem:[%s11625_s11 + $0x450] sm:$0xff]   ;;  %v9969_v45 = vld [vmem:[#allocation2 + $0x58] sm:$0xfe]  ;;  %v9971_v15 = vld [vmem:[#allocation2 + $0x78] sm:$0x1]  ;;  %v3831_v57 = vrot.slane %v3704_v26, 1 }
 0x50e   :  { %7526 = vmatpush3.bf16.msra.mxu0 %v8106_v48  ;;  %v8137_v9 = vld [vmem:[%s11625_s11 + $0x410] sm:$0xff]   ;;  %v9973_v42 = vld [vmem:[#allocation2 + $0x98] sm:$0xfe]  ;;  %v8139_v36 = vld [vmem:[%s11625_s11 + $0x448] sm:$0xff]   ;;  %v3842_v54 = vrot.slane %v3708_v5, 1  ;;  %v3843_v53 = vrot.slane %v3712_v63, 1 }
 0x50f   :  { %7527 = vmatprep.subr.bf16.mxu0 %v8108_v27  ;;  %v3288_v62 = vld [vmem:[#allocation2 + $0x298] sm:$0xff]  ;;  %v3285_v39 = vld [vmem:[#allocation2 + $0x280] sm:$0xff]  ;;  %v8136_v61 = vld [vmem:[%s11625_s11 + $0x4d0] sm:$0xff]  }
 0x510   :  { %7490 = vmatpush3.bf16.msra.mxu1 %v8113_v33  ;;  %v9978_v51 = vld [vmem:[#allocation2 + $0xb8] sm:$0x1]  ;;  %v9983_v27 = vld [vmem:[#allocation2 + $0x40] sm:$0xfe]  ;;  %v9985_v47 = vld [vmem:[#allocation2 + $0x60] sm:$0x1] }
 0x511   :  { %3241 = vmatmul.mubr.bf16.gmra.mxu0 %v2861_v1  ;;  %7555 = vmatprep.subr.bf16.mxu1 %v8115_v6  ;;  %v8134_v48 = vld [vmem:[%s11625_s11 + $0x498] sm:$0xff]   ;;  %v3836_v33 = vrot.slane %v9969_v45, 1  ;;  %v3837_v6 = vrot.slane %v9971_v15, 1  ;;  %v9994_v1 = vld [vmem:[#allocation2 + $0xa0] sm:$0x1]  ;;  %v8141_v30 = vld [vmem:[%s11625_s11 + $0x408] sm:$0xff]  }
 0x512   :  { %7528 = vmatpush3.bf16.msra.mxu0 %v8110_v38  ;;  %3658 = vmatprep.mubr.bf16.mxu0 %v3292_v17  ;;  %v9992_v38 = vld [vmem:[#allocation2 + $0x80] sm:$0xfe]  ;;  %v3848_v17 = vrot.slane %v9973_v42, 1  ;;  %v3716_v7 = vld [vmem:[#allocation2 + $0xc8] sm:$0xfe]  ;;  %v8138_v24 = vld [vmem:[%s11625_s11 + $0x490] sm:$0xff]  }
 0x513   :  { %7529 = vmatprep.subr.bf16.mxu0 %v8112_v59  ;;  %3594 = vmatmul.mubr.bf16.vlgmr.msra.gmra.mxu1 %v3289_v50  ;;  %v3299_v59 = vpack.c.bf16 %v9704_v44, %v9651_v16  ;;  %v10003_v50 = vld [vmem:[#allocation2 + $0x50] sm:$0xfe]  ;;  %v8143_v16 = vld [vmem:[%s11625_s11 + $0x440] sm:$0xff]   ;;  %v3827_v44 = vrot.slane %v9983_v27, 1  ;;  %v8147_v49 = vld [vmem:[%s11625_s11 + $0x578] sm:$0xff]   ;;  %v3838_v45 = vsel %vm1737_vm7, %v3836_v33, %v3837_v6 }
 0x514   :  { %7556 = vmatpush3.bf16.msra.mxu1 %v8117_v25  ;;  %3601 = vmatprep.mubr.bf16.mxu1 %v3294_v13  ;;  %v3849_v25 = vrot.slane %v9978_v51, 1  ;;  %v3832_v13 = vsel %vm1737_vm7, %v3830_v19, %v3831_v57  ;;  %v10042_v26 = vld [vmem:[#allocation2 + $0x118] sm:$0xfe]  ;;  %v10044_v5 = vld [vmem:[#allocation2 + $0x138] sm:$0x1]  ;;  %v11669_v63 = vld [vmem:[#allocation4_spill] sm:$0xff] }
 0x515   :  { %7557 = vmatprep.subr.bf16.mxu1 %v8119_v58  ;;  %v10005_v58 = vld [vmem:[#allocation2 + $0x70] sm:$0x1]  ;;  %v8144_v42 = vld [vmem:[%s11625_s11 + $0x4c0] sm:$0xff]   ;;  %v8149_v51 = vld [vmem:[%s11625_s11 + $0x538] sm:$0xff]  }
 0x516   :  { %7530 = vmatpush3.bf16.msra.mxu0 %v8114_v2  ;;  %v10007_v2 = vld [vmem:[#allocation2 + $0x290] sm:$0xff]  ;;  %v3834_v21 = vrot.slane %v10005_v58, 1  ;;  %v3850_v15 = vsel %vm1737_vm7, %v3848_v17, %v3849_v25  ;;  %v10064_v19 = vld [vmem:[#allocation2 + $0x100] sm:$0xfe]  ;;  %v10066_v57 = vld [vmem:[#allocation2 + $0x120] sm:$0x1] }
 0x517   :  { %7595 = vmatprep.subr.bf16.mxu0 %v8116_v56  ;;  %v3844_v56 = vsel %vm1737_vm7, %v3842_v54, %v3843_v53  ;;  %v10075_v27 = vld [vmem:[#allocation2 + $0xd0] sm:$0xfe]  ;;  %v3958_v17 = vpack.c.bf16 %v3850_v15, %v3838_v45  ;;  %v8146_v25 = vld [vmem:[%s11625_s11 + $0x480] sm:$0xff]   ;;  %v8150_v58 = vld [vmem:[%s11625_s11 + $0x5b8] sm:$0xff]  }
 0x518   :  { %7558 = vmatpush3.bf16.msra.mxu1 %v8121_v40  ;;  %v3828_v40 = vrot.slane %v9985_v47, 1  ;;  %v10077_v47 = vld [vmem:[#allocation2 + $0xf0] sm:$0x1]  ;;  %v10147_v45 = vld [vmem:[#allocation2 + $0x1d0] sm:$0xfe] }
 0x519   :  { %3659 = vmatmul.mubr.bf16.vlgmr.msra.gmra.mxu0 %v3291_v4  ;;  %7559 = vmatprep.subr.bf16.mxu1 %v8123_v11  ;;  %v3720_v11 = vld [vmem:[#allocation2 + $0xe8] sm:$0x1]  ;;  %v3839_v4 = vrot.slane %v9992_v38, 1  ;;  %v8151_v6 = vld [vmem:[%s11625_s11 + $0x570] sm:$0xff]  }
 0x51a   :  { %7596 = vmatpush3.bf16.msra.mxu0 %v8118_v14  ;;  %3666 = vmatprep.mubr.bf16.mxu0 %v3296_v28  ;;  %v3304_v14 = vpack.c.bf16 %v3288_v62, %v9666_v8  ;;  %v3724_v28 = vld [vmem:[#allocation2 + $0x108] sm:$0xfe]  ;;  %v10026_v8 = vld [vmem:[#allocation2 + $0x90] sm:$0xfe]  ;;  %v3829_v54 = vsel %vm1737_vm7, %v3827_v44, %v3828_v40  ;;  %v8148_v44 = vld [vmem:[%s11625_s11 + $0x5f8] sm:$0xff]  }
 0x51b   :  { %7597 = vmatprep.subr.bf16.mxu0 %v8120_v3  ;;  %3602 = vmatmul.mubr.bf16.gmra.mxu1 %v3293_v29  ;;  %v3840_v3 = vrot.slane %v9994_v1, 1  ;;  %v8140_v29 = vld [vmem:[%s11625_s11 + $0x4c8] sm:$0xff]   ;;  %v3866_v35 = vrot.slane %v3724_v28, 1  ;;  %v10149_v15 = vld [vmem:[#allocation2 + $0x1f0] sm:$0x1] }
 0x51c   :  { %7560 = vmatpush3.bf16.msra.mxu1 %v8125_v37  ;;  %3609 = vmatprep.mubr.bf16.mxu1 %v3298_v10  ;;  %v3728_v37 = vld [vmem:[#allocation2 + $0x128] sm:$0x1]  ;;  %v10028_v10 = vld [vmem:[#allocation2 + $0xb0] sm:$0x1] }
 0x51d   :  { %7561 = vmatprep.subr.bf16.mxu1 %v8127_v0  ;;  %v11668_v0 = vld [vmem:[#allocation3_spill] sm:$0xff]  ;;  %v3841_v53 = vsel %vm1737_vm7, %v3839_v4, %v3840_v3  ;;  %v8153_v3 = vld [vmem:[%s11625_s11 + $0x530] sm:$0xff]  }
 0x51e   :  { %7598 = vmatpush3.bf16.msra.mxu0 %v8122_v23  ;;  %v3301_v23 = vpack.c.bf16 %v3285_v39, %v11668_v0  ;;  %v3873_v39 = vrot.slane %v10044_v5, 1  ;;  %v3955_v40 = vpack.c.bf16 %v3841_v53, %v3829_v54  ;;  %v10105_v0 = vld [vmem:[#allocation2 + $0x1f8] sm:$0x1]  ;;  %v3748_v54 = vld [vmem:[#allocation2 + $0x248] sm:$0xfe] }
 0x51f   :  { %7599 = vmatprep.subr.bf16.mxu0 %v8124_v60  ;;  %v3833_v60 = vrot.slane %v10003_v50, 1  ;;  %v3752_v53 = vld [vmem:[#allocation2 + $0x268] sm:$0x1] }
 0x520   :  { %7562 = vmatpush3.bf16.msra.mxu1 %v8129_v41  ;;  %v3956_v41 = vpack.c.bf16 %v3844_v56, %v3832_v13  ;;  %v3864_v13 = vrot.slane %v10066_v57, 1  ;;  %v3740_v56 = vld [vmem:[#allocation2 + $0x208] sm:$0xfe] }
 0x521   :  { %3667 = vmatmul.mubr.bf16.gmra.mxu0 %v3295_v12  ;;  %7563 = vmatprep.subr.bf16.mxu1 %v8131_v22  ;;  %v8145_v22 = vld [vmem:[%s11625_s11 + $0x400] sm:$0xff]   ;;  %v10035_v12 = vld [vmem:[#allocation2 + $0xd8] sm:$0xfe] }
 0x522   :  { %7600 = vmatpush3.bf16.msra.mxu0 %v8126_v31  ;;  %3674 = vmatprep.mubr.bf16.mxu0 %v3300_v55  ;;  %v3854_v31 = vrot.slane %v3716_v7, 1  ;;  %v3867_v55 = vrot.slane %v3728_v37, 1  ;;  %v3860_v62 = vrot.slane %v10035_v12, 1  ;;  %v10094_v7 = vld [vmem:[#allocation2 + $0x110] sm:$0xfe] }
 0x523   :  { %7601 = vmatprep.subr.bf16.mxu0 %v8128_v32  ;;  %3610 = vmatmul.mubr.bf16.gmra.mxu1 %v3297_v34  ;;  %v3855_v32 = vrot.slane %v3720_v11, 1  ;;  %v3845_v34 = vrot.slane %v10026_v8, 1  ;;  %v10096_v11 = vld [vmem:[#allocation2 + $0x130] sm:$0x1] }
 0x524   :  { %7564 = vmatpush3.bf16.msra.mxu1 %v8133_v43  ;;  %3617 = vmatprep.mubr.bf16.mxu1 %v3302_v20  ;;  %v10037_v43 = vld [vmem:[#allocation2 + $0xf8] sm:$0x1]  ;;  %v10053_v20 = vld [vmem:[#allocation2 + $0xc0] sm:$0xfe]  ;;  %v3868_v33 = vsel %vm1737_vm7, %v3866_v35, %v3867_v55  ;;  %v3870_v12 = vrot.slane %v10096_v11, 1  ;;  %v8152_v35 = vld [vmem:[%s11625_s11 + $0x5f0] sm:$0xff]  }
 0x525   :  { %7565 = vmatprep.subr.bf16.mxu1 %v8135_v18  ;;  %v3846_v18 = vrot.slane %v10028_v10, 1  ;;  %v3851_v38 = vrot.slane %v10053_v20, 1  ;;  %v8155_v10 = vld [vmem:[%s11625_s11 + $0x568] sm:$0xff]  }
 0x526   :  { %7602 = vmatpush3.bf16.msra.mxu0 %v8130_v52  ;;  %v3303_v52 = vpack.c.bf16 %v10007_v2, %v11669_v63  ;;  %v3863_v2 = vrot.slane %v10064_v19, 1  ;;  %v3885_v63 = vrot.slane %v10105_v0, 1  ;;  %v10195_v0 = vld [vmem:[#allocation2 + $0x240] sm:$0xfe] }
 0x527   :  { %7603 = vmatprep.subr.bf16.mxu0 %v8132_v46  ;;  %v8142_v46 = vld [vmem:[%s11625_s11 + $0x488] sm:$0xff]   ;;  %v3847_v8 = vsel %vm1737_vm7, %v3845_v34, %v3846_v18 }
 0x528   :  { %7566 = vmatpush3.bf16.msra.mxu1 %v8137_v9  ;;  %v10055_v9 = vld [vmem:[#allocation2 + $0xe0] sm:$0x1]  ;;  %v8157_v18 = vld [vmem:[%s11625_s11 + $0x528] sm:$0xff]  }
 0x529   :  { %3675 = vmatmul.mubr.bf16.gmra.mxu0 %v3299_v59  ;;  %7567 = vmatprep.subr.bf16.mxu1 %v8139_v36  ;;  %v3861_v36 = vrot.slane %v10037_v43, 1  ;;  %v3852_v1 = vrot.slane %v10055_v9, 1  ;;  %v3732_v59 = vld [vmem:[#allocation2 + $0x1c8] sm:$0xfe]  ;;  %v10127_v43 = vld [vmem:[#allocation2 + $0x1c0] sm:$0xfe] }
 0x52a   :  { %7604 = vmatpush3.bf16.msra.mxu0 %v8134_v48  ;;  %3682 = vmatprep.mubr.bf16.mxu0 %v3304_v14  ;;  %v3872_v48 = vrot.slane %v10042_v26, 1  ;;  %v3857_v14 = vrot.slane %v10075_v27, 1  ;;  %v3878_v28 = vrot.slane %v3732_v59, 1  ;;  %v3865_v26 = vsel %vm1737_vm7, %v3863_v2, %v3864_v13 }
 0x52b   :  { %7605 = vmatprep.subr.bf16.mxu0 %v8136_v61  ;;  %3618 = vmatmul.mubr.bf16.gmra.mxu1 %v3301_v23  ;;  %v3856_v61 = vsel %vm1737_vm7, %v3854_v31, %v3855_v32  ;;  %v3835_v23 = vsel %vm1737_vm7, %v3833_v60, %v3834_v21  ;;  %v10116_v31 = vld [vmem:[#allocation2 + $0x218] sm:$0xfe]  ;;  %v10118_v32 = vld [vmem:[#allocation2 + $0x238] sm:$0x1]  ;;  %v3862_v50 = vsel %vm1737_vm7, %v3860_v62, %v3861_v36  ;;  %v3869_v21 = vrot.slane %v10094_v7, 1  ;;  %v8159_v36 = vld [vmem:[%s11625_s11 + $0x560] sm:$0xff]  }
 0x52c   :  { %7568 = vmatpush3.bf16.msra.mxu1 %v8141_v30  ;;  %4259 = vmatprep.mubr.bf16.mxu1 %v3956_v41  ;;  %v3736_v30 = vld [vmem:[#allocation2 + $0x1e8] sm:$0x1]  ;;  %v3960_v4 = vpack.c.bf16 %v3868_v33, %v3856_v61  ;;  %v3890_v41 = vrot.slane %v3740_v56, 1  ;;  %v3874_v60 = vsel %vm1737_vm7, %v3872_v48, %v3873_v39  ;;  %v3853_v55 = vsel %vm1737_vm7, %v3851_v38, %v3852_v1  ;;  %v8154_v48 = vld [vmem:[%s11625_s11 + $0x5b0] sm:$0xff]   ;;  %v3756_v33 = vld [vmem:[#allocation2 + $0x288] sm:$0xfe] }
 0x52d   :  { %7569 = vmatprep.subr.bf16.mxu1 %v8143_v16  ;;  %v3744_v16 = vld [vmem:[#allocation2 + $0x228] sm:$0x1]  ;;  %v3879_v37 = vrot.slane %v3736_v30, 1  ;;  %v3957_v34 = vpack.c.bf16 %v3847_v8, %v3835_v23  ;;  %v3896_v20 = vrot.slane %v10116_v31, 1  ;;  %v3897_v9 = vrot.slane %v10118_v32, 1  ;;  %v8161_v56 = vld [vmem:[%s11625_s11 + $0x520] sm:$0xff]  }
 0x52e   :  { %7606 = vmatpush3.bf16.msra.mxu0 %v8138_v24  ;;  %v3858_v24 = vrot.slane %v10077_v47, 1  ;;  %v3875_v19 = vrot.slane %v10127_v43, 1  ;;  %v3959_v39 = vpack.c.bf16 %v3865_v26, %v3853_v55  ;;  %v8156_v38 = vld [vmem:[%s11625_s11 + $0x5e8] sm:$0xff]   ;;  %v3871_v59 = vsel %vm1737_vm7, %v3869_v21, %v3870_v12  ;;  %v10170_v30 = vld [vmem:[#allocation2 + $0x210] sm:$0xfe]  ;;  %v8163_v7 = vld [vmem:[%s11625_s11 + $0x558] sm:$0xff]  }
 0x52f   :  { %7607 = vmatprep.subr.bf16.mxu0 %v8140_v29  ;;  %v10103_v29 = vld [vmem:[#allocation2 + $0x1d8] sm:$0xfe]  ;;  %v3882_v2 = vrot.slane %v10149_v15, 1  ;;  %v3902_v27 = vrot.slane %v3748_v54, 1  ;;  %v3914_v11 = vrot.slane %v3756_v33, 1 }
 0x530   :  { %7570 = vmatpush3.bf16.msra.mxu1 %v8145_v22  ;;  %v3891_v22 = vrot.slane %v3744_v16, 1  ;;  %v3884_v5 = vrot.slane %v10103_v29, 1  ;;  %v3859_v1 = vsel %vm1737_vm7, %v3857_v14, %v3858_v24  ;;  %v3903_v16 = vrot.slane %v3752_v53, 1  ;;  %v10186_v24 = vld [vmem:[#allocation2 + $0x298] sm:$0xfe] }
 0x531   :  { %3683 = vmatmul.mubr.bf16.gmra.mxu0 %v3303_v52  ;;  %7635 = vmatprep.subr.bf16.mxu1 %v8147_v49  ;;  %v10129_v49 = vld [vmem:[#allocation2 + $0x1e0] sm:$0x1]  ;;  %v10138_v52 = vld [vmem:[#allocation2 + $0x200] sm:$0xfe]  ;;  %v8165_v21 = vld [vmem:[%s11625_s11 + $0x518] sm:$0xff]   ;;  %v3920_v12 = vrot.slane %v10186_v24, 1 }
 0x532   :  { %7608 = vmatpush3.bf16.msra.mxu0 %v8142_v46  ;;  %4324 = vmatprep.mubr.bf16.mxu0 %v3958_v17  ;;  %v10140_v46 = vld [vmem:[#allocation2 + $0x220] sm:$0x1]  ;;  %v3892_v62 = vsel %vm1737_vm7, %v3890_v41, %v3891_v22  ;;  %v3876_v57 = vrot.slane %v10129_v49, 1  ;;  %v3887_v47 = vrot.slane %v10138_v52, 1  ;;  %v10172_v17 = vld [vmem:[#allocation2 + $0x230] sm:$0x1]  ;;  %v3886_v8 = vsel %vm1737_vm7, %v3884_v5, %v3885_v63 }
 0x533   :  { %7609 = vmatprep.subr.bf16.mxu0 %v8144_v42  ;;  %4260 = vmatmul.mubr.bf16.vlgmr.msra.gmra.mxu1 %v3955_v40  ;;  %v3880_v42 = vsel %vm1737_vm7, %v3878_v28, %v3879_v37  ;;  %v3888_v61 = vrot.slane %v10140_v46, 1  ;;  %v10181_v40 = vld [vmem:[#allocation2 + $0x278] sm:$0x1]  ;;  %v8158_v28 = vld [vmem:[%s11625_s11 + $0x5a8] sm:$0xff]   ;;  %v3893_v37 = vrot.slane %v10170_v30, 1  ;;  %v3894_v29 = vrot.slane %v10172_v17, 1 }
 0x534   :  { %7636 = vmatpush3.bf16.msra.mxu1 %v8149_v51  ;;  %4267 = vmatprep.mubr.bf16.mxu1 %v3960_v4  ;;  %v3962_v51 = vpack.c.bf16 %v3874_v60, %v3862_v50  ;;  %v3964_v13 = vpack.c.bf16 %v3892_v62, %v3880_v42  ;;  %v10188_v4 = vld [vmem:[#allocation2 + $0x2b8] sm:$0x1]  ;;  %v10197_v23 = vld [vmem:[#allocation2 + $0x260] sm:$0x1]  ;;  %v3909_v31 = vrot.slane %v10181_v40, 1  ;;  %v3877_v50 = vsel %vm1737_vm7, %v3875_v19, %v3876_v57  ;;  %v8167_v5 = vld [vmem:[%s11625_s11 + $0x550] sm:$0xff]  }
 0x535   :  { %7637 = vmatprep.subr.bf16.mxu1 %v8151_v6  ;;  %v3760_v6 = vld [vmem:[#allocation2 + $0x2a8] sm:$0x1]  ;;  %v8160_v41 = vld [vmem:[%s11625_s11 + $0x5e0] sm:$0xff]   ;;  %v3889_v60 = vsel %vm1737_vm7, %v3887_v47, %v3888_v61  ;;  %v3921_v43 = vrot.slane %v10188_v4, 1  ;;  %v10217_v49 = vld [vmem:[#allocation2 + $0x250] sm:$0xfe]  ;;  %v3904_v55 = vsel %vm1737_vm7, %v3902_v27, %v3903_v16 }
 0x536   :  { %7610 = vmatpush3.bf16.msra.mxu0 %v8146_v25  ;;  %v3881_v25 = vrot.slane %v10147_v45, 1  ;;  %v3915_v14 = vrot.slane %v3760_v6, 1  ;;  %v10206_v32 = vld [vmem:[#allocation2 + $0x280] sm:$0xfe]  ;;  %v3899_v63 = vrot.slane %v10195_v0, 1  ;;  %v3900_v52 = vrot.slane %v10197_v23, 1 }
 0x537   :  { %7675 = vmatprep.subr.bf16.mxu0 %v8148_v44  ;;  %v10179_v44 = vld [vmem:[#allocation2 + $0x258] sm:$0xfe]  ;;  %v4366_v46 = vld [vmem:[#allocation2 + $0x48] sm:$0xfc]  ;;  %v3963_v57 = vpack.c.bf16 %v3889_v60, %v3877_v50  ;;  %v10236_v54 = vld [vmem:[#allocation2 + $0x290] sm:$0xfe] }
 0x538   :  { %7638 = vmatpush3.bf16.msra.mxu1 %v8153_v3  ;;  %v3961_v3 = vpack.c.bf16 %v3871_v59, %v3859_v1  ;;  %v3908_v22 = vrot.slane %v10179_v44, 1  ;;  %v3916_v26 = vsel %vm1737_vm7, %v3914_v11, %v3915_v14  ;;  %v4374_v62 = vld [vmem:[#allocation2 + $0x88] sm:$0xfc]  ;;  %v8164_v19 = vld [vmem:[%s11625_s11 + $0x5d8] sm:$0xff]   ;;  %v10238_v53 = vld [vmem:[#allocation2 + $0x2b0] sm:$0x1]  ;;  %v3883_v1 = vsel %vm1737_vm7, %v3881_v25, %v3882_v2 }
 0x539   :  { %4325 = vmatmul.mubr.bf16.vlgmr.msra.gmra.mxu0 %v3957_v34  ;;  %7639 = vmatprep.subr.bf16.mxu1 %v8155_v10  ;;  %v3898_v10 = vsel %vm1737_vm7, %v3896_v20, %v3897_v9  ;;  %v4370_v34 = vld [vmem:[#allocation2 + $0x68] sm:$0x3]  ;;  %v8162_v20 = vld [vmem:[%s11625_s11 + $0x5a0] sm:$0xff]   ;;  %v3911_v9 = vrot.slane %v10206_v32, 1  ;;  %v8169_v47 = vld [vmem:[%s11625_s11 + $0x510] sm:$0xff]   ;;  %v4496_v61 = vrot.slane %v4366_v46, 2  ;;  %v3895_v59 = vsel %vm1737_vm7, %v3893_v37, %v3894_v29 }
 0x53a   :  { %7676 = vmatpush3.bf16.msra.mxu0 %v8150_v58  ;;  %4332 = vmatprep.mubr.bf16.mxu0 %v3962_v51  ;;  %v10208_v58 = vld [vmem:[#allocation2 + $0x2a0] sm:$0x1]  ;;  %v3905_v51 = vrot.slane %v10217_v49, 1  ;;  %v4497_v33 = vrot.slane %v4370_v34, 2  ;;  %v10245_v6 = vld [vmem:[#allocation2 + $0x58] sm:$0xfc]  ;;  %v3910_v45 = vsel %vm1737_vm7, %v3908_v22, %v3909_v31  ;;  %v3922_v25 = vsel %vm1737_vm7, %v3920_v12, %v3921_v43 }
 0x53b   :  { %7677 = vmatprep.subr.bf16.mxu0 %v8152_v35  ;;  %4268 = vmatmul.mubr.bf16.gmra.mxu1 %v3959_v39  ;;  %v10219_v35 = vld [vmem:[#allocation2 + $0x270] sm:$0x1]  ;;  %v3912_v42 = vrot.slane %v10208_v58, 1  ;;  %v3968_v39 = vpack.c.bf16 %v3916_v26, %v3904_v55  ;;  %v8171_v30 = vld [vmem:[%s11625_s11 + $0x548] sm:$0xff]   ;;  %v4508_v17 = vrot.slane %v4374_v62, 2  ;;  %v8166_v15 = vld [vmem:[%s11625_s11 + $0x598] sm:$0xff]   ;;  %v3901_v11 = vsel %vm1737_vm7, %v3899_v63, %v3900_v52 }
 0x53c   :  { %7640 = vmatpush3.bf16.msra.mxu1 %v8157_v18  ;;  %4275 = vmatprep.mubr.bf16.mxu1 %v3964_v13  ;;  %v3966_v18 = vpack.c.bf16 %v3898_v10, %v3886_v8  ;;  %v10260_v27 = vld [vmem:[#allocation2 + $0xb8] sm:$0x3]  ;;  %v3917_v2 = vrot.slane %v10236_v54, 1  ;;  %v3918_v16 = vrot.slane %v10238_v53, 1  ;;  %v10269_v44 = vld [vmem:[#allocation2 + $0x40] sm:$0xfc]  ;;  %v3965_v37 = vpack.c.bf16 %v3895_v59, %v3883_v1 }
 0x53d   :  { %7641 = vmatprep.subr.bf16.mxu1 %v8159_v36  ;;  %v4378_v36 = vld [vmem:[#allocation2 + $0xa8] sm:$0x3]  ;;  %v10271_v40 = vld [vmem:[#allocation2 + $0x60] sm:$0x3]  ;;  %v3913_v14 = vsel %vm1737_vm7, %v3911_v9, %v3912_v42  ;;  %v4502_v24 = vrot.slane %v10245_v6, 2  ;;  %v4515_v23 = vrot.slane %v10260_v27, 2 }
 0x53e   :  { %7678 = vmatpush3.bf16.msra.mxu0 %v8154_v48  ;;  %v3906_v48 = vrot.slane %v10219_v35, 1  ;;  %v4509_v13 = vrot.slane %v4378_v36, 2  ;;  %v8173_v29 = vld [vmem:[%s11625_s11 + $0x508] sm:$0xff]   ;;  %v10289_v8 = vld [vmem:[#allocation2 + $0x50] sm:$0xfc]  ;;  %v8175_v31 = vld [vmem:[%s11625_s11 + $0x540] sm:$0xff]   ;;  %v3967_v43 = vpack.c.bf16 %v3913_v14, %v3901_v11  ;;  %v3919_v46 = vsel %vm1737_vm7, %v3917_v2, %v3918_v16 }
 0x53f   :  { %7679 = vmatprep.subr.bf16.mxu0 %v8156_v38  ;;  %v10247_v38 = vld [vmem:[#allocation2 + $0x78] sm:$0x3]  ;;  %v10291_v10 = vld [vmem:[#allocation2 + $0x70] sm:$0x3]  ;;  %v4493_v32 = vrot.slane %v10269_v44, 2  ;;  %v4494_v58 = vrot.slane %v10271_v40, 2 }
 0x540   :  { %7642 = vmatpush3.bf16.msra.mxu1 %v8161_v56  ;;  %v10258_v56 = vld [vmem:[#allocation2 + $0x98] sm:$0xfc]  ;;  %v4503_v4 = vrot.slane %v10247_v38, 2  ;;  %v4510_v22 = vsel %vm2718_vm8, %v4508_v17, %v4509_v13  ;;  %v4382_v50 = vld [vmem:[#allocation2 + $0xc8] sm:$0xfc]  ;;  %v8170_v12 = vld [vmem:[%s11625_s11 + $0x590] sm:$0xff]   ;;  %v3907_v52 = vsel %vm1737_vm7, %v3905_v51, %v3906_v48 }
 0x541   :  { %4333 = vmatmul.mubr.bf16.gmra.mxu0 %v3961_v3  ;;  %7643 = vmatprep.subr.bf16.mxu1 %v8163_v7  ;;  %v8168_v7 = vld [vmem:[%s11625_s11 + $0x5d0] sm:$0xff]   ;;  %v10280_v3 = vld [vmem:[#allocation2 + $0x80] sm:$0xfc]  ;;  %v4514_v0 = vrot.slane %v10258_v56, 2  ;;  %v4386_v60 = vld [vmem:[#allocation2 + $0xe8] sm:$0x3] }
 0x542   :  { %7680 = vmatpush3.bf16.msra.mxu0 %v8158_v28  ;;  %4340 = vmatprep.mubr.bf16.mxu0 %v3966_v18  ;;  %v10282_v28 = vld [vmem:[#allocation2 + $0xa0] sm:$0x3]  ;;  %v4505_v35 = vrot.slane %v10280_v3, 2  ;;  %v4390_v26 = vld [vmem:[#allocation2 + $0x108] sm:$0xfc]  ;;  %v4500_v9 = vrot.slane %v10291_v10, 2  ;;  %v4504_v59 = vsel %vm2718_vm8, %v4502_v24, %v4503_v4 }
 0x543   :  { %7681 = vmatprep.subr.bf16.mxu0 %v8160_v41  ;;  %4276 = vmatmul.mubr.bf16.gmra.mxu1 %v3963_v57  ;;  %v4498_v41 = vsel %vm2718_vm8, %v4496_v61, %v4497_v33  ;;  %v4506_v55 = vrot.slane %v10282_v28, 2  ;;  %v8172_v63 = vld [vmem:[%s11625_s11 + $0x5c8] sm:$0xff]   ;;  %v10312_v34 = vld [vmem:[#allocation2 + $0x90] sm:$0xfc]  ;;  %v10314_v18 = vld [vmem:[#allocation2 + $0xb0] sm:$0x3] }
 0x544   :  { %7644 = vmatpush3.bf16.msra.mxu1 %v8165_v21  ;;  %4283 = vmatprep.mubr.bf16.mxu1 %v3968_v39  ;;  %v3970_v21 = vpack.c.bf16 %v3922_v25, %v3910_v45  ;;  %v4622_v42 = vpack.c.bf16 %v4510_v22, %v4498_v41  ;;  %v8177_v62 = vld [vmem:[%s11625_s11 + $0x500] sm:$0xff]   ;;  %v4520_v49 = vrot.slane %v4382_v50, 2  ;;  %v4521_v36 = vrot.slane %v4386_v60, 2  ;;  %v10323_v57 = vld [vmem:[#allocation2 + $0xf8] sm:$0x3]  ;;  %v8174_v61 = vld [vmem:[%s11625_s11 + $0x588] sm:$0xff]  }
 0x545   :  { %7645 = vmatprep.subr.bf16.mxu1 %v8167_v5  ;;  %v4394_v5 = vld [vmem:[#allocation2 + $0x128] sm:$0x3]  ;;  %v8179_v54 = vld [vmem:[%s11625_s11 + $0x678] sm:$0xff]   ;;  %v4532_v53 = vrot.slane %v4390_v26, 2  ;;  %v4511_v33 = vrot.slane %v10312_v34, 2  ;;  %v4512_v6 = vrot.slane %v10314_v18, 2  ;;  %v4495_v45 = vsel %vm2718_vm8, %v4493_v32, %v4494_v58 }
 0x546   :  { %7682 = vmatpush3.bf16.msra.mxu0 %v8162_v20  ;;  %v4499_v20 = vrot.slane %v10289_v8, 2  ;;  %v4533_v51 = vrot.slane %v4394_v5, 2  ;;  %v10328_v48 = vld [vmem:[#allocation2 + $0x118] sm:$0xfc]  ;;  %v10330_v39 = vld [vmem:[#allocation2 + $0x138] sm:$0x3]  ;;  %v4507_v25 = vsel %vm2718_vm8, %v4505_v35, %v4506_v55  ;;  %v4522_v11 = vsel %vm2718_vm8, %v4520_v49, %v4521_v36 }
 0x547   :  { %7683 = vmatprep.subr.bf16.mxu0 %v8164_v19  ;;  %v10321_v19 = vld [vmem:[#allocation2 + $0xd8] sm:$0xfc]  ;;  %v10337_v38 = vld [vmem:[#allocation2 + $0xc0] sm:$0xfc]  ;;  %v10339_v1 = vld [vmem:[#allocation2 + $0xe0] sm:$0x3]  ;;  %v4621_v32 = vpack.c.bf16 %v4507_v25, %v4495_v45 }
 0x548   :  { %7646 = vmatpush3.bf16.msra.mxu1 %v8169_v47  ;;  %v3969_v47 = vpack.c.bf16 %v3919_v46, %v3907_v52  ;;  %v8176_v17 = vld [vmem:[%s11625_s11 + $0x5c0] sm:$0xff]   ;;  %v4526_v13 = vrot.slane %v10321_v19, 2  ;;  %v4527_v56 = vrot.slane %v10323_v57, 2  ;;  %v8181_v2 = vld [vmem:[%s11625_s11 + $0x638] sm:$0xff]   ;;  %v4538_v16 = vrot.slane %v10328_v48, 2  ;;  %v8183_v24 = vld [vmem:[%s11625_s11 + $0x670] sm:$0xff]  }
 0x549   :  { %4341 = vmatmul.mubr.bf16.gmra.mxu0 %v3965_v37  ;;  %7647 = vmatprep.subr.bf16.mxu1 %v8171_v30  ;;  %v4516_v30 = vsel %vm2718_vm8, %v4514_v0, %v4515_v23  ;;  %v10348_v27 = vld [vmem:[#allocation2 + $0x100] sm:$0xfc]  ;;  %v4539_v44 = vrot.slane %v10330_v39, 2  ;;  %v4398_v40 = vld [vmem:[#allocation2 + $0x1c8] sm:$0xfc]  ;;  %v4534_v14 = vsel %vm2718_vm8, %v4532_v53, %v4533_v51  ;;  %v4517_v4 = vrot.slane %v10337_v38, 2 }
 0x54a   :  { %7684 = vmatpush3.bf16.msra.mxu0 %v8166_v15  ;;  %4348 = vmatprep.mubr.bf16.mxu0 %v3970_v21  ;;  %v10350_v15 = vld [vmem:[#allocation2 + $0x120] sm:$0x3]  ;;  %v4518_v3 = vrot.slane %v10339_v1, 2  ;;  %v4406_v28 = vld [vmem:[#allocation2 + $0x208] sm:$0xfc]  ;;  %v4529_v23 = vrot.slane %v10348_v27, 2  ;;  %v4513_v52 = vsel %vm2718_vm8, %v4511_v33, %v4512_v6  ;;  %v4528_v10 = vsel %vm2718_vm8, %v4526_v13, %v4527_v56 }
 0x54b   :  { %7685 = vmatprep.subr.bf16.mxu0 %v8168_v7  ;;  %4284 = vmatmul.mubr.bf16.gmra.mxu1 %v3967_v43  ;;  %v4402_v7 = vld [vmem:[#allocation2 + $0x1e8] sm:$0x3]  ;;  %v8178_v0 = vld [vmem:[%s11625_s11 + $0x580] sm:$0xff]   ;;  %v4530_v41 = vrot.slane %v10350_v15, 2  ;;  %v10371_v22 = vld [vmem:[#allocation2 + $0xd0] sm:$0xfc] }
 0x54c   :  { %7648 = vmatpush3.bf16.msra.mxu1 %v8173_v29  ;;  %4925 = vmatprep.mubr.bf16.mxu1 %v4622_v42  ;;  %v4410_v37 = vld [vmem:[#allocation2 + $0x228] sm:$0x3]  ;;  %v4624_v29 = vpack.c.bf16 %v4516_v30, %v4504_v59  ;;  %v10375_v58 = vld [vmem:[#allocation2 + $0x110] sm:$0xfc]  ;;  %v10377_v50 = vld [vmem:[#allocation2 + $0x130] sm:$0x3]  ;;  %v4519_v48 = vsel %vm2718_vm8, %v4517_v4, %v4518_v3 }
 0x54d   :  { %7649 = vmatprep.subr.bf16.mxu1 %v8175_v31  ;;  %v10373_v31 = vld [vmem:[#allocation2 + $0xf0] sm:$0x3]  ;;  %v4544_v60 = vrot.slane %v4398_v40, 2  ;;  %v4545_v21 = vrot.slane %v4402_v7, 2  ;;  %v4556_v43 = vrot.slane %v4406_v28, 2  ;;  %v4557_v35 = vrot.slane %v4410_v37, 2 }
 0x54e   :  { %7686 = vmatpush3.bf16.msra.mxu0 %v8170_v12  ;;  %v4626_v12 = vpack.c.bf16 %v4534_v14, %v4522_v11  ;;  %v10379_v55 = vld [vmem:[#allocation2 + $0x1d8] sm:$0xfc]  ;;  %v10381_v26 = vld [vmem:[#allocation2 + $0x1f8] sm:$0x3]  ;;  %v8185_v46 = vld [vmem:[%s11625_s11 + $0x630] sm:$0xff]   ;;  %v4523_v18 = vrot.slane %v10371_v22, 2  ;;  %v4531_v39 = vsel %vm2718_vm8, %v4529_v23, %v4530_v41 }
 0x54f   :  { %7687 = vmatprep.subr.bf16.mxu0 %v8172_v63  ;;  %v8180_v5 = vld [vmem:[%s11625_s11 + $0x6f8] sm:$0xff]   ;;  %v4501_v63 = vsel %vm2718_vm8, %v4499_v20, %v4500_v9  ;;  %v8187_v34 = vld [vmem:[%s11625_s11 + $0x668] sm:$0xff]   ;;  %v4524_v42 = vrot.slane %v10373_v31, 2  ;;  %v4540_v20 = vsel %vm2718_vm8, %v4538_v16, %v4539_v44  ;;  %v4535_v9 = vrot.slane %v10375_v58, 2  ;;  %v8184_v19 = vld [vmem:[%s11625_s11 + $0x6f0] sm:$0xff]  }
 0x550   :  { %7650 = vmatpush3.bf16.msra.mxu1 %v8177_v62  ;;  %v8182_v8 = vld [vmem:[%s11625_s11 + $0x6b8] sm:$0xff]   ;;  %v4536_v62 = vrot.slane %v10377_v50, 2  ;;  %v4550_v57 = vrot.slane %v10379_v55, 2  ;;  %v4397_v53 = vld [vmem:[#allocation2 + $0x1c0] sm:$0xfc]  ;;  %v4623_v1 = vpack.c.bf16 %v4513_v52, %v4501_v63  ;;  %v4628_v59 = vpack.c.bf16 %v4540_v20, %v4528_v10  ;;  %v8189_v56 = vld [vmem:[%s11625_s11 + $0x628] sm:$0xff]  }
 0x551   :  { %4349 = vmatmul.mubr.bf16.gmra.mxu0 %v3969_v47  ;;  %7715 = vmatprep.subr.bf16.mxu1 %v8179_v54  ;;  %v4408_v49 = vld [vmem:[#allocation2 + $0x218] sm:$0xfc]  ;;  %v4412_v36 = vld [vmem:[#allocation2 + $0x238] sm:$0x3]  ;;  %v4551_v54 = vrot.slane %v10381_v26, 2  ;;  %v4546_v47 = vsel %vm2718_vm8, %v4544_v60, %v4545_v21  ;;  %v8191_v45 = vld [vmem:[%s11625_s11 + $0x660] sm:$0xff]   ;;  %v4625_v16 = vpack.c.bf16 %v4531_v39, %v4519_v48 }
 0x552   :  { %7688 = vmatpush3.bf16.msra.mxu0 %v8174_v61  ;;  %4990 = vmatprep.mubr.bf16.mxu0 %v4624_v29  ;;  %v4401_v51 = vld [vmem:[#allocation2 + $0x1e0] sm:$0x3]  ;;  %v4558_v61 = vsel %vm2718_vm8, %v4556_v43, %v4557_v35  ;;  %v4405_v33 = vld [vmem:[#allocation2 + $0x200] sm:$0xfc]  ;;  %v4414_v38 = vld [vmem:[#allocation2 + $0x248] sm:$0xfc]  ;;  %v4537_v23 = vsel %vm2718_vm8, %v4535_v9, %v4536_v62 }
 0x553   :  { %7689 = vmatprep.subr.bf16.mxu0 %v8176_v17  ;;  %4926 = vmatmul.mubr.bf16.vlgmr.msra.gmra.mxu1 %v4621_v32  ;;  %v4409_v6 = vld [vmem:[#allocation2 + $0x220] sm:$0x3]  ;;  %v4418_v30 = vld [vmem:[#allocation2 + $0x268] sm:$0x3]  ;;  %v4422_v17 = vld [vmem:[#allocation2 + $0x288] sm:$0xfc]  ;;  %v4630_v44 = vpack.c.bf16 %v4558_v61, %v4546_v47  ;;  %v4552_v31 = vsel %vm2718_vm8, %v4550_v57, %v4551_v54 }
 0x554   :  { %7716 = vmatpush3.bf16.msra.mxu1 %v8181_v2  ;;  %4933 = vmatprep.mubr.bf16.mxu1 %v4626_v12  ;;  %v4426_v13 = vld [vmem:[#allocation2 + $0x2a8] sm:$0x3]  ;;  %v4562_v27 = vrot.slane %v4408_v49, 2  ;;  %v4563_v15 = vrot.slane %v4412_v36, 2  ;;  %v4541_v25 = vrot.slane %v4397_v53, 2  ;;  %v4542_v2 = vrot.slane %v4401_v51, 2 }
 0x555   :  { %7717 = vmatprep.subr.bf16.mxu1 %v8183_v24  ;;  %v4553_v40 = vrot.slane %v4405_v33, 2  ;;  %v4554_v7 = vrot.slane %v4409_v6, 2  ;;  %v10422_v11 = vld [vmem:[#allocation2 + $0x1d0] sm:$0xfc]  ;;  %v10424_v14 = vld [vmem:[#allocation2 + $0x1f0] sm:$0x3] }
 0x556   :  { %7690 = vmatpush3.bf16.msra.mxu0 %v8178_v0  ;;  %v8186_v24 = vld [vmem:[%s11625_s11 + $0x6b0] sm:$0xff]   ;;  %v4568_v4 = vrot.slane %v4414_v38, 2  ;;  %v4569_v3 = vrot.slane %v4418_v30, 2  ;;  %v4580_v28 = vrot.slane %v4422_v17, 2  ;;  %v4581_v37 = vrot.slane %v4426_v13, 2  ;;  %v8188_v29 = vld [vmem:[%s11625_s11 + $0x6e8] sm:$0xff]  }
 0x557   :  { %7755 = vmatprep.subr.bf16.mxu0 %v8180_v5  ;;  %v4525_v0 = vsel %vm2718_vm8, %v4523_v18, %v4524_v42  ;;  %v4407_v41 = vld [vmem:[#allocation2 + $0x210] sm:$0xfc]  ;;  %v4411_v22 = vld [vmem:[#allocation2 + $0x230] sm:$0x3]  ;;  %v4564_v32 = vsel %vm2718_vm8, %v4562_v27, %v4563_v15  ;;  %v8193_v58 = vld [vmem:[%s11625_s11 + $0x620] sm:$0xff]   ;;  %v4547_v60 = vrot.slane %v10422_v11, 2  ;;  %v4543_v43 = vsel %vm2718_vm8, %v4541_v25, %v4542_v2 }
 0x558   :  { %7718 = vmatpush3.bf16.msra.mxu1 %v8185_v46  ;;  %v8195_v50 = vld [vmem:[%s11625_s11 + $0x658] sm:$0xff]   ;;  %v4548_v21 = vrot.slane %v10424_v14, 2  ;;  %v4555_v35 = vsel %vm2718_vm8, %v4553_v40, %v4554_v7  ;;  %v8190_v63 = vld [vmem:[%s11625_s11 + $0x6a8] sm:$0xff]   ;;  %v8192_v52 = vld [vmem:[%s11625_s11 + $0x6e0] sm:$0xff]   ;;  %v4559_v46 = vrot.slane %v4407_v41, 2  ;;  %v4570_v18 = vsel %vm2718_vm8, %v4568_v4, %v4569_v3 }
 0x559   :  { %4991 = vmatmul.mubr.bf16.vlgmr.msra.gmra.mxu0 %v4623_v1  ;;  %7719 = vmatprep.subr.bf16.mxu1 %v8187_v34  ;;  %v4416_v12 = vld [vmem:[#allocation2 + $0x258] sm:$0xfc]  ;;  %v4420_v55 = vld [vmem:[#allocation2 + $0x278] sm:$0x3]  ;;  %v4560_v34 = vrot.slane %v4411_v22, 2  ;;  %v4582_v42 = vsel %vm2718_vm8, %v4580_v28, %v4581_v37  ;;  %v4627_v10 = vpack.c.bf16 %v4537_v23, %v4525_v0  ;;  %v4632_v20 = vpack.c.bf16 %v4564_v32, %v4552_v31  ;;  %v8199_v39 = vld [vmem:[%s11625_s11 + $0x650] sm:$0xff]  }
 0x55a   :  { %7756 = vmatpush3.bf16.msra.mxu0 %v8182_v8  ;;  %4998 = vmatprep.mubr.bf16.mxu0 %v4628_v59  ;;  %v4424_v26 = vld [vmem:[#allocation2 + $0x298] sm:$0xfc]  ;;  %v4428_v5 = vld [vmem:[#allocation2 + $0x2b8] sm:$0x3]  ;;  %v4413_v8 = vld [vmem:[#allocation2 + $0x240] sm:$0xfc]  ;;  %v4629_v51 = vpack.c.bf16 %v4555_v35, %v4543_v43  ;;  %v4634_v48 = vpack.c.bf16 %v4582_v42, %v4570_v18  ;;  %v4549_v59 = vsel %vm2718_vm8, %v4547_v60, %v4548_v21 }
 0x55b   :  { %7757 = vmatprep.subr.bf16.mxu0 %v8184_v19  ;;  %4934 = vmatmul.mubr.bf16.gmra.mxu1 %v4625_v16  ;;  %v4417_v9 = vld [vmem:[#allocation2 + $0x260] sm:$0x3]  ;;  %v4421_v62 = vld [vmem:[#allocation2 + $0x280] sm:$0xfc]  ;;  %v8197_v36 = vld [vmem:[%s11625_s11 + $0x618] sm:$0xff]   ;;  %v4574_v19 = vrot.slane %v4416_v12, 2  ;;  %v4561_v30 = vsel %vm2718_vm8, %v4559_v46, %v4560_v34 }
 0x55c   :  { %7720 = vmatpush3.bf16.msra.mxu1 %v8189_v56  ;;  %4941 = vmatprep.mubr.bf16.mxu1 %v4630_v44  ;;  %v4425_v49 = vld [vmem:[#allocation2 + $0x2a0] sm:$0x3]  ;;  %v4575_v57 = vrot.slane %v4420_v55, 2  ;;  %v4586_v54 = vrot.slane %v4424_v26, 2  ;;  %v4587_v53 = vrot.slane %v4428_v5, 2  ;;  %v4565_v61 = vrot.slane %v4413_v8, 2 }
 0x55d   :  { %7721 = vmatprep.subr.bf16.mxu1 %v8191_v45  ;;  %v8194_v47 = vld [vmem:[%s11625_s11 + $0x6a0] sm:$0xff]   ;;  %v4566_v33 = vrot.slane %v4417_v9, 2  ;;  %v4577_v6 = vrot.slane %v4421_v62, 2  ;;  %v4578_v38 = vrot.slane %v4425_v49, 2  ;;  %v8196_v1 = vld [vmem:[%s11625_s11 + $0x6d8] sm:$0xff]   ;;  %v8201_v56 = vld [vmem:[%s11625_s11 + $0x610] sm:$0xff]   ;;  %v4631_v7 = vpack.c.bf16 %v4561_v30, %v4549_v59 }
 0x55e   :  { %7758 = vmatpush3.bf16.msra.mxu0 %v8186_v24  ;;  %v4576_v17 = vsel %vm2718_vm8, %v4574_v19, %v4575_v57  ;;  %v4588_v13 = vsel %vm2718_vm8, %v4586_v54, %v4587_v53  ;;  %v8203_v27 = vld [vmem:[%s11625_s11 + $0x648] sm:$0xff]   ;;  %v4415_v15 = vld [vmem:[#allocation2 + $0x250] sm:$0xfc]  ;;  %v4419_v45 = vld [vmem:[#allocation2 + $0x270] sm:$0x3] }
 0x55f   :  { %7759 = vmatprep.subr.bf16.mxu0 %v8188_v29  ;;  %v4423_v25 = vld [vmem:[#allocation2 + $0x290] sm:$0xfc]  ;;  %v4427_v2 = vld [vmem:[#allocation2 + $0x2b0] sm:$0x3]  ;;  %v8198_v16 = vld [vmem:[%s11625_s11 + $0x698] sm:$0xff]   ;;  %v4567_v44 = vsel %vm2718_vm8, %v4565_v61, %v4566_v33  ;;  %v4579_v40 = vsel %vm2718_vm8, %v4577_v6, %v4578_v38  ;;  %v4636_v11 = vpack.c.bf16 %v4588_v13, %v4576_v17  ;;  %v4571_v3 = vrot.slane %v4415_v15, 2 }
 0x560   :  { %7722 = vmatpush3.bf16.msra.mxu1 %v8193_v58  ;;  %v8200_v14 = vld [vmem:[%s11625_s11 + $0x6d0] sm:$0xff]   ;;  %v5033_v24 = vld [vmem:[#allocation2 + $0x88] sm:$0xff]  ;;  %v4572_v28 = vrot.slane %v4419_v45, 2  ;;  %v4583_v37 = vrot.slane %v4423_v25, 2  ;;  %v4584_v29 = vrot.slane %v4427_v2, 2  ;;  %v4633_v23 = vpack.c.bf16 %v4579_v40, %v4567_v44  ;;  %v8207_v41 = vld [vmem:[%s11625_s11 + $0x640] sm:$0xff]  }
 0x561   :  { %4999 = vmatmul.mubr.bf16.gmra.mxu0 %v4627_v10  ;;  %7723 = vmatprep.subr.bf16.mxu1 %v8195_v50  ;;  %v5037_v4 = vld [vmem:[#allocation2 + $0xc8] sm:$0xff]  ;;  %v8202_v22 = vld [vmem:[%s11625_s11 + $0x690] sm:$0xff]   ;;  %v8209_v60 = vld [vmem:[%s11625_s11 + $0x600] sm:$0xff]  }
 0x562   :  { %7760 = vmatpush3.bf16.msra.mxu0 %v8190_v63  ;;  %5006 = vmatprep.mubr.bf16.mxu0 %v4632_v20  ;;  %v8205_v0 = vld [vmem:[%s11625_s11 + $0x608] sm:$0xff]   ;;  %v5065_v31 = vpack.c.bf16 %v5037_v4, %v5033_v24  ;;  %v4573_v58 = vsel %vm2718_vm8, %v4571_v3, %v4572_v28  ;;  %v4585_v50 = vsel %vm2718_vm8, %v4583_v37, %v4584_v29  ;;  %v5035_v21 = vld [vmem:[#allocation2 + $0x98] sm:$0xff]  ;;  %v5032_v55 = vld [vmem:[#allocation2 + $0x80] sm:$0xff] }
 0x563   :  { %7761 = vmatprep.subr.bf16.mxu0 %v8192_v52  ;;  %4942 = vmatmul.mubr.bf16.gmra.mxu1 %v4629_v51  ;;  %v8204_v32 = vld [vmem:[%s11625_s11 + $0x6c8] sm:$0xff]   ;;  %v5039_v12 = vld [vmem:[#allocation2 + $0xd8] sm:$0xff]  ;;  %v5036_v26 = vld [vmem:[#allocation2 + $0xc0] sm:$0xff]  ;;  %v4635_v5 = vpack.c.bf16 %v4585_v50, %v4573_v58 }
 0x564   :  { %7724 = vmatpush3.bf16.msra.mxu1 %v8197_v36  ;;  %4949 = vmatprep.mubr.bf16.mxu1 %v4634_v48  ;;  %v8211_v43 = vld [vmem:[%s11625_s11 + $0x778] sm:$0xff]   ;;  %v8206_v35 = vld [vmem:[%s11625_s11 + $0x688] sm:$0xff]   ;;  %v8208_v63 = vld [vmem:[%s11625_s11 + $0x6c0] sm:$0xff]   ;;  %v5067_v46 = vpack.c.bf16 %v5039_v12, %v5035_v21  ;;  %v5064_v18 = vpack.c.bf16 %v5036_v26, %v5032_v55 }
 0x565   :  { %7725 = vmatprep.subr.bf16.mxu1 %v8199_v39  ;;  %v5041_v52 = vld [vmem:[#allocation2 + $0x108] sm:$0xff]  ;;  %v8213_v34 = vld [vmem:[%s11625_s11 + $0x738] sm:$0xff]   ;;  %v8215_v42 = vld [vmem:[%s11625_s11 + $0x770] sm:$0xff]  }
 0x566   :  { %7762 = vmatpush3.bf16.msra.mxu0 %v8194_v47  ;;  %v8210_v8 = vld [vmem:[%s11625_s11 + $0x680] sm:$0xff]   ;;  %v8212_v62 = vld [vmem:[%s11625_s11 + $0x7f8] sm:$0xff]   ;;  %v5034_v49 = vld [vmem:[#allocation2 + $0x90] sm:$0xff] }
 0x567   :  { %7763 = vmatprep.subr.bf16.mxu0 %v8196_v1  ;;  %v10519_v20 = vld [vmem:[#allocation2] sm:$0xff]  ;;  %v5038_v36 = vld [vmem:[#allocation2 + $0xd0] sm:$0xff]  ;;  %v8214_v19 = vld [vmem:[%s11625_s11 + $0x7b8] sm:$0xff]  }
 0x568   :  { %7726 = vmatpush3.bf16.msra.mxu1 %v8201_v56  ;;  %v5069_v9 = vpack.c.bf16 %v10519_v20, %v5041_v52  ;;  %v5043_v57 = vld [vmem:[#allocation2 + $0x118] sm:$0xff]  ;;  %v8217_v53 = vld [vmem:[%s11625_s11 + $0x730] sm:$0xff]   ;;  %v10531_v51 = vld [vmem:[#allocation2 + $0x88] sm:$0xfe]  ;;  %v5066_v30 = vpack.c.bf16 %v5038_v36, %v5034_v49 }
 0x569   :  { %5007 = vmatmul.mubr.bf16.gmra.mxu0 %v4631_v7  ;;  %7727 = vmatprep.subr.bf16.mxu1 %v8203_v27  ;;  %v8216_v39 = vld [vmem:[%s11625_s11 + $0x7f0] sm:$0xff]   ;;  %v8219_v47 = vld [vmem:[%s11625_s11 + $0x768] sm:$0xff]   ;;  %v5040_v38 = vld [vmem:[#allocation2 + $0x100] sm:$0xff]  ;;  %v5605_v27 = vrot.slane %v10531_v51, 1  ;;  %v5071_v15 = vpack.c.bf16 %v10519_v20, %v5043_v57 }
 0x56a   :  { %7764 = vmatpush3.bf16.msra.mxu0 %v8198_v16  ;;  %5014 = vmatprep.mubr.bf16.mxu0 %v4636_v11  ;;  %v10541_v61 = vld [vmem:[#allocation2 + $0xa8] sm:$0x1]  ;;  %v10543_v33 = vld [vmem:[#allocation2 + $0xc8] sm:$0xfe]  ;;  %v8223_v13 = vld [vmem:[%s11625_s11 + $0x760] sm:$0xff]   ;;  %v5068_v24 = vpack.c.bf16 %v10519_v20, %v5040_v38 }
 0x56b   :  { %7765 = vmatprep.subr.bf16.mxu0 %v8200_v14  ;;  %4950 = vmatmul.mubr.bf16.gmra.mxu1 %v4633_v23  ;;  %v8221_v1 = vld [vmem:[%s11625_s11 + $0x728] sm:$0xff]   ;;  %v8218_v45 = vld [vmem:[%s11625_s11 + $0x7b0] sm:$0xff]   ;;  %v5606_v2 = vrot.slane %v10541_v61, 1  ;;  %v5617_v16 = vrot.slane %v10543_v33, 1  ;;  %v10560_v44 = vld [vmem:[#allocation2 + $0x98] sm:$0xfe] }
 0x56c   :  { %7728 = vmatpush3.bf16.msra.mxu1 %v8205_v0  ;;  %5368 = vmatprep.mubr.bf16.mxu1 %v5065_v31  ;;  %v5049_v59 = vld [vmem:[#allocation2 + $0x208] sm:$0xff]  ;;  %v10562_v40 = vld [vmem:[#allocation2 + $0xb8] sm:$0x1]  ;;  %v10570_v4 = vld [vmem:[#allocation2 + $0xd8] sm:$0xfe] }
 0x56d   :  { %7729 = vmatprep.subr.bf16.mxu1 %v8207_v41  ;;  %v5053_v17 = vld [vmem:[#allocation2 + $0x248] sm:$0xff]  ;;  %v10572_v3 = vld [vmem:[#allocation2 + $0xf8] sm:$0x1]  ;;  %v10574_v28 = vld [vmem:[#allocation2 + $0x80] sm:$0xfe] }
 0x56e   :  { %7766 = vmatpush3.bf16.msra.mxu0 %v8202_v22  ;;  %v10551_v56 = vld [vmem:[#allocation2 + $0xe8] sm:$0x1]  ;;  %v10576_v37 = vld [vmem:[#allocation2 + $0x110] sm:$0xff]  ;;  %v5073_v29 = vpack.c.bf16 %v5053_v17, %v5049_v59  ;;  %v10578_v0 = vld [vmem:[#allocation2 + $0x218] sm:$0xff] }
 0x56f   :  { %7767 = vmatprep.subr.bf16.mxu0 %v8204_v32  ;;  %v8220_v14 = vld [vmem:[%s11625_s11 + $0x7e8] sm:$0xff]   ;;  %v10580_v23 = vld [vmem:[#allocation2 + $0x258] sm:$0xff]  ;;  %v8225_v41 = vld [vmem:[%s11625_s11 + $0x720] sm:$0xff]  }
 0x570   :  { %7730 = vmatpush3.bf16.msra.mxu1 %v8209_v60  ;;  %v10585_v22 = vld [vmem:[#allocation2 + $0x200] sm:$0xff]  ;;  %v8227_v12 = vld [vmem:[%s11625_s11 + $0x758] sm:$0xff]   ;;  %v10600_v55 = vld [vmem:[#allocation2 + $0x90] sm:$0xfe] }
 0x571   :  { %5015 = vmatmul.mubr.bf16.gmra.mxu0 %v4635_v5  ;;  %7795 = vmatprep.subr.bf16.mxu1 %v8211_v43  ;;  %v10587_v31 = vld [vmem:[#allocation2 + $0x240] sm:$0xff]  ;;  %v5618_v43 = vrot.slane %v10551_v56, 1  ;;  %v10602_v26 = vld [vmem:[#allocation2 + $0xb0] sm:$0x1]  ;;  %v10619_v49 = vld [vmem:[#allocation2 + $0x298] sm:$0xff]  ;;  %v5608_v59 = vrot.slane %v10600_v55, 1 }
 0x572   :  { %7768 = vmatpush3.bf16.msra.mxu0 %v8206_v35  ;;  %5433 = vmatprep.mubr.bf16.mxu0 %v5067_v46  ;;  %v7251_v10 = vpop.f32.mrf.mxu1  ;;  %v10589_v32 = vld [vmem:[#allocation2 + $0xa0] sm:$0x1]  ;;  %v10591_v58 = vld [vmem:[#allocation2 + $0xc0] sm:$0xfe]  ;;  %v5611_v35 = vrot.slane %v10560_v44, 1  ;;  %v10607_v52 = vld [vmem:[#allocation2 + $0x210] sm:$0xff] }
 0x573   :  { %7769 = vmatprep.subr.bf16.mxu0 %v8208_v63  ;;  %5369 = vmatmul.mubr.bf16.vlgmr.msra.gmra.mxu1 %v5064_v18  ;;  %v10593_v50 = vld [vmem:[#allocation2 + $0xe0] sm:$0x1]  ;;  %v8222_v63 = vld [vmem:[%s11625_s11 + $0x7a8] sm:$0xff]   ;;  %v10609_v46 = vld [vmem:[#allocation2 + $0x250] sm:$0xff]  ;;  %v5612_v18 = vrot.slane %v10562_v40, 1  ;;  %v5603_v57 = vrot.slane %v10589_v32, 1 }
 0x574   :  { %7796 = vmatpush3.bf16.msra.mxu1 %v8213_v34  ;;  %5376 = vmatprep.mubr.bf16.mxu1 %v5069_v9  ;;  %v7252_v54 = vpop.f32.mrf.mxu1  ;;  %v10611_v34 = vld [vmem:[#allocation2 + $0x288] sm:$0xff]  ;;  %v10621_v36 = vld [vmem:[#allocation2 + $0x280] sm:$0xff]  ;;  %v10635_v38 = vld [vmem:[#allocation2 + $0xd0] sm:$0xfe] }
 0x575   :  { %v10533_v48 = vadd.f32 %v7252_v54, %v7251_v10  ;;  %7797 = vmatprep.subr.bf16.mxu1 %v8215_v42  ;;  %v5623_v42 = vrot.slane %v10570_v4, 1  ;;  %v5614_v54 = vrot.slane %v10591_v58, 1  ;;  %v8226_v51 = vld [vmem:[%s11625_s11 + $0x7a0] sm:$0xff]  }
 0x576   :  { %7770 = vmatpush3.bf16.msra.mxu0 %v8210_v8  ;;  %v7254_v6 = vpop.f32.mrf.mxu1  ;;  %v5624_v8 = vrot.slane %v10572_v3, 1  ;;  %v10745_v40 = vld [vmem:[#allocation2 + $0x120] sm:$0x1]  ;;  %v10747_v4 = vld [vmem:[#allocation2 + $0x140] sm:$0xfe] }
 0x577   :  { %7835 = vmatprep.subr.bf16.mxu0 %v8212_v62  ;;  %v8224_v62 = vld [vmem:[%s11625_s11 + $0x7e0] sm:$0xff]  }
 0x578   :  { %7798 = vmatpush3.bf16.msra.mxu1 %v8217_v53  ;;  %v7255_v25 = vpop.f32.mrf.mxu1  ;;  %v5615_v53 = vrot.slane %v10593_v50, 1  ;;  %v10749_v3 = vld [vmem:[#allocation2 + $0x160] sm:$0x1] }
 0x579   :  { %v7291_v7 = vpop.f32.mrf.mxu0  ;;  %5434 = vmatmul.mubr.bf16.vlgmr.msra.gmra.mxu0 %v5066_v30  ;;  %v10564_v11 = vadd.f32 %v7255_v25, %v7254_v6  ;;  %7799 = vmatprep.subr.bf16.mxu1 %v8219_v47  ;;  %v8229_v6 = vld [vmem:[%s11625_s11 + $0x718] sm:$0xff]   ;;  %v5609_v30 = vrot.slane %v10602_v26, 1  ;;  %v8231_v25 = vld [vmem:[%s11625_s11 + $0x750] sm:$0xff]   ;;  %v8237_v26 = vld [vmem:[%s11625_s11 + $0x708] sm:$0xff]  }
 0x57a   :  { %7836 = vmatpush3.bf16.msra.mxu0 %v8214_v19  ;;  %5441 = vmatprep.mubr.bf16.mxu0 %v5071_v15  ;;  %v7257_v21 = vpop.f32.mrf.mxu1  ;;  %v5602_v19 = vrot.slane %v10574_v28, 1  ;;  %v5072_v15 = vpack.c.bf16 %v10587_v31, %v10585_v22  ;;  %v10664_v22 = vld [vmem:[#allocation2 + $0x168] sm:$0x1]  ;;  %v10666_v31 = vld [vmem:[#allocation2 + $0x118] sm:$0xfe]  ;;  %v10743_v44 = vsel %vm1737_vm7, %v5614_v54, %v5615_v53 }
 0x57b   :  { %v7292_v60 = vpop.f32.mrf.mxu0  ;;  %7837 = vmatprep.subr.bf16.mxu0 %v8216_v39  ;;  %5377 = vmatmul.mubr.bf16.gmra.mxu1 %v5068_v24  ;;  %v10656_v24 = vld [vmem:[#allocation2 + $0x148] sm:$0xfe]  ;;  %v10763_v58 = vsel %vm1737_vm7, %v5608_v59, %v5609_v30  ;;  %v10787_v59 = vld [vmem:[#allocation2 + $0x170] sm:$0x1] }
 0x57c   :  { %v7293_v5 = vadd.f32 %v7292_v60, %v7291_v7  ;;  %7800 = vmatpush3.bf16.msra.mxu1 %v8221_v1  ;;  %5384 = vmatprep.mubr.bf16.mxu1 %v5073_v29  ;;  %v7258_v9 = vpop.f32.mrf.mxu1  ;;  %v10637_v1 = vld [vmem:[#allocation2 + $0xf0] sm:$0x1]  ;;  %v10652_v7 = vld [vmem:[#allocation2 + $0x108] sm:$0xfe]  ;;  %v5077_v29 = vpack.c.bf16 %v10519_v20, %v10611_v34  ;;  %v10668_v60 = vld [vmem:[#allocation2 + $0x138] sm:$0x1]  ;;  %v10680_v34 = vsel %vm1737_vm7, %v5617_v16, %v5618_v43 }
 0x57d   :  { %v7294_v10 = vpop.f32.mrf.mxu0  ;;  %7801 = vmatprep.subr.bf16.mxu1 %v8223_v13  ;;  %v10630_v47 = vadd.f32 %v7258_v9, %v7257_v21  ;;  %v5075_v13 = vpack.c.bf16 %v10580_v23, %v10578_v0  ;;  %v5079_v0 = vpack.c.bf16 %v10519_v20, %v10619_v49  ;;  %v5076_v23 = vpack.c.bf16 %v10519_v20, %v10621_v36  ;;  %v8228_v16 = vld [vmem:[%s11625_s11 + $0x7d8] sm:$0xff]   ;;  %v10789_v30 = vld [vmem:[#allocation2 + $0x208] sm:$0xfe] }
 0x57e   :  { %v10628_v39 = vadd.f32 %v7293_v5, %v10533_v48  ;;  %7838 = vmatpush3.bf16.msra.mxu0 %v8218_v45  ;;  %v5070_v48 = vpack.c.bf16 %v10519_v20, %v10576_v37  ;;  %v7260_v56 = vpop.f32.mrf.mxu1  ;;  %v5074_v45 = vpack.c.bf16 %v10609_v46, %v10607_v52  ;;  %v5621_v9 = vrot.slane %v10637_v1, 1 }
 0x57f   :  { %v7295_v17 = vpop.f32.mrf.mxu0  ;;  %7839 = vmatprep.subr.bf16.mxu0 %v8220_v14  ;;  %v10654_v14 = vld [vmem:[#allocation2 + $0x128] sm:$0x1]  ;;  %v5629_v33 = vrot.slane %v10652_v7, 1  ;;  %v5641_v43 = vrot.slane %v10656_v24, 1  ;;  %v5636_v1 = vrot.slane %v10668_v60, 1  ;;  %v10729_v60 = vsel %vm1737_vm7, %v5623_v42, %v5624_v8 }
 0x580   :  { %v7296_v37 = vadd.f32 %v7295_v17, %v7294_v10  ;;  %7802 = vmatpush3.bf16.msra.mxu1 %v8225_v41  ;;  %v7261_v5 = vpop.f32.mrf.mxu1  ;;  %v10675_v41 = vsel %vm1737_vm7, %v5605_v27, %v5606_v2  ;;  %v5620_v10 = vrot.slane %v10635_v38, 1  ;;  %v5501_v17 = vld [vmem:[#allocation2 + $0x158] sm:$0xfe]  ;;  %v5630_v27 = vrot.slane %v10654_v14, 1  ;;  %v10770_v42 = vld [vmem:[#allocation2 + $0x130] sm:$0x1] }
 0x581   :  { %v7297_v21 = vpop.f32.mrf.mxu0  ;;  %5442 = vmatmul.mubr.bf16.gmra.mxu0 %v5070_v48  ;;  %7803 = vmatprep.subr.bf16.mxu1 %v8227_v12  ;;  %v5505_v48 = vld [vmem:[#allocation2 + $0x178] sm:$0x1]  ;;  %v10690_v61 = vadd.f32 %v7261_v5, %v7260_v56  ;;  %v5635_v38 = vrot.slane %v10666_v31, 1  ;;  %v8233_v56 = vld [vmem:[%s11625_s11 + $0x710] sm:$0xff]   ;;  %v5731_v7 = vpack.c.bf16 %v10680_v34, %v10675_v41  ;;  %v5647_v14 = vrot.slane %v5501_v17, 1 }
 0x582   :  { %v10685_v12 = vadd.f32 %v7296_v37, %v10564_v11  ;;  %7840 = vmatpush3.bf16.msra.mxu0 %v8222_v63  ;;  %5449 = vmatprep.mubr.bf16.mxu0 %v5075_v13  ;;  %v5642_v63 = vrot.slane %v10664_v22, 1  ;;  %v5648_v24 = vrot.slane %v5505_v48, 1  ;;  %v10712_v37 = vld [vmem:[#allocation2 + $0x100] sm:$0xfe]  ;;  %v10722_v31 = vsel %vm1737_vm7, %v5611_v35, %v5612_v18  ;;  %v10756_v35 = vld [vmem:[#allocation2 + $0x290] sm:$0xff] }
 0x583   :  { %v7298_v2 = vpop.f32.mrf.mxu0  ;;  %7841 = vmatprep.subr.bf16.mxu0 %v8224_v62  ;;  %v7263_v11 = vpop.f32.mrf.mxu1  ;;  %5385 = vmatmul.mubr.bf16.gmra.mxu1 %v5072_v15  ;;  %v8230_v62 = vld [vmem:[%s11625_s11 + $0x798] sm:$0xff]   ;;  %v8235_v15 = vld [vmem:[%s11625_s11 + $0x748] sm:$0xff]   ;;  %v10766_v50 = vsel %vm1737_vm7, %v5620_v10, %v5621_v9  ;;  %v10768_v18 = vld [vmem:[#allocation2 + $0x110] sm:$0xfe]  ;;  %v10778_v55 = vsel %vm1737_vm7, %v5629_v33, %v5630_v27  ;;  %v10784_v53 = vsel %vm1737_vm7, %v5635_v38, %v5636_v1  ;;  %v5627_v10 = vrot.slane %v10745_v40, 1 }
 0x584   :  { %v7299_v13 = vadd.f32 %v7298_v2, %v7297_v21  ;;  %7804 = vmatpush3.bf16.msra.mxu1 %v8229_v6  ;;  %5392 = vmatprep.mubr.bf16.mxu1 %v5077_v29  ;;  %v8232_v29 = vld [vmem:[%s11625_s11 + $0x7d0] sm:$0xff]   ;;  %v10781_v54 = vsel %vm1737_vm7, %v5641_v43, %v5642_v63  ;;  %v10792_v5 = vsel %vm1737_vm7, %v5647_v14, %v5648_v24  ;;  %v5638_v9 = vrot.slane %v10747_v4, 1  ;;  %v10796_v17 = vld [vmem:[#allocation2 + $0x228] sm:$0x1]  ;;  %v10798_v48 = vld [vmem:[#allocation2 + $0x248] sm:$0xfe] }
 0x585   :  { %v7300_v6 = vpop.f32.mrf.mxu0  ;;  %v7264_v22 = vpop.f32.mrf.mxu1  ;;  %7805 = vmatprep.subr.bf16.mxu1 %v8231_v25  ;;  %v10736_v25 = vsel %vm1737_vm7, %v5602_v19, %v5603_v57  ;;  %v10772_v8 = vld [vmem:[#allocation2 + $0x150] sm:$0xfe]  ;;  %v8239_v2 = vld [vmem:[%s11625_s11 + $0x740] sm:$0xff]   ;;  %v5633_v43 = vrot.slane %v10770_v42, 1  ;;  %v5645_v1 = vrot.slane %v10787_v59, 1  ;;  %v5654_v14 = vrot.slane %v10796_v17, 1 }
 0x586   :  { %v10752_v32 = vadd.f32 %v7299_v13, %v10630_v47  ;;  %7842 = vmatpush3.bf16.msra.mxu0 %v8226_v51  ;;  %v10754_v28 = vadd.f32 %v7264_v22, %v7263_v11  ;;  %v5626_v47 = vrot.slane %v10712_v37, 1  ;;  %v8234_v33 = vld [vmem:[%s11625_s11 + $0x790] sm:$0xff]   ;;  %v5632_v11 = vrot.slane %v10768_v18, 1  ;;  %v8241_v38 = vld [vmem:[%s11625_s11 + $0x700] sm:$0xff]   ;;  %v10828_v13 = vld [vmem:[#allocation2 + $0x268] sm:$0x1] }
 0x587   :  { %v7301_v19 = vpop.f32.mrf.mxu0  ;;  %7843 = vmatprep.subr.bf16.mxu0 %v8228_v16  ;;  %v7266_v57 = vpop.f32.mrf.mxu1  ;;  %v5639_v16 = vrot.slane %v10749_v3, 1  ;;  %v5644_v63 = vrot.slane %v10772_v8, 1  ;;  %v5665_v24 = vrot.slane %v10798_v48, 1  ;;  %v10843_v37 = vld [vmem:[#allocation2 + $0x218] sm:$0xfe]  ;;  %v5735_v4 = vpack.c.bf16 %v10781_v54, %v10778_v55  ;;  %v8249_v48 = vld [vmem:[%s11625_s11 + $0x830] sm:$0xff]  }
 0x588   :  { %v7302_v21 = vadd.f32 %v7301_v19, %v7300_v6  ;;  %7806 = vmatpush3.bf16.msra.mxu1 %v8233_v56  ;;  %v5733_v56 = vpack.c.bf16 %v10729_v60, %v10722_v31  ;;  %v10845_v6 = vld [vmem:[#allocation2 + $0x238] sm:$0x1]  ;;  %v5517_v22 = vld [vmem:[#allocation2 + $0x258] sm:$0xfe]  ;;  %v10854_v31 = vld [vmem:[#allocation2 + $0x200] sm:$0xfe]  ;;  %v5737_v41 = vpack.c.bf16 %v10792_v5, %v10784_v53  ;;  %v10861_v34 = vsel %vm1737_vm7, %v5626_v47, %v5627_v10 }
 0x589   :  { %v7303_v51 = vpop.f32.mrf.mxu0  ;;  %5450 = vmatmul.mubr.bf16.gmra.mxu0 %v5074_v45  ;;  %v7267_v27 = vpop.f32.mrf.mxu1  ;;  %7807 = vmatprep.subr.bf16.mxu1 %v8235_v15  ;;  %v8236_v45 = vld [vmem:[%s11625_s11 + $0x7c8] sm:$0xff]   ;;  %v8243_v15 = vld [vmem:[%s11625_s11 + $0x878] sm:$0xff]   ;;  %v5518_v3 = vld [vmem:[#allocation2 + $0x260] sm:$0x1]  ;;  %v5659_v55 = vrot.slane %v10843_v37, 1 }
 0x58a   :  { %v10814_v52 = vadd.f32 %v7302_v21, %v10690_v61  ;;  %7844 = vmatpush3.bf16.msra.mxu0 %v8230_v62  ;;  %5457 = vmatprep.mubr.bf16.mxu0 %v5079_v0  ;;  %v10819_v46 = vadd.f32 %v7267_v27, %v7266_v57  ;;  %v5653_v61 = vrot.slane %v10789_v30, 1  ;;  %v5078_v0 = vpack.c.bf16 %v10519_v20, %v10756_v35  ;;  %v8238_v19 = vld [vmem:[%s11625_s11 + $0x788] sm:$0xff]   ;;  %v8240_v47 = vld [vmem:[%s11625_s11 + $0x7c0] sm:$0xff]   ;;  %v8259_v53 = vld [vmem:[%s11625_s11 + $0x858] sm:$0xff]  }
 0x58b   :  { %v7304_v62 = vpop.f32.mrf.mxu0  ;;  %7845 = vmatprep.subr.bf16.mxu0 %v8232_v29  ;;  %v7269_v49 = vpop.f32.mrf.mxu1  ;;  %5393 = vmatmul.mubr.bf16.gmra.mxu1 %v5076_v23  ;;  %v5730_v20 = vpack.c.bf16 %v10743_v44, %v10736_v25  ;;  %v5732_v23 = vpack.c.bf16 %v10766_v50, %v10763_v58  ;;  %v5521_v29 = vld [vmem:[#allocation2 + $0x278] sm:$0x1]  ;;  %v5510_v25 = vld [vmem:[#allocation2 + $0x220] sm:$0x1]  ;;  %v5514_v44 = vld [vmem:[#allocation2 + $0x240] sm:$0xfe] }
 0x58c   :  { %v7305_v36 = vadd.f32 %v7304_v62, %v7303_v51  ;;  %7808 = vmatpush3.bf16.msra.mxu1 %v8237_v26  ;;  %6034 = vmatprep.mubr.bf16.mxu1 %v5731_v7  ;;  %v10864_v7 = vsel %vm1737_vm7, %v5638_v9, %v5639_v16  ;;  %v5666_v26 = vrot.slane %v10828_v13, 1  ;;  %v5671_v21 = vrot.slane %v5517_v22, 1  ;;  %v8245_v51 = vld [vmem:[%s11625_s11 + $0x838] sm:$0xff]   ;;  %v8247_v62 = vld [vmem:[%s11625_s11 + $0x870] sm:$0xff]   ;;  %v10916_v42 = vld [vmem:[#allocation2 + $0x2a8] sm:$0x1] }
 0x58d   :  { %v7306_v60 = vpop.f32.mrf.mxu0  ;;  %v7270_v40 = vpop.f32.mrf.mxu1  ;;  %7809 = vmatprep.subr.bf16.mxu1 %v8239_v2  ;;  %v5672_v10 = vrot.slane %v5521_v29, 1  ;;  %v5650_v9 = vrot.slane %v10854_v31, 1  ;;  %v5662_v27 = vrot.slane %v5514_v44, 1  ;;  %v5663_v2 = vrot.slane %v5518_v3, 1  ;;  %v10918_v8 = vld [vmem:[#allocation2 + $0x2c8] sm:$0xfe] }
 0x58e   :  { %v10867_v35 = vadd.f32 %v7305_v36, %v10754_v28  ;;  %7846 = vmatpush3.bf16.msra.mxu0 %v8234_v33  ;;  %v10872_v57 = vadd.f32 %v7270_v40, %v7269_v49  ;;  %v5660_v28 = vrot.slane %v10845_v6, 1  ;;  %v5651_v33 = vrot.slane %v5510_v25, 1  ;;  %v10952_v29 = vld [vmem:[#allocation2 + $0x250] sm:$0xfe]  ;;  %v10954_v31 = vld [vmem:[#allocation2 + $0x270] sm:$0x1] }
 0x58f   :  { %v7307_v54 = vpop.f32.mrf.mxu0  ;;  %7847 = vmatprep.subr.bf16.mxu0 %v8236_v45  ;;  %v7272_v59 = vpop.f32.mrf.mxu1  ;;  %v8242_v45 = vld [vmem:[%s11625_s11 + $0x780] sm:$0xff]   ;;  %v10897_v49 = vsel %vm1737_vm7, %v5632_v11, %v5633_v43  ;;  %v10914_v18 = vsel %vm1737_vm7, %v5653_v61, %v5654_v14  ;;  %v10920_v11 = vld [vmem:[#allocation2 + $0x2e8] sm:$0x1]  ;;  %v10928_v30 = vsel %vm1737_vm7, %v5665_v24, %v5666_v26  ;;  %v10934_v61 = vsel %vm1737_vm7, %v5671_v21, %v5672_v10  ;;  %v10938_v14 = vld [vmem:[#allocation2 + $0x230] sm:$0x1] }
 0x590   :  { %v7308_v17 = vadd.f32 %v7307_v54, %v7306_v60  ;;  %7810 = vmatpush3.bf16.msra.mxu1 %v8241_v38  ;;  %v5734_v38 = vpack.c.bf16 %v10864_v7, %v10861_v34  ;;  %v10947_v24 = vsel %vm1737_vm7, %v5650_v9, %v5651_v33  ;;  %v10950_v22 = vsel %vm1737_vm7, %v5662_v27, %v5663_v2  ;;  %v8251_v25 = vld [vmem:[%s11625_s11 + $0x868] sm:$0xff]   ;;  %v10974_v21 = vld [vmem:[#allocation2 + $0x298] sm:$0xfe]  ;;  %v10976_v10 = vld [vmem:[#allocation2 + $0x2b8] sm:$0x1] }
 0x591   :  { %v7309_v16 = vpop.f32.mrf.mxu0  ;;  %5458 = vmatmul.mubr.bf16.gmra.mxu0 %v5078_v0  ;;  %v7273_v13 = vpop.f32.mrf.mxu1  ;;  %7875 = vmatprep.subr.bf16.mxu1 %v8243_v15  ;;  %v10902_v0 = vsel %vm1737_vm7, %v5644_v63, %v5645_v1  ;;  %v10904_v15 = vld [vmem:[#allocation2 + $0x288] sm:$0xfe]  ;;  %v8244_v63 = vld [vmem:[%s11625_s11 + $0x8f8] sm:$0xff]   ;;  %v10931_v1 = vsel %vm1737_vm7, %v5659_v55, %v5660_v28  ;;  %v5678_v3 = vrot.slane %v10916_v42, 1  ;;  %v5690_v26 = vrot.slane %v10920_v11, 1 }
 0x592   :  { %v10907_v37 = vadd.f32 %v7308_v17, %v10819_v46  ;;  %7848 = vmatpush3.bf16.msra.mxu0 %v8238_v19  ;;  %6099 = vmatprep.mubr.bf16.mxu0 %v5733_v56  ;;  %v10909_v6 = vadd.f32 %v7273_v13, %v7272_v59  ;;  %v10936_v56 = vld [vmem:[#allocation2 + $0x210] sm:$0xfe]  ;;  %v5677_v44 = vrot.slane %v10904_v15, 1  ;;  %v5689_v19 = vrot.slane %v10918_v8, 1  ;;  %v10984_v2 = vld [vmem:[#allocation2 + $0x2d8] sm:$0xfe] }
 0x593   :  { %v7310_v43 = vpop.f32.mrf.mxu0  ;;  %7849 = vmatprep.subr.bf16.mxu0 %v8240_v47  ;;  %v7331_v46 = vpop.f32.mrf.mxu1  ;;  %6035 = vmatmul.mubr.bf16.vlgmr.msra.gmra.mxu1 %v5730_v20  ;;  %v8246_v20 = vld [vmem:[%s11625_s11 + $0x8b8] sm:$0xff]   ;;  %v8253_v47 = vld [vmem:[%s11625_s11 + $0x828] sm:$0xff]   ;;  %v5656_v59 = vrot.slane %v10936_v56, 1  ;;  %v5657_v28 = vrot.slane %v10938_v14, 1  ;;  %v5668_v33 = vrot.slane %v10952_v29, 1  ;;  %v5669_v27 = vrot.slane %v10954_v31, 1 }
 0x594   :  { %v7311_v36 = vadd.f32 %v7310_v43, %v7309_v16  ;;  %7876 = vmatpush3.bf16.msra.mxu1 %v8245_v51  ;;  %6042 = vmatprep.mubr.bf16.mxu1 %v5735_v4  ;;  %v8248_v4 = vld [vmem:[%s11625_s11 + $0x8f0] sm:$0xff]   ;;  %v5739_v51 = vpack.c.bf16 %v10928_v30, %v10914_v18  ;;  %v10986_v16 = vld [vmem:[#allocation2 + $0x2f8] sm:$0x1]  ;;  %v5741_v15 = vpack.c.bf16 %v10934_v61, %v10931_v1  ;;  %v8255_v18 = vld [vmem:[%s11625_s11 + $0x860] sm:$0xff]   ;;  %v5683_v56 = vrot.slane %v10974_v21, 1 }
 0x595   :  { %v7312_v60 = vpop.f32.mrf.mxu0  ;;  %v7332_v40 = vpop.f32.mrf.mxu1  ;;  %7877 = vmatprep.subr.bf16.mxu1 %v8247_v62  ;;  %v8250_v62 = vld [vmem:[%s11625_s11 + $0x8b0] sm:$0xff]   ;;  %v5738_v42 = vpack.c.bf16 %v10950_v22, %v10947_v24  ;;  %v10999_v8 = vld [vmem:[#allocation2 + $0x280] sm:$0xfe]  ;;  %v11001_v11 = vld [vmem:[#allocation2 + $0x2a0] sm:$0x1]  ;;  %v11013_v30 = vsel %vm1737_vm7, %v5689_v19, %v5690_v26  ;;  %v5684_v14 = vrot.slane %v10976_v10, 1  ;;  %v11037_v5 = vsel %vm1737_vm7, %v5656_v59, %v5657_v28 }
 0x596   :  { %v10967_v55 = vadd.f32 %v7311_v36, %v10872_v57  ;;  %7850 = vmatpush3.bf16.msra.mxu0 %v8242_v45  ;;  %v7333_v54 = vadd.f32 %v7332_v40, %v7331_v46  ;;  %v5736_v57 = vpack.c.bf16 %v10902_v0, %v10897_v49  ;;  %v11010_v46 = vsel %vm1737_vm7, %v5677_v44, %v5678_v3  ;;  %v5530_v36 = vld [vmem:[#allocation2 + $0x2c0] sm:$0xfe]  ;;  %v6145_v40 = vld [vmem:[#allocation2 + $0xa8] sm:$0x3]  ;;  %v11050_v59 = vld [vmem:[#allocation2 + $0x2b0] sm:$0x1] }
 0x597   :  { %v7313_v9 = vpop.f32.mrf.mxu0  ;;  %7915 = vmatprep.subr.bf16.mxu0 %v8244_v63  ;;  %v7334_v17 = vpop.f32.mrf.mxu1  ;;  %v8252_v63 = vld [vmem:[%s11625_s11 + $0x8e8] sm:$0xff]   ;;  %v5695_v29 = vrot.slane %v10984_v2, 1  ;;  %v5696_v31 = vrot.slane %v10986_v16, 1  ;;  %v5675_v44 = vrot.slane %v11001_v11, 1  ;;  %v5743_v10 = vpack.c.bf16 %v11013_v30, %v11010_v46  ;;  %v8256_v11 = vld [vmem:[%s11625_s11 + $0x8e0] sm:$0xff]  }
 0x598   :  { %v7314_v45 = vadd.f32 %v7313_v9, %v7312_v60  ;;  %v2495_v13 = vadd.f32 %v7333_v54, %v10628_v39  ;;  %7878 = vmatpush3.bf16.msra.mxu1 %v8249_v48  ;;  %v5534_v48 = vld [vmem:[#allocation2 + $0x2e0] sm:$0x1]  ;;  %v11028_v60 = vld [vmem:[#allocation2 + $0x88] sm:$0xfc]  ;;  %v6153_v3 = vld [vmem:[#allocation2 + $0xe8] sm:$0x3] }
 0x599   :  { %v7371_v39 = vpop.f32.mrf.mxu0  ;;  %6100 = vmatmul.mubr.bf16.vlgmr.msra.gmra.mxu0 %v5732_v23  ;;  %v7335_v43 = vpop.f32.mrf.mxu1  ;;  %7879 = vmatprep.subr.bf16.mxu1 %v8251_v25  ;;  %v8257_v23 = vld [vmem:[%s11625_s11 + $0x820] sm:$0xff]   ;;  %v8254_v7 = vld [vmem:[%s11625_s11 + $0x8a8] sm:$0xff]   ;;  %v5687_v26 = vrot.slane %v5534_v48, 1  ;;  %v11048_v54 = vld [vmem:[#allocation2 + $0x290] sm:$0xfe]  ;;  %v6284_v16 = vrot.slane %v6153_v3, 2 }
 0x59a   :  { %v11018_v58 = vadd.f32 %v7314_v45, %v10909_v6  ;;  %7916 = vmatpush3.bf16.msra.mxu0 %v8246_v20  ;;  %6107 = vmatprep.mubr.bf16.mxu0 %v5737_v41  ;;  %v7336_v50 = vadd.f32 %v7335_v43, %v7334_v17  ;;  %v11040_v41 = vsel %vm1737_vm7, %v5668_v33, %v5669_v27  ;;  %v5674_v20 = vrot.slane %v10999_v8, 1  ;;  %v11059_v9 = vld [vmem:[#allocation2 + $0x2f0] sm:$0x1]  ;;  %v11064_v45 = vld [vmem:[#allocation2 + $0x98] sm:$0xfc] }
 0x59b   :  { %v7372_v25 = vpop.f32.mrf.mxu0  ;;  %7917 = vmatprep.subr.bf16.mxu0 %v8248_v4  ;;  %v7337_v6 = vpop.f32.mrf.mxu1  ;;  %6043 = vmatmul.mubr.bf16.gmra.mxu1 %v5734_v38  ;;  %v6149_v4 = vld [vmem:[#allocation2 + $0xc8] sm:$0xfc]  ;;  %v5686_v38 = vrot.slane %v5530_v36, 1  ;;  %v6271_v17 = vrot.slane %v11028_v60, 2  ;;  %v11072_v43 = vsel %vm1737_vm7, %v5695_v29, %v5696_v31  ;;  %v5681_v46 = vrot.slane %v11050_v59, 1  ;;  %v8258_v29 = vld [vmem:[%s11625_s11 + $0x8a0] sm:$0xff]  }
 0x59c   :  { %v7373_v19 = vadd.f32 %v7372_v25, %v7371_v39  ;;  %v2498_v34 = vadd.f32 %v7336_v50, %v10685_v12  ;;  %7880 = vmatpush3.bf16.msra.mxu1 %v8253_v47  ;;  %6050 = vmatprep.mubr.bf16.mxu1 %v5739_v51  ;;  %v11055_v12 = vsel %vm1737_vm7, %v5683_v56, %v5684_v14  ;;  %v11057_v47 = vld [vmem:[#allocation2 + $0x2d0] sm:$0xfe]  ;;  %v6272_v51 = vrot.slane %v6145_v40, 2  ;;  %v11079_v30 = vld [vmem:[#allocation2 + $0xd8] sm:$0xfc] }
 0x59d   :  { %v7374_v28 = vpop.f32.mrf.mxu0  ;;  %v7338_v21 = vpop.f32.mrf.mxu1  ;;  %7881 = vmatprep.subr.bf16.mxu1 %v8255_v18  ;;  %v6283_v2 = vrot.slane %v6149_v4, 2  ;;  %v11066_v18 = vld [vmem:[#allocation2 + $0xb8] sm:$0x3]  ;;  %v11086_v36 = vsel %vm1737_vm7, %v5686_v38, %v5687_v26  ;;  %v5692_v48 = vrot.slane %v11057_v47, 1  ;;  %v8263_v31 = vld [vmem:[%s11625_s11 + $0x850] sm:$0xff]   ;;  %v5693_v60 = vrot.slane %v11059_v9, 1 }
 0x59e   :  { %v11062_v33 = vadd.f32 %v7373_v19, %v2495_v13  ;;  %7918 = vmatpush3.bf16.msra.mxu0 %v8250_v62  ;;  %v7339_v27 = vadd.f32 %v7338_v21, %v7337_v6  ;;  %v11075_v13 = vsel %vm1737_vm7, %v5674_v20, %v5675_v44  ;;  %v5680_v62 = vrot.slane %v11048_v54, 1  ;;  %v8261_v14 = vld [vmem:[%s11625_s11 + $0x818] sm:$0xff]   ;;  %v8265_v6 = vld [vmem:[%s11625_s11 + $0x810] sm:$0xff]   ;;  %v11121_v4 = vld [vmem:[#allocation2 + $0x80] sm:$0xfc] }
 0x59f   :  { %v7375_v8 = vpop.f32.mrf.mxu0  ;;  %7919 = vmatprep.subr.bf16.mxu0 %v8252_v63  ;;  %v7340_v39 = vpop.f32.mrf.mxu1  ;;  %v11103_v40 = vsel %vm2718_vm8, %v6271_v17, %v6272_v51  ;;  %v6277_v49 = vrot.slane %v11064_v45, 2  ;;  %v6278_v0 = vrot.slane %v11066_v18, 2  ;;  %v11118_v20 = vld [vmem:[#allocation2 + $0xf8] sm:$0x3]  ;;  %v6289_v44 = vrot.slane %v11079_v30, 2 }
 0x5a0   :  { %v7376_v56 = vadd.f32 %v7375_v8, %v7374_v28  ;;  %v2503_v63 = vadd.f32 %v7339_v27, %v10752_v32  ;;  %7882 = vmatpush3.bf16.msra.mxu1 %v8257_v23  ;;  %v8260_v23 = vld [vmem:[%s11625_s11 + $0x8d8] sm:$0xff]   ;;  %v5740_v1 = vpack.c.bf16 %v11040_v41, %v11037_v5  ;;  %v5745_v61 = vpack.c.bf16 %v11072_v43, %v11055_v12  ;;  %v11137_v38 = vld [vmem:[#allocation2 + $0xc0] sm:$0xfc]  ;;  %v11139_v26 = vld [vmem:[#allocation2 + $0xe0] sm:$0x3] }
 0x5a1   :  { %v7377_v50 = vpop.f32.mrf.mxu0  ;;  %6108 = vmatmul.mubr.bf16.gmra.mxu0 %v5736_v57  ;;  %v7341_v32 = vpop.f32.mrf.mxu1  ;;  %7883 = vmatprep.subr.bf16.mxu1 %v8259_v53  ;;  %v11116_v53 = vsel %vm2718_vm8, %v6283_v2, %v6284_v16  ;;  %v11146_v5 = vsel %vm1737_vm7, %v5680_v62, %v5681_v46  ;;  %v11148_v41 = vld [vmem:[#allocation2 + $0x90] sm:$0xfc]  ;;  %v11150_v54 = vld [vmem:[#allocation2 + $0x108] sm:$0xfc]  ;;  %v6161_v59 = vld [vmem:[#allocation2 + $0x128] sm:$0x3]  ;;  %v11156_v12 = vsel %vm1737_vm7, %v5692_v48, %v5693_v60 }
 0x5a2   :  { %v11107_v57 = vadd.f32 %v7376_v56, %v2498_v34  ;;  %7920 = vmatpush3.bf16.msra.mxu0 %v8254_v7  ;;  %6115 = vmatprep.mubr.bf16.mxu0 %v5741_v15  ;;  %v7342_v25 = vadd.f32 %v7341_v32, %v7340_v39  ;;  %v8267_v15 = vld [vmem:[%s11625_s11 + $0x848] sm:$0xff]   ;;  %v5742_v34 = vpack.c.bf16 %v11086_v36, %v11075_v13  ;;  %v11135_v7 = vld [vmem:[#allocation2 + $0xa0] sm:$0x3]  ;;  %v6290_v47 = vrot.slane %v11118_v20, 2  ;;  %v11168_v39 = vld [vmem:[#allocation2 + $0xd0] sm:$0xfc] }
 0x5a3   :  { %v7378_v3 = vpop.f32.mrf.mxu0  ;;  %7921 = vmatprep.subr.bf16.mxu0 %v8256_v11  ;;  %v7343_v19 = vpop.f32.mrf.mxu1  ;;  %6051 = vmatmul.mubr.bf16.gmra.mxu1 %v5738_v42  ;;  %v8262_v42 = vld [vmem:[%s11625_s11 + $0x898] sm:$0xff]   ;;  %v6268_v9 = vrot.slane %v11121_v4, 2  ;;  %v6165_v17 = vld [vmem:[#allocation2 + $0x148] sm:$0xfc]  ;;  %v6169_v51 = vld [vmem:[#allocation2 + $0x168] sm:$0x3] }
 0x5a4   :  { %v7379_v24 = vadd.f32 %v7378_v3, %v7377_v50  ;;  %v2506_v22 = vadd.f32 %v7342_v25, %v10814_v52  ;;  %7884 = vmatpush3.bf16.msra.mxu1 %v8261_v14  ;;  %6058 = vmatprep.mubr.bf16.mxu1 %v5743_v10  ;;  %v8264_v52 = vld [vmem:[%s11625_s11 + $0x8d0] sm:$0xff]   ;;  %v6397_v10 = vpack.c.bf16 %v11116_v53, %v11103_v40  ;;  %v6269_v16 = vrot.slane %v11135_v7, 2  ;;  %v8269_v46 = vld [vmem:[%s11625_s11 + $0x808] sm:$0xff]   ;;  %v8271_v56 = vld [vmem:[%s11625_s11 + $0x840] sm:$0xff]  }
 0x5a5   :  { %v7380_v28 = vpop.f32.mrf.mxu0  ;;  %v7344_v21 = vpop.f32.mrf.mxu1  ;;  %7885 = vmatprep.subr.bf16.mxu1 %v8263_v31  ;;  %v6280_v8 = vrot.slane %v11137_v38, 2  ;;  %v11166_v11 = vld [vmem:[#allocation2 + $0xb0] sm:$0x3]  ;;  %v6274_v14 = vrot.slane %v11148_v41, 2  ;;  %v6295_v48 = vrot.slane %v11150_v54, 2  ;;  %v6296_v50 = vrot.slane %v6161_v59, 2 }
 0x5a6   :  { %v11162_v27 = vadd.f32 %v7379_v24, %v2503_v63  ;;  %7922 = vmatpush3.bf16.msra.mxu0 %v8258_v29  ;;  %v7345_v2 = vadd.f32 %v7344_v21, %v7343_v19  ;;  %v6281_v63 = vrot.slane %v11139_v26, 2  ;;  %v11183_v31 = vld [vmem:[#allocation2 + $0xf0] sm:$0x3]  ;;  %v6307_v60 = vrot.slane %v6165_v17, 2  ;;  %v11185_v25 = vld [vmem:[#allocation2 + $0x118] sm:$0xfc] }
 0x5a7   :  { %v7381_v43 = vpop.f32.mrf.mxu0  ;;  %7923 = vmatprep.subr.bf16.mxu0 %v8260_v23  ;;  %v7346_v62 = vpop.f32.mrf.mxu1  ;;  %v8266_v23 = vld [vmem:[%s11625_s11 + $0x890] sm:$0xff]   ;;  %v6308_v40 = vrot.slane %v6169_v51, 2  ;;  %v8268_v4 = vld [vmem:[%s11625_s11 + $0x8c8] sm:$0xff]   ;;  %v6275_v3 = vrot.slane %v11166_v11, 2  ;;  %v6286_v19 = vrot.slane %v11168_v39, 2  ;;  %v11211_v18 = vsel %vm2718_vm8, %v6268_v9, %v6269_v16  ;;  %v8273_v13 = vld [vmem:[%s11625_s11 + $0x800] sm:$0xff]  }
 0x5a8   :  { %v7382_v29 = vadd.f32 %v7381_v43, %v7380_v28  ;;  %v2511_v32 = vadd.f32 %v7345_v2, %v10867_v35  ;;  %7886 = vmatpush3.bf16.msra.mxu1 %v8265_v6  ;;  %v11195_v35 = vsel %vm2718_vm8, %v6277_v49, %v6278_v0  ;;  %v11200_v6 = vsel %vm2718_vm8, %v6289_v44, %v6290_v47  ;;  %v6171_v30 = vld [vmem:[#allocation2 + $0x178] sm:$0x3]  ;;  %v11213_v49 = vld [vmem:[#allocation2 + $0x100] sm:$0xfc]  ;;  %v11215_v0 = vld [vmem:[#allocation2 + $0x120] sm:$0x3] }
 0x5a9   :  { %v7383_v53 = vpop.f32.mrf.mxu0  ;;  %6116 = vmatmul.mubr.bf16.gmra.mxu0 %v5740_v1  ;;  %v7347_v20 = vpop.f32.mrf.mxu1  ;;  %7887 = vmatprep.subr.bf16.mxu1 %v8267_v15  ;;  %v11204_v1 = vld [vmem:[#allocation2 + $0x138] sm:$0x3]  ;;  %v11206_v15 = vld [vmem:[#allocation2 + $0x158] sm:$0xfc]  ;;  %v11221_v26 = vsel %vm2718_vm8, %v6280_v8, %v6281_v63  ;;  %v11225_v24 = vsel %vm2718_vm8, %v6295_v48, %v6296_v50  ;;  %v11230_v54 = vld [vmem:[#allocation2 + $0x160] sm:$0x3]  ;;  %v11237_v36 = vsel %vm2718_vm8, %v6307_v60, %v6308_v40 }
 0x5aa   :  { %v11208_v7 = vadd.f32 %v7382_v29, %v2506_v22  ;;  %7924 = vmatpush3.bf16.msra.mxu0 %v8262_v42  ;;  %6123 = vmatprep.mubr.bf16.mxu0 %v5745_v61  ;;  %v7348_v45 = vadd.f32 %v7347_v20, %v7346_v62  ;;  %v6287_v61 = vrot.slane %v11183_v31, 2  ;;  %v6301_v22 = vrot.slane %v11185_v25, 2  ;;  %v11228_v42 = vld [vmem:[#allocation2 + $0x140] sm:$0xfc]  ;;  %v6173_v39 = vld [vmem:[#allocation2 + $0x208] sm:$0xfc] }
 0x5ab   :  { %v7384_v44 = vpop.f32.mrf.mxu0  ;;  %7925 = vmatprep.subr.bf16.mxu0 %v8264_v52  ;;  %v7349_v38 = vpop.f32.mrf.mxu1  ;;  %6059 = vmatmul.mubr.bf16.gmra.mxu1 %v5742_v34  ;;  %v6302_v34 = vrot.slane %v11204_v1, 2  ;;  %v8270_v52 = vld [vmem:[%s11625_s11 + $0x888] sm:$0xff]   ;;  %v6314_v9 = vrot.slane %v6171_v30, 2  ;;  %v6292_v17 = vrot.slane %v11213_v49, 2  ;;  %v6293_v51 = vrot.slane %v11215_v0, 2  ;;  %v8274_v1 = vld [vmem:[%s11625_s11 + $0x880] sm:$0xff]  }
 0x5ac   :  { %v7385_v59 = vadd.f32 %v7384_v44, %v7383_v53  ;;  %v2514_v28 = vadd.f32 %v7348_v45, %v10907_v37  ;;  %7888 = vmatpush3.bf16.msra.mxu1 %v8269_v46  ;;  %6700 = vmatprep.mubr.bf16.mxu1 %v6397_v10  ;;  %v8272_v37 = vld [vmem:[%s11625_s11 + $0x8c0] sm:$0xff]   ;;  %v6313_v10 = vrot.slane %v11206_v15, 2  ;;  %v6304_v8 = vrot.slane %v11228_v42, 2  ;;  %v6177_v43 = vld [vmem:[#allocation2 + $0x228] sm:$0x3] }
 0x5ad   :  { %v7386_v21 = vpop.f32.mrf.mxu0  ;;  %v7350_v47 = vpop.f32.mrf.mxu1  ;;  %7889 = vmatprep.subr.bf16.mxu1 %v8271_v56  ;;  %v6305_v11 = vrot.slane %v11230_v54, 2  ;;  %v5744_v46 = vpack.c.bf16 %v11156_v12, %v11146_v5  ;;  %v6399_v56 = vpack.c.bf16 %v11200_v6, %v11195_v35  ;;  %v6396_v48 = vpack.c.bf16 %v11221_v26, %v11211_v18  ;;  %v11264_v29 = vld [vmem:[#allocation2 + $0x110] sm:$0xfc]  ;;  %v11272_v40 = vld [vmem:[#allocation2 + $0x130] sm:$0x3] }
 0x5ae   :  { %v11249_v2 = vadd.f32 %v7385_v59, %v2511_v32  ;;  %7926 = vmatpush3.bf16.msra.mxu0 %v8266_v23  ;;  %v7351_v16 = vadd.f32 %v7350_v47, %v7349_v38  ;;  %v11262_v50 = vsel %vm2718_vm8, %v6274_v14, %v6275_v3  ;;  %v6181_v32 = vld [vmem:[#allocation2 + $0x248] sm:$0xfc]  ;;  %v6185_v23 = vld [vmem:[#allocation2 + $0x268] sm:$0x3]  ;;  %v11268_v5 = vsel %vm2718_vm8, %v6286_v19, %v6287_v61  ;;  %v11274_v41 = vld [vmem:[#allocation2 + $0x150] sm:$0xfc] }
 0x5af   :  { %v7387_v62 = vpop.f32.mrf.mxu0  ;;  %7927 = vmatprep.subr.bf16.mxu0 %v8268_v4  ;;  %v7352_v63 = vpop.f32.mrf.mxu1  ;;  %v6401_v12 = vpack.c.bf16 %v11237_v36, %v11225_v24  ;;  %v11276_v14 = vld [vmem:[#allocation2 + $0x170] sm:$0x3]  ;;  %v11279_v20 = vsel %vm2718_vm8, %v6301_v22, %v6302_v34  ;;  %v6319_v4 = vrot.slane %v6173_v39, 2  ;;  %v6320_v35 = vrot.slane %v6177_v43, 2  ;;  %v11284_v6 = vld [vmem:[#allocation2 + $0x218] sm:$0xfc] }
 0x5b0   :  { %v7388_v31 = vadd.f32 %v7387_v62, %v7386_v21  ;;  %v2519_v60 = vadd.f32 %v7351_v16, %v10967_v55  ;;  %7890 = vmatpush3.bf16.msra.mxu1 %v8273_v13  ;;  %v11282_v55 = vsel %vm2718_vm8, %v6313_v10, %v6314_v9  ;;  %v11286_v3 = vld [vmem:[#allocation2 + $0x238] sm:$0x3]  ;;  %v6331_v45 = vrot.slane %v6181_v32, 2  ;;  %v6183_v61 = vld [vmem:[#allocation2 + $0x258] sm:$0xfc] }
 0x5b1   :  { %v7389_v25 = vpop.f32.mrf.mxu0  ;;  %6124 = vmatmul.mubr.bf16.gmra.mxu0 %v5744_v46  ;;  %v7353_v53 = vpop.f32.mrf.mxu1  ;;  %v6332_v18 = vrot.slane %v6185_v23, 2  ;;  %v6298_v0 = vrot.slane %v11264_v29, 2  ;;  %v6299_v44 = vrot.slane %v11272_v40, 2  ;;  %v6310_v38 = vrot.slane %v11274_v41, 2  ;;  %v6187_v42 = vld [vmem:[#allocation2 + $0x278] sm:$0x3] }
 0x5b2   :  { %v11288_v19 = vadd.f32 %v7388_v31, %v2514_v28  ;;  %7928 = vmatpush3.bf16.msra.mxu0 %v8270_v52  ;;  %6765 = vmatprep.mubr.bf16.mxu0 %v6399_v56  ;;  %v7354_v15 = vadd.f32 %v7353_v53, %v7352_v63  ;;  %v6311_v26 = vrot.slane %v11276_v14, 2  ;;  %v6325_v54 = vrot.slane %v11284_v6, 2  ;;  %v6172_v28 = vld [vmem:[#allocation2 + $0x200] sm:$0xfc]  ;;  %v6176_v47 = vld [vmem:[#allocation2 + $0x220] sm:$0x3] }
 0x5b3   :  { %v7390_v30 = vpop.f32.mrf.mxu0  ;;  %7929 = vmatprep.subr.bf16.mxu0 %v8272_v37  ;;  %v7411_v49 = vpop.f32.mrf.mxu1  ;;  %6701 = vmatmul.mubr.bf16.vlgmr.msra.gmra.mxu1 %v6396_v48  ;;  %v6326_v59 = vrot.slane %v11286_v3, 2  ;;  %v6294_v34 = vsel %vm2718_vm8, %v6292_v17, %v6293_v51  ;;  %v6306_v21 = vsel %vm2718_vm8, %v6304_v8, %v6305_v11  ;;  %v6321_v52 = vsel %vm2718_vm8, %v6319_v4, %v6320_v35  ;;  %v6180_v37 = vld [vmem:[#allocation2 + $0x240] sm:$0xfc]  ;;  %v6184_v10 = vld [vmem:[#allocation2 + $0x260] sm:$0x3] }
 0x5b4   :  { %v7391_v24 = vadd.f32 %v7390_v30, %v7389_v25  ;;  %v2522_v22 = vadd.f32 %v7354_v15, %v11018_v58  ;;  %6708 = vmatprep.mubr.bf16.mxu1 %v6401_v12  ;;  %v6333_v16 = vsel %vm2718_vm8, %v6331_v45, %v6332_v18  ;;  %v6337_v39 = vrot.slane %v6183_v61, 2  ;;  %v6189_v43 = vld [vmem:[#allocation2 + $0x288] sm:$0xfc]  ;;  %v6193_v62 = vld [vmem:[#allocation2 + $0x2a8] sm:$0x3] }
 0x5b5   :  { %v7392_v13 = vpop.f32.mrf.mxu0  ;;  %v7412_v36 = vpop.f32.mrf.mxu1  ;;  %v6398_v17 = vpack.c.bf16 %v11268_v5, %v11262_v50  ;;  %v6403_v51 = vpack.c.bf16 %v11282_v55, %v11279_v20  ;;  %v6338_v11 = vrot.slane %v6187_v42, 2  ;;  %v6316_v56 = vrot.slane %v6172_v28, 2  ;;  %v6197_v63 = vld [vmem:[#allocation2 + $0x2c8] sm:$0xfc]  ;;  %v6201_v48 = vld [vmem:[#allocation2 + $0x2e8] sm:$0x3] }
 0x5b6   :  { %v11303_v9 = vadd.f32 %v7391_v24, %v2519_v60  ;;  %7930 = vmatpush3.bf16.msra.mxu0 %v8274_v1  ;;  %v7413_v58 = vadd.f32 %v7412_v36, %v7411_v49  ;;  %v6317_v32 = vrot.slane %v6176_v47, 2  ;;  %v6328_v23 = vrot.slane %v6180_v37, 2  ;;  %v11310_v14 = vld [vmem:[#allocation2 + $0x210] sm:$0xfc]  ;;  %v11312_v50 = vld [vmem:[#allocation2 + $0x230] sm:$0x3] }
 0x5b7   :  { %v7393_v46 = vpop.f32.mrf.mxu0  ;;  %v7414_v8 = vpop.f32.mrf.mxu1  ;;  %v6329_v31 = vrot.slane %v6184_v10, 2  ;;  %v6400_v40 = vpack.c.bf16 %v6306_v21, %v6294_v34  ;;  %v6405_v41 = vpack.c.bf16 %v6333_v16, %v6321_v52  ;;  %v6343_v5 = vrot.slane %v6189_v43, 2  ;;  %v6182_v55 = vld [vmem:[#allocation2 + $0x250] sm:$0xfc]  ;;  %v6186_v4 = vld [vmem:[#allocation2 + $0x270] sm:$0x3] }
 0x5b8   :  { %v7394_v29 = vadd.f32 %v7393_v46, %v7392_v13  ;;  %v6344_v25 = vrot.slane %v6193_v62, 2  ;;  %v6355_v35 = vrot.slane %v6197_v63, 2  ;;  %v6356_v6 = vrot.slane %v6201_v48, 2  ;;  %v6195_v42 = vld [vmem:[#allocation2 + $0x2b8] sm:$0x3] }
 0x5b9   :  { %v7451_v60 = vpop.f32.mrf.mxu0  ;;  %6766 = vmatmul.mubr.bf16.vlgmr.msra.gmra.mxu0 %v6398_v17  ;;  %v7415_v12 = vpop.f32.mrf.mxu1  ;;  %v6300_v15 = vsel %vm2718_vm8, %v6298_v0, %v6299_v44  ;;  %v6312_v45 = vsel %vm2718_vm8, %v6310_v38, %v6311_v26  ;;  %v6327_v18 = vsel %vm2718_vm8, %v6325_v54, %v6326_v59  ;;  %v6339_v49 = vsel %vm2718_vm8, %v6337_v39, %v6338_v11  ;;  %v6199_v26 = vld [vmem:[#allocation2 + $0x2d8] sm:$0xfc]  ;;  %v6203_v54 = vld [vmem:[#allocation2 + $0x2f8] sm:$0x3]  ;;  %v6188_v47 = vld [vmem:[#allocation2 + $0x280] sm:$0xfc] }
 0x5ba   :  { %v11314_v53 = vadd.f32 %v7394_v29, %v2522_v22  ;;  %6773 = vmatprep.mubr.bf16.mxu0 %v6403_v51  ;;  %v7416_v20 = vadd.f32 %v7415_v12, %v7414_v8  ;;  %v6322_v61 = vrot.slane %v11310_v14, 2  ;;  %v6323_v24 = vrot.slane %v11312_v50, 2  ;;  %v6191_v22 = vld [vmem:[#allocation2 + $0x298] sm:$0xfc]  ;;  %v6192_v37 = vld [vmem:[#allocation2 + $0x2a0] sm:$0x3] }
 0x5bb   :  { %v7452_v3 = vpop.f32.mrf.mxu0  ;;  %v7417_v1 = vpop.f32.mrf.mxu1  ;;  %6709 = vmatmul.mubr.bf16.gmra.mxu1 %v6400_v40  ;;  %v6318_v36 = vsel %vm2718_vm8, %v6316_v56, %v6317_v32  ;;  %v6330_v0 = vsel %vm2718_vm8, %v6328_v23, %v6329_v31  ;;  %v6334_v44 = vrot.slane %v6182_v55, 2  ;;  %v6335_v38 = vrot.slane %v6186_v4, 2  ;;  %v6196_v17 = vld [vmem:[#allocation2 + $0x2c0] sm:$0xfc]  ;;  %v6200_v51 = vld [vmem:[#allocation2 + $0x2e0] sm:$0x3] }
 0x5bc   :  { %v7453_v30 = vadd.f32 %v7452_v3, %v7451_v60  ;;  %6716 = vmatprep.mubr.bf16.mxu1 %v6405_v41  ;;  %v6345_v21 = vsel %vm2718_vm8, %v6343_v5, %v6344_v25  ;;  %v6357_v52 = vsel %vm2718_vm8, %v6355_v35, %v6356_v6  ;;  %v6402_v16 = vpack.c.bf16 %v6312_v45, %v6300_v15  ;;  %v6190_v35 = vld [vmem:[#allocation2 + $0x290] sm:$0xfc]  ;;  %v6194_v6 = vld [vmem:[#allocation2 + $0x2b0] sm:$0x3] }
 0x5bd   :  { %v7454_v28 = vpop.f32.mrf.mxu0  ;;  %v7418_v13 = vpop.f32.mrf.mxu1  ;;  %v6407_v39 = vpack.c.bf16 %v6339_v49, %v6327_v18  ;;  %v6349_v62 = vrot.slane %v6191_v22, 2  ;;  %v6350_v46 = vrot.slane %v6195_v42, 2  ;;  %v6362_v56 = vrot.slane %v6203_v54, 2  ;;  %v6198_v15 = vld [vmem:[#allocation2 + $0x2d0] sm:$0xfc] }
 0x5be   :  { %v3219_v59 = vadd.f32 %v7453_v30, %v7413_v58  ;;  %v7419_v34 = vadd.f32 %v7418_v13, %v7417_v1  ;;  %v6361_v58 = vrot.slane %v6199_v26, 2  ;;  %v6404_v29 = vpack.c.bf16 %v6330_v0, %v6318_v36  ;;  %v6202_v45 = vld [vmem:[#allocation2 + $0x2f0] sm:$0x3] }
 0x5bf   :  { %v7455_v10 = vpop.f32.mrf.mxu0  ;;  %v7420_v43 = vpop.f32.mrf.mxu1  ;;  %v6409_v32 = vpack.c.bf16 %v6357_v52, %v6345_v21  ;;  %v6340_v23 = vrot.slane %v6188_v47, 2  ;;  %v6341_v31 = vrot.slane %v6192_v37, 2  ;;  %v6352_v40 = vrot.slane %v6196_v17, 2 }
 0x5c0   :  { %v11327_v8 = vadd.f32 %v3219_v59, %v11062_v33  ;;  %v7456_v11 = vadd.f32 %v7455_v10, %v7454_v28  ;;  %v6353_v41 = vrot.slane %v6200_v51, 2  ;;  %v6324_v33 = vsel %vm2718_vm8, %v6322_v61, %v6323_v24 }
 0x5c1   :  { %v7457_v63 = vpop.f32.mrf.mxu0  ;;  %6774 = vmatmul.mubr.bf16.gmra.mxu0 %v6402_v16  ;;  %v7421_v48 = vpop.f32.mrf.mxu1  ;;  %v6336_v5 = vsel %vm2718_vm8, %v6334_v44, %v6335_v38  ;;  %v6351_v4 = vsel %vm2718_vm8, %v6349_v62, %v6350_v46  ;;  %v6342_v49 = vsel %vm2718_vm8, %v6340_v23, %v6341_v31  ;;  %v6346_v28 = vrot.slane %v6190_v35, 2 }
 0x5c2   :  { %v3222_v60 = vadd.f32 %v7456_v11, %v7416_v20  ;;  %6781 = vmatprep.mubr.bf16.mxu0 %v6407_v39  ;;  %v7422_v12 = vadd.f32 %v7421_v48, %v7420_v43  ;;  %v6363_v20 = vsel %vm2718_vm8, %v6361_v58, %v6362_v56  ;;  %v6354_v61 = vsel %vm2718_vm8, %v6352_v40, %v6353_v41 }
 0x5c3   :  { %v7458_v14 = vpop.f32.mrf.mxu0  ;;  %v7423_v50 = vpop.f32.mrf.mxu1  ;;  %6717 = vmatmul.mubr.bf16.gmra.mxu1 %v6404_v29  ;;  %v6406_v24 = vpack.c.bf16 %v6336_v5, %v6324_v33  ;;  %v6411_v22 = vpack.c.bf16 %v6363_v20, %v6351_v4  ;;  %v6347_v13 = vrot.slane %v6194_v6, 2  ;;  %v6358_v44 = vrot.slane %v6198_v15, 2 }
 0x5c4   :  { %v11332_v25 = vadd.f32 %v3222_v60, %v11107_v57  ;;  %v7459_v55 = vadd.f32 %v7458_v14, %v7457_v63  ;;  %6724 = vmatprep.mubr.bf16.mxu1 %v6409_v32  ;;  %v6359_v38 = vrot.slane %v6202_v45, 2  ;;  %v6408_v59 = vpack.c.bf16 %v6354_v61, %v6342_v49 }
 0x5c5   :  { %v7460_v3 = vpop.f32.mrf.mxu0  ;;  %v7424_v1 = vpop.f32.mrf.mxu1 }
 0x5c6   :  { %v3227_v18 = vadd.f32 %v7459_v55, %v7419_v34  ;;  %v7425_v30 = vadd.f32 %v7424_v1, %v7423_v50  ;;  %v6360_v16 = vsel %vm2718_vm8, %v6358_v44, %v6359_v38 }
 0x5c7   :  { %v7461_v57 = vpop.f32.mrf.mxu0  ;;  %v7426_v42 = vpop.f32.mrf.mxu1 }
 0x5c8   :  { %v11339_v36 = vadd.f32 %v3227_v18, %v11162_v27  ;;  %v7462_v0 = vadd.f32 %v7461_v57, %v7460_v3  ;;  %v6348_v27 = vsel %vm2718_vm8, %v6346_v28, %v6347_v13 }
 0x5c9   :  { %v7463_v26 = vpop.f32.mrf.mxu0  ;;  %6782 = vmatmul.mubr.bf16.gmra.mxu0 %v6406_v24  ;;  %v7427_v54 = vpop.f32.mrf.mxu1  ;;  %v6410_v51 = vpack.c.bf16 %v6360_v16, %v6348_v27 }
 0x5ca   :  { %v3230_v34 = vadd.f32 %v7462_v0, %v7422_v12  ;;  %6789 = vmatprep.mubr.bf16.mxu0 %v6411_v22  ;;  %v7428_v21 = vadd.f32 %v7427_v54, %v7426_v42 }
 0x5cb   :  { %v7464_v52 = vpop.f32.mrf.mxu0  ;;  %v7429_v47 = vpop.f32.mrf.mxu1  ;;  %6725 = vmatmul.mubr.bf16.gmra.mxu1 %v6408_v59 }
 0x5cc   :  { %v11342_v37 = vadd.f32 %v3230_v34, %v11208_v7  ;;  %v7465_v10 = vadd.f32 %v7464_v52, %v7463_v26 }
 0x5cd   :  { %v7466_v39 = vpop.f32.mrf.mxu0  ;;  %v7430_v43 = vpop.f32.mrf.mxu1 }
 0x5ce   :  { %v3235_v62 = vadd.f32 %v7465_v10, %v7425_v30  ;;  %v7431_v46 = vadd.f32 %v7430_v43, %v7429_v47 }
 0x5cf   :  { %v7467_v17 = vpop.f32.mrf.mxu0  ;;  %v7432_v11 = vpop.f32.mrf.mxu1 }
 0x5d0   :  { %v11347_v58 = vadd.f32 %v3235_v62, %v11249_v2  ;;  %v7468_v56 = vadd.f32 %v7467_v17, %v7466_v39 }
 0x5d1   :  { %v7469_v63 = vpop.f32.mrf.mxu0  ;;  %6790 = vmatmul.mubr.bf16.gmra.mxu0 %v6410_v51  ;;  %v7433_v7 = vpop.f32.mrf.mxu1 }
 0x5d2   :  { %v3238_v48 = vadd.f32 %v7468_v56, %v7428_v21  ;;  %v7434_v29 = vadd.f32 %v7433_v7, %v7432_v11 }
 0x5d3   :  { %v7470_v32 = vpop.f32.mrf.mxu0  ;;  %v7491_v23 = vpop.f32.mrf.mxu1 }
 0x5d4   :  { %v11350_v31 = vadd.f32 %v3238_v48, %v11288_v19  ;;  %v7471_v60 = vadd.f32 %v7470_v32, %v7469_v63 }
 0x5d5   :  { %v7472_v12 = vpop.f32.mrf.mxu0  ;;  %v7492_v40 = vpop.f32.mrf.mxu1 }
 0x5d6   :  { %v3243_v41 = vadd.f32 %v7471_v60, %v7431_v46  ;;  %v7493_v14 = vadd.f32 %v7492_v40, %v7491_v23 }
 0x5d7   :  { %v7473_v50 = vpop.f32.mrf.mxu0  ;;  %v7494_v33 = vpop.f32.mrf.mxu1 }
 0x5d8   :  { %v11353_v2 = vadd.f32 %v3243_v41, %v11303_v9  ;;  %v7474_v5 = vadd.f32 %v7473_v50, %v7472_v12 }
 0x5d9   :  { %v7531_v55 = vpop.f32.mrf.mxu0  ;;  %v7495_v4 = vpop.f32.mrf.mxu1 }
 0x5da   :  { %v3246_v20 = vadd.f32 %v7474_v5, %v7434_v29  ;;  %v7496_v35 = vadd.f32 %v7495_v4, %v7494_v33 }
 0x5db   :  { %v7532_v6 = vpop.f32.mrf.mxu0  ;;  %v7497_v3 = vpop.f32.mrf.mxu1 }
 0x5dc   :  { %v11356_v19 = vadd.f32 %v3246_v20, %v11314_v53  ;;  %v7533_v1 = vadd.f32 %v7532_v6, %v7531_v55 }
 0x5dd   :  { %v7534_v15 = vpop.f32.mrf.mxu0  ;;  %v7498_v45 = vpop.f32.mrf.mxu1 }
 0x5de   :  { %v3661_v18 = vadd.f32 %v7533_v1, %v7493_v14  ;;  %v7499_v30 = vadd.f32 %v7498_v45, %v7497_v3 }
 0x5df   :  { %v7535_v49 = vpop.f32.mrf.mxu0  ;;  %v7500_v61 = vpop.f32.mrf.mxu1 }
 0x5e0   :  { %v11359_v9 = vadd.f32 %v3661_v18, %v11327_v8  ;;  %v7536_v57 = vadd.f32 %v7535_v49, %v7534_v15 }
 0x5e1   :  { %v7537_v24 = vpop.f32.mrf.mxu0  ;;  %v7501_v22 = vpop.f32.mrf.mxu1 }
 0x5e2   :  { %v3664_v42 = vadd.f32 %v7536_v57, %v7496_v35  ;;  %v7502_v28 = vadd.f32 %v7501_v22, %v7500_v61 }
 0x5e3   :  { %v7538_v13 = vpop.f32.mrf.mxu0  ;;  %v7503_v0 = vpop.f32.mrf.mxu1 }
 0x5e4   :  { %v11362_v53 = vadd.f32 %v3664_v42, %v11332_v25  ;;  %v7539_v44 = vadd.f32 %v7538_v13, %v7537_v24 }
 0x5e5   :  { %v7540_v38 = vpop.f32.mrf.mxu0  ;;  %v7504_v26 = vpop.f32.mrf.mxu1 }
 0x5e6   :  { %v3669_v54 = vadd.f32 %v7539_v44, %v7499_v30  ;;  %v7505_v59 = vadd.f32 %v7504_v26, %v7503_v0 }
 0x5e7   :  { %v7541_v34 = vpop.f32.mrf.mxu0  ;;  %v7506_v21 = vpop.f32.mrf.mxu1 }
 0x5e8   :  { %v11365_v8 = vadd.f32 %v3669_v54, %v11339_v36  ;;  %v7542_v52 = vadd.f32 %v7541_v34, %v7540_v38 }
 0x5e9   :  { %v7543_v47 = vpop.f32.mrf.mxu0  ;;  %v7507_v10 = vpop.f32.mrf.mxu1 }
 0x5ea   :  { %v3672_v27 = vadd.f32 %v7542_v52, %v7502_v28  ;;  %v7508_v16 = vadd.f32 %v7507_v10, %v7506_v21 }
 0x5eb   :  { %v7544_v39 = vpop.f32.mrf.mxu0  ;;  %v7509_v43 = vpop.f32.mrf.mxu1 }
 0x5ec   :  { %v11368_v25 = vadd.f32 %v3672_v27, %v11342_v37  ;;  %v7545_v62 = vadd.f32 %v7544_v39, %v7543_v47 }
 0x5ed   :  { %v7546_v46 = vpop.f32.mrf.mxu0  ;;  %v7510_v17 = vpop.f32.mrf.mxu1 }
 0x5ee   :  { %v3677_v51 = vadd.f32 %v7545_v62, %v7505_v59  ;;  %v7511_v11 = vadd.f32 %v7510_v17, %v7509_v43 }
 0x5ef   :  { %v7547_v56 = vpop.f32.mrf.mxu0  ;;  %v7512_v63 = vpop.f32.mrf.mxu1 }
 0x5f0   :  { %v11371_v36 = vadd.f32 %v3677_v51, %v11347_v58  ;;  %v7548_v7 = vadd.f32 %v7547_v56, %v7546_v46 }
 0x5f1   :  { %v7549_v48 = vpop.f32.mrf.mxu0  ;;  %v7513_v29 = vpop.f32.mrf.mxu1 }
 0x5f2   :  { %v3680_v32 = vadd.f32 %v7548_v7, %v7508_v16  ;;  %v7514_v23 = vadd.f32 %v7513_v29, %v7512_v63 }
 0x5f3   :  { %v7550_v60 = vpop.f32.mrf.mxu0  ;;  %v7571_v12 = vpop.f32.mrf.mxu1 }
 0x5f4   :  { %v11374_v37 = vadd.f32 %v3680_v32, %v11350_v31  ;;  %v7551_v40 = vadd.f32 %v7550_v60, %v7549_v48 }
 0x5f5   :  { %v7552_v41 = vpop.f32.mrf.mxu0  ;;  %v7572_v14 = vpop.f32.mrf.mxu1 }
 0x5f6   :  { %v3685_v50 = vadd.f32 %v7551_v40, %v7511_v11  ;;  %v7573_v33 = vadd.f32 %v7572_v14, %v7571_v12 }
 0x5f7   :  { %v7553_v5 = vpop.f32.mrf.mxu0  ;;  %v7574_v55 = vpop.f32.mrf.mxu1 }
 0x5f8   :  { %v11377_v58 = vadd.f32 %v3685_v50, %v11353_v2  ;;  %v7554_v4 = vadd.f32 %v7553_v5, %v7552_v41 }
 0x5f9   :  { %v7611_v20 = vpop.f32.mrf.mxu0  ;;  %v7575_v35 = vpop.f32.mrf.mxu1 }
 0x5fa   :  { %v3688_v6 = vadd.f32 %v7554_v4, %v7514_v23  ;;  %v7576_v3 = vadd.f32 %v7575_v35, %v7574_v55 }
 0x5fb   :  { %v7612_v1 = vpop.f32.mrf.mxu0  ;;  %v7577_v15 = vpop.f32.mrf.mxu1 }
 0x5fc   :  { %v11380_v31 = vadd.f32 %v3688_v6, %v11356_v19  ;;  %v7613_v45 = vadd.f32 %v7612_v1, %v7611_v20 }
 0x5fd   :  { %v7614_v18 = vpop.f32.mrf.mxu0  ;;  %v7578_v30 = vpop.f32.mrf.mxu1 }
 0x5fe   :  { %v4327_v49 = vadd.f32 %v7613_v45, %v7573_v33  ;;  %v7579_v61 = vadd.f32 %v7578_v30, %v7577_v15 }
 0x5ff   :  { %v7615_v57 = vpop.f32.mrf.mxu0  ;;  %v7580_v24 = vpop.f32.mrf.mxu1 }
 0x600   :  { %v11383_v2 = vadd.f32 %v4327_v49, %v11359_v9  ;;  %v7616_v22 = vadd.f32 %v7615_v57, %v7614_v18 }
 0x601   :  { %v7617_v42 = vpop.f32.mrf.mxu0  ;;  %v7581_v28 = vpop.f32.mrf.mxu1 }
 0x602   :  { %v4330_v13 = vadd.f32 %v7616_v22, %v7576_v3  ;;  %v7582_v0 = vadd.f32 %v7581_v28, %v7580_v24 }
 0x603   :  { %v7618_v44 = vpop.f32.mrf.mxu0  ;;  %v7583_v38 = vpop.f32.mrf.mxu1 }
 0x604   :  { %v11386_v19 = vadd.f32 %v4330_v13, %v11362_v53  ;;  %v7619_v26 = vadd.f32 %v7618_v44, %v7617_v42 }
 0x605   :  { %v7620_v54 = vpop.f32.mrf.mxu0  ;;  %v7584_v59 = vpop.f32.mrf.mxu1 }
 0x606   :  { %v4335_v34 = vadd.f32 %v7619_v26, %v7579_v61  ;;  %v7585_v21 = vadd.f32 %v7584_v59, %v7583_v38 }
 0x607   :  { %v7621_v52 = vpop.f32.mrf.mxu0  ;;  %v7586_v47 = vpop.f32.mrf.mxu1 }
 0x608   :  { %v11389_v9 = vadd.f32 %v4335_v34, %v11365_v8  ;;  %v7622_v10 = vadd.f32 %v7621_v52, %v7620_v54 }
 0x609   :  { %v7623_v27 = vpop.f32.mrf.mxu0  ;;  %v7587_v16 = vpop.f32.mrf.mxu1 }
 0x60a   :  { %v4338_v39 = vadd.f32 %v7622_v10, %v7582_v0  ;;  %v7588_v43 = vadd.f32 %v7587_v16, %v7586_v47 }
 0x60b   :  { %v7624_v62 = vpop.f32.mrf.mxu0  ;;  %v7589_v46 = vpop.f32.mrf.mxu1 }
 0x60c   :  { %v11392_v53 = vadd.f32 %v4338_v39, %v11368_v25  ;;  %v7625_v17 = vadd.f32 %v7624_v62, %v7623_v27 }
 0x60d   :  { %v7626_v51 = vpop.f32.mrf.mxu0  ;;  %v7590_v11 = vpop.f32.mrf.mxu1 }
 0x60e   :  { %v4343_v56 = vadd.f32 %v7625_v17, %v7585_v21  ;;  %v7591_v63 = vadd.f32 %v7590_v11, %v7589_v46 }
 0x60f   :  { %v7627_v7 = vpop.f32.mrf.mxu0  ;;  %v7592_v48 = vpop.f32.mrf.mxu1 }
 0x610   :  { %v11395_v8 = vadd.f32 %v4343_v56, %v11371_v36  ;;  %v7628_v29 = vadd.f32 %v7627_v7, %v7626_v51 }
 0x611   :  { %v7629_v32 = vpop.f32.mrf.mxu0  ;;  %v7593_v23 = vpop.f32.mrf.mxu1 }
 0x612   :  { %v4346_v60 = vadd.f32 %v7628_v29, %v7588_v43  ;;  %v7594_v12 = vadd.f32 %v7593_v23, %v7592_v48 }
 0x613   :  { %v7630_v40 = vpop.f32.mrf.mxu0  ;;  %v7651_v41 = vpop.f32.mrf.mxu1 }
 0x614   :  { %v11398_v25 = vadd.f32 %v4346_v60, %v11374_v37  ;;  %v7631_v14 = vadd.f32 %v7630_v40, %v7629_v32 }
 0x615   :  { %v7632_v50 = vpop.f32.mrf.mxu0  ;;  %v7652_v33 = vpop.f32.mrf.mxu1 }
 0x616   :  { %v4351_v5 = vadd.f32 %v7631_v14, %v7591_v63  ;;  %v7653_v55 = vadd.f32 %v7652_v33, %v7651_v41 }
 0x617   :  { %v7633_v4 = vpop.f32.mrf.mxu0  ;;  %v7654_v20 = vpop.f32.mrf.mxu1 }
 0x618   :  { %v11401_v36 = vadd.f32 %v4351_v5, %v11377_v58  ;;  %v7634_v35 = vadd.f32 %v7633_v4, %v7632_v50 }
 0x619   :  { %v7691_v6 = vpop.f32.mrf.mxu0  ;;  %v7655_v3 = vpop.f32.mrf.mxu1 }
 0x61a   :  { %v4354_v1 = vadd.f32 %v7634_v35, %v7594_v12  ;;  %v7656_v15 = vadd.f32 %v7655_v3, %v7654_v20 }
 0x61b   :  { %v7692_v45 = vpop.f32.mrf.mxu0  ;;  %v7657_v18 = vpop.f32.mrf.mxu1 }
 0x61c   :  { %v4364_v37 = vadd.f32 %v4354_v1, %v11380_v31  ;;  %v7693_v30 = vadd.f32 %v7692_v45, %v7691_v6 }
 0x61d   :  { %v7694_v49 = vpop.f32.mrf.mxu0  ;;  %v7658_v61 = vpop.f32.mrf.mxu1 }
 0x61e   :  { %v4993_v57 = vadd.f32 %v7693_v30, %v7653_v55  ;;  %v7659_v24 = vadd.f32 %v7658_v61, %v7657_v18 }
 0x61f   :  { %v7695_v22 = vpop.f32.mrf.mxu0  ;;  %v7660_v42 = vpop.f32.mrf.mxu1 }
 0x620   :  { %v11405_v28 = vadd.f32 %v4993_v57, %v11383_v2  ;;  %v7696_v58 = vadd.f32 %v7695_v22, %v7694_v49 }
 0x621   :  { %v7697_v13 = vpop.f32.mrf.mxu0  ;;  %v7661_v0 = vpop.f32.mrf.mxu1 }
 0x622   :  { %v4996_v44 = vadd.f32 %v7696_v58, %v7656_v15  ;;  %v7662_v38 = vadd.f32 %v7661_v0, %v7660_v42 }
 0x623   :  { %v7698_v26 = vpop.f32.mrf.mxu0  ;;  %v7663_v54 = vpop.f32.mrf.mxu1 }
 0x624   :  { %v11408_v59 = vadd.f32 %v4996_v44, %v11386_v19  ;;  %v7699_v31 = vadd.f32 %v7698_v26, %v7697_v13 }
 0x625   :  { %v7700_v34 = vpop.f32.mrf.mxu0  ;;  %v7664_v21 = vpop.f32.mrf.mxu1 }
 0x626   :  { %v5001_v52 = vadd.f32 %v7699_v31, %v7659_v24  ;;  %v7665_v47 = vadd.f32 %v7664_v21, %v7663_v54 }
 0x627   :  { %v7701_v10 = vpop.f32.mrf.mxu0  ;;  %v7666_v27 = vpop.f32.mrf.mxu1 }
 0x628   :  { %v11411_v2 = vadd.f32 %v5001_v52, %v11389_v9  ;;  %v7702_v16 = vadd.f32 %v7701_v10, %v7700_v34 }
 0x629   :  { %v7703_v39 = vpop.f32.mrf.mxu0  ;;  %v7667_v43 = vpop.f32.mrf.mxu1 }
 0x62a   :  { %v5004_v62 = vadd.f32 %v7702_v16, %v7662_v38  ;;  %v7668_v46 = vadd.f32 %v7667_v43, %v7666_v27 }
 0x62b   :  { %v7704_v17 = vpop.f32.mrf.mxu0  ;;  %v7669_v51 = vpop.f32.mrf.mxu1 }
 0x62c   :  { %v11414_v19 = vadd.f32 %v5004_v62, %v11392_v53  ;;  %v7705_v11 = vadd.f32 %v7704_v17, %v7703_v39 }
 0x62d   :  { %v7706_v56 = vpop.f32.mrf.mxu0  ;;  %v7670_v63 = vpop.f32.mrf.mxu1 }
 0x62e   :  { %v5009_v7 = vadd.f32 %v7705_v11, %v7665_v47  ;;  %v7671_v48 = vadd.f32 %v7670_v63, %v7669_v51 }
 0x62f   :  { %v7707_v29 = vpop.f32.mrf.mxu0  ;;  %v7672_v32 = vpop.f32.mrf.mxu1 }
 0x630   :  { %v11417_v9 = vadd.f32 %v5009_v7, %v11395_v8  ;;  %v7708_v23 = vadd.f32 %v7707_v29, %v7706_v56 }
 0x631   :  { %v7709_v60 = vpop.f32.mrf.mxu0  ;;  %v7673_v12 = vpop.f32.mrf.mxu1 }
 0x632   :  { %11670 = vst [vmem:[#allocation5_spill] sm:$0xff] %v11417_v9  ;;  %v5012_v40 = vadd.f32 %v7708_v23, %v7668_v46  ;;  %v7674_v41 = vadd.f32 %v7673_v12, %v7672_v32 }
 0x633   :  { %v7710_v14 = vpop.f32.mrf.mxu0  ;;  %v11419_v50 = vpop.f32.mrf.mxu1 }
 0x634   :  { %v11422_v53 = vadd.f32 %v5012_v40, %v11398_v25  ;;  %v7711_v33 = vadd.f32 %v7710_v14, %v7709_v60 }
 0x635   :  { %v7712_v5 = vpop.f32.mrf.mxu0  ;;  %v11424_v55 = vpop.f32.mrf.mxu1 }
 0x636   :  { %11671 = vst [vmem:[#allocation6_spill] sm:$0xff] %v11422_v53  ;;  %v5017_v4 = vadd.f32 %v7711_v33, %v7671_v48  ;;  %v7733_v9 = vadd.f32 %v11424_v55, %v11419_v50 }
 0x637   :  { %v7713_v20 = vpop.f32.mrf.mxu0  ;;  %v11426_v35 = vpop.f32.mrf.mxu1 }
 0x638   :  { %v11429_v8 = vadd.f32 %v5017_v4, %v11401_v36  ;;  %v7714_v6 = vadd.f32 %v7713_v20, %v7712_v5 }
 0x639   :  { %v11431_v3 = vpop.f32.mrf.mxu0  ;;  %v11433_v1 = vpop.f32.mrf.mxu1 }
 0x63a   :  { %11672 = vst [vmem:[#allocation7_spill] sm:$0xff] %v11429_v8  ;;  %v5020_v15 = vadd.f32 %v7714_v6, %v7674_v41 }
 0x63b   :  { %v7772_v45 = vpop.f32.mrf.mxu0  ;;  %v11435_v25 = vpop.f32.mrf.mxu1 }
 0x63c   :  { %v11437_v18 = vadd.f32 %v5020_v15, %v4364_v37 }
 0x63d   :  { %v11439_v30 = vpop.f32.mrf.mxu0  ;;  %v11441_v49 = vpop.f32.mrf.mxu1 }
 0x63e   :  { %11673 = vst [vmem:[#allocation8_spill] sm:$0xff] %v11437_v18 }
 0x63f   :  { %v11443_v61 = vpop.f32.mrf.mxu0  ;;  %v11445_v57 = vpop.f32.mrf.mxu1 }
 0x641   :  { %v11447_v36 = vpop.f32.mrf.mxu0  ;;  %v11449_v24 = vpop.f32.mrf.mxu1 }
 0x643   :  { %v11451_v22 = vpop.f32.mrf.mxu0  ;;  %v11453_v42 = vpop.f32.mrf.mxu1 }
 0x645   :  { %v11455_v58 = vpop.f32.mrf.mxu0  ;;  %v11457_v37 = vpop.f32.mrf.mxu1 }
 0x647   :  { %v11459_v13 = vpop.f32.mrf.mxu0  ;;  %v11461_v0 = vpop.f32.mrf.mxu1 }
 0x649   :  { %v11463_v44 = vpop.f32.mrf.mxu0  ;;  %v11465_v38 = vpop.f32.mrf.mxu1 }
 0x64b   :  { %v11467_v26 = vpop.f32.mrf.mxu0  ;;  %v11469_v54 = vpop.f32.mrf.mxu1 }
 0x64c   :  { %11674 = vst [vmem:[#allocation3_spill] sm:$0xff] %v11469_v54 }
 0x64d   :  { %v11471_v31 = vpop.f32.mrf.mxu0  ;;  %v11473_v34 = vpop.f32.mrf.mxu1 }
 0x64e   :  { %11675 = vst [vmem:[#allocation4_spill] sm:$0xff] %v11473_v34 }
 0x64f   :  { %v11475_v21 = vpop.f32.mrf.mxu0  ;;  %v11477_v52 = vpop.f32.mrf.mxu1 }
 0x650   :  { %11676 = vst [vmem:[#allocation9_spill] sm:$0xff] %v11477_v52 }
 0x651   :  { %v11479_v47 = vpop.f32.mrf.mxu0  ;;  %v11481_v10 = vpop.f32.mrf.mxu1 }
 0x652   :  { %11677 = vst [vmem:[#allocation10_spill] sm:$0xff] %v11479_v47  ;;  %11678 = vst [vmem:[#allocation11_spill] sm:$0xff] %v11481_v10 }
 0x653   :  { %v11483_v27 = vpop.f32.mrf.mxu0  ;;  %v7811_v16 = vpop.f32.mrf.mxu1 }
 0x654   :  { %11679 = vst [vmem:[#allocation12_spill] sm:$0xff] %v11483_v27 }
 0x655   :  { %v11485_v39 = vpop.f32.mrf.mxu0  ;;  %v7812_v43 = vpop.f32.mrf.mxu1 }
 0x656   :  { %11680 = vst [vmem:[#allocation13_spill] sm:$0xff] %v11485_v39 }
 0x657   :  { %v11487_v62 = vpop.f32.mrf.mxu0  ;;  %v7814_v46 = vpop.f32.mrf.mxu1 }
 0x658   :  { %11681 = vst [vmem:[#allocation14_spill] sm:$0xff] %v11487_v62 }
 0x659   :  { %v7851_v17 = vpop.f32.mrf.mxu0  ;;  %v7815_v51 = vpop.f32.mrf.mxu1 }
 0x65a   :  { %v7816_v55 = vadd.f32 %v7815_v51, %v7814_v46 }
 0x65b   :  { %v7852_v11 = vpop.f32.mrf.mxu0  ;;  %v7817_v56 = vpop.f32.mrf.mxu1 }
 0x65c   :  { %v7853_v34 = vadd.f32 %v7852_v11, %v7851_v17 }
 0x65d   :  { %v7854_v63 = vpop.f32.mrf.mxu0  ;;  %v7818_v7 = vpop.f32.mrf.mxu1 }
 0x65f   :  { %v7855_v48 = vpop.f32.mrf.mxu0  ;;  %v11489_v29 = vpop.f32.mrf.mxu1 }
 0x661   :  { %v7857_v32 = vpop.f32.mrf.mxu0  ;;  %v7821_v23 = vpop.f32.mrf.mxu1 }
 0x663   :  { %v7858_v60 = vpop.f32.mrf.mxu0  ;;  %v11491_v12 = vpop.f32.mrf.mxu1 }
 0x665   :  { %v7860_v40 = vpop.f32.mrf.mxu0  ;;  %v11493_v41 = vpop.f32.mrf.mxu1 }
 0x667   :  { %v7861_v14 = vpop.f32.mrf.mxu0  ;;  %v11495_v33 = vpop.f32.mrf.mxu1 }
 0x668   :  { %v7862_v51 = vadd.f32 %v7861_v14, %v7860_v40 }
 0x669   :  { %v11497_v5 = vpop.f32.mrf.mxu0  ;;  %v11499_v4 = vpop.f32.mrf.mxu1 }
 0x66b   :  { %v11501_v20 = vpop.f32.mrf.mxu0  ;;  %v11503_v6 = vpop.f32.mrf.mxu1 }
 0x66c   :  { %11682 = vst [vmem:[#allocation15_spill] sm:$0xff] %v11503_v6  ;;  %v7773_v6 = vadd.f32 %v7772_v45, %v11431_v3  ;;  %v7856_v3 = vadd.f32 %v7855_v48, %v7854_v63 }
 0x66d   :  { %v11505_v15 = vpop.f32.mrf.mxu0  ;;  %v11507_v18 = vpop.f32.mrf.mxu1 }
 0x66e   :  { %11683 = vst [vmem:[#allocation16_spill] sm:$0xff] %v11505_v15  ;;  %11684 = vst [vmem:[#allocation17_spill] sm:$0xff] %v11507_v18  ;;  %v7813_v18 = vadd.f32 %v7812_v43, %v7811_v16  ;;  %v7739_v16 = vadd.f32 %v11441_v49, %v11435_v25  ;;  %v7779_v43 = vadd.f32 %v11451_v22, %v11447_v36 }
 0x66f   :  { %v11509_v8 = vpop.f32.mrf.mxu0  ;;  %v11511_v62 = vpop.f32.mrf.mxu1  ;;  %v7742_v25 = vadd.f32 %v11449_v24, %v11445_v57  ;;  %v7782_v49 = vadd.f32 %v11459_v13, %v11455_v58 }
 0x670   :  { %11685 = vst [vmem:[#allocation18_spill] sm:$0xff] %v11509_v8  ;;  %11686 = vst [vmem:[#allocation19_spill] sm:$0xff] %v11511_v62  ;;  %v5436_v8 = vadd.f32 %v7773_v6, %v7733_v9  ;;  %v6102_v50 = vadd.f32 %v7853_v34, %v7813_v18  ;;  %v7819_v6 = vadd.f32 %v7818_v7, %v7817_v56 }
 0x671   :  { %v11513_v39 = vpop.f32.mrf.mxu0  ;;  %v11515_v10 = vpop.f32.mrf.mxu1  ;;  %v6105_v34 = vadd.f32 %v7856_v3, %v7816_v55  ;;  %v5447_v48 = vadd.f32 %v7782_v49, %v7742_v25  ;;  %v7865_v55 = vadd.f32 %v11501_v20, %v11497_v5  ;;  %v7748_v3 = vadd.f32 %v11465_v38, %v11461_v0 }
 0x672   :  { %11687 = vst [vmem:[#allocation20_spill] sm:$0xff] %v11513_v39  ;;  %11688 = vst [vmem:[#allocation21_spill] sm:$0xff] %v11515_v10  ;;  %v7736_v10 = vadd.f32 %v11433_v1, %v11426_v35  ;;  %v5466_v11 = vadd.f32 %v5436_v8, %v11405_v28  ;;  %v11542_v28 = vld [vmem:[%s11628_s12] ss:$0 sm:$0xff] }
 0x673   :  { %v11517_v52 = vpop.f32.mrf.mxu0  ;;  %v7891_v53 = vpop.f32.mrf.mxu1 }
 0x674   :  { %11689 = vst [vmem:[#allocation22_spill] sm:$0xff] %v11517_v52  ;;  %v7776_v52 = vadd.f32 %v11443_v61, %v11439_v30  ;;  %v7859_v30 = vadd.f32 %v7858_v60, %v7857_v32  ;;  %v6132_v18 = vadd.f32 %v6102_v50, %v5466_v11 }
 0x675   :  { %v11522_v27 = vpop.f32.mrf.mxu0  ;;  %v7892_v47 = vpop.f32.mrf.mxu1 }
 0x676   :  { %v7893_v45 = vadd.f32 %v7892_v47, %v7891_v53  ;;  %v5439_v35 = vadd.f32 %v7776_v52, %v7736_v10  ;;  %v5444_v47 = vadd.f32 %v7779_v43, %v7739_v16 }
 0x677   :  { %v11524_v54 = vpop.f32.mrf.mxu0  ;;  %v7894_v62 = vpop.f32.mrf.mxu1 }
 0x678   :  { %11690 = vst [vmem:[#allocation23_spill] sm:$0xff] %v11524_v54  ;;  %v5467_v22 = vadd.f32 %v5439_v35, %v11408_v59  ;;  %v5468_v7 = vadd.f32 %v5444_v47, %v11411_v2  ;;  %v7745_v59 = vadd.f32 %v11457_v37, %v11453_v42  ;;  %v7825_v2 = vadd.f32 %v11493_v41, %v11491_v12 }
 0x679   :  { %v7931_v39 = vpop.f32.mrf.mxu0  ;;  %v7895_v15 = vpop.f32.mrf.mxu1 }
 0x67a   :  { %v7896_v53 = vadd.f32 %v7895_v15, %v7894_v62  ;;  %v7822_v62 = vadd.f32 %v7821_v23, %v11489_v29  ;;  %v6133_v24 = vadd.f32 %v6105_v34, %v5467_v22  ;;  %v7785_v15 = vadd.f32 %v11467_v26, %v11463_v44  ;;  %v11695_v34 = vld [vmem:[#allocation10_spill] sm:$0xff]  ;;  %v11698_v22 = vld [vmem:[#allocation15_spill] sm:$0xff] }
 0x67b   :  { %v7932_v17 = vpop.f32.mrf.mxu0  ;;  %v7897_v9 = vpop.f32.mrf.mxu1  ;;  %v5469_v26 = vadd.f32 %v5447_v48, %v11414_v19  ;;  %v11691_v19 = vld [vmem:[#allocation16_spill] sm:$0xff]  ;;  %v6118_v35 = vadd.f32 %v7865_v55, %v7825_v2 }
 0x67c   :  { %v7933_v1 = vadd.f32 %v7932_v17, %v7931_v39  ;;  %v6110_v39 = vadd.f32 %v7859_v30, %v7819_v6  ;;  %v6113_v14 = vadd.f32 %v7862_v51, %v7822_v62  ;;  %v5452_v12 = vadd.f32 %v7785_v15, %v7745_v59  ;;  %v11693_v30 = vld [vmem:[#allocation3_spill] sm:$0xff]  ;;  %v11701_v62 = vld [vmem:[#allocation22_spill] sm:$0xff]  ;;  %v11703_v15 = vld [vmem:[#allocation9_spill] sm:$0xff] }
 0x67d   :  { %v7934_v61 = vpop.f32.mrf.mxu0  ;;  %v7898_v54 = vpop.f32.mrf.mxu1  ;;  %v7828_v17 = vadd.f32 %v11499_v4, %v11495_v33  ;;  %v11697_v33 = vld [vmem:[#allocation5_spill] sm:$0xff] }
 0x67e   :  { %v6768_v46 = vadd.f32 %v7933_v1, %v7893_v45  ;;  %v7899_v63 = vadd.f32 %v7898_v54, %v7897_v9  ;;  %v6134_v40 = vadd.f32 %v6110_v39, %v5468_v7  ;;  %v7788_v45 = vadd.f32 %v11475_v21, %v11471_v31  ;;  %v11692_v9 = vld [vmem:[#allocation18_spill] sm:$0xff]  ;;  %v11700_v39 = vld [vmem:[#allocation20_spill] sm:$0xff] }
 0x67f   :  { %v7935_v8 = vpop.f32.mrf.mxu0  ;;  %v7900_v36 = vpop.f32.mrf.mxu1  ;;  %v6135_v20 = vadd.f32 %v6113_v14, %v5469_v26  ;;  %v7868_v11 = vadd.f32 %v11692_v9, %v11691_v19  ;;  %v5470_v4 = vadd.f32 %v5452_v12, %v11697_v33  ;;  %v7871_v51 = vadd.f32 %v11701_v62, %v11700_v39  ;;  %v11702_v7 = vld [vmem:[#allocation6_spill] sm:$0xff] }
 0x680   :  { %v6798_v52 = vadd.f32 %v6768_v46, %v6132_v18  ;;  %v7936_v10 = vadd.f32 %v7935_v8, %v7934_v61  ;;  %v5455_v6 = vadd.f32 %v7788_v45, %v7748_v3  ;;  %v11694_v61 = vld [vmem:[#allocation4_spill] sm:$0xff]  ;;  %v11706_v14 = vld [vmem:[#allocation14_spill] sm:$0xff]  ;;  %v11709_v45 = vld [vmem:[#allocation23_spill] sm:$0xff] }
 0x681   :  { %v7937_v56 = vpop.f32.mrf.mxu0  ;;  %v7901_v57 = vpop.f32.mrf.mxu1  ;;  %v7751_v18 = vadd.f32 %v11694_v61, %v11693_v30  ;;  %v11696_v46 = vld [vmem:[#allocation12_spill] sm:$0xff] }
 0x682   :  { %v6813_v58 = vadd.f32 %v11542_v28, %v6798_v52  ;;  %v6771_v13 = vadd.f32 %v7936_v10, %v7896_v53  ;;  %v7902_v44 = vadd.f32 %v7901_v57, %v7900_v36  ;;  %v7791_v53 = vadd.f32 %v11696_v46, %v11695_v34  ;;  %v11699_v52 = vld [vmem:[#allocation17_spill] sm:$0xff]  ;;  %v11711_v30 = vld [vmem:[#allocation8_spill] sm:$0xff] }
 0x683   :  { %v7938_v32 = vpop.f32.mrf.mxu0  ;;  %v7903_v60 = vpop.f32.mrf.mxu1  ;;  %v6121_v36 = vadd.f32 %v7868_v11, %v7828_v17  ;;  %v7831_v10 = vadd.f32 %v11699_v52, %v11698_v22  ;;  %v5471_v48 = vadd.f32 %v5455_v6, %v11702_v7 }
 0x684   :  { %6821 = vst [vmem:[%s11629_s13] sm:$0xff] %v6813_v58  ;;  %v6799_v29 = vadd.f32 %v6771_v13, %v6133_v24  ;;  %v7939_v23 = vadd.f32 %v7938_v32, %v7937_v56  ;;  %v6136_v24 = vadd.f32 %v6118_v35, %v5470_v4  ;;  %v5460_v32 = vadd.f32 %v7791_v53, %v7751_v18 }
 0x685   :  { %v7940_v54 = vpop.f32.mrf.mxu0  ;;  %v7904_v50 = vpop.f32.mrf.mxu1  ;;  %v6137_v55 = vadd.f32 %v6121_v36, %v5471_v48 }
 0x686   :  { %v6814_v42 = vadd.f32 %v11542_v28, %v6799_v29  ;;  %v6776_v37 = vadd.f32 %v7939_v23, %v7899_v63  ;;  %v7905_v1 = vadd.f32 %v7904_v50, %v7903_v60  ;;  %v11704_v29 = vld [vmem:[#allocation11_spill] sm:$0xff] }
 0x687   :  { %v7941_v16 = vpop.f32.mrf.mxu0  ;;  %v7906_v43 = vpop.f32.mrf.mxu1  ;;  %v7754_v23 = vadd.f32 %v11704_v29, %v11703_v15 }
 0x688   :  { %6822 = vst [vmem:[%s11629_s13 + $0x8] sm:$0xff] %v6814_v42  ;;  %v6800_v41 = vadd.f32 %v6776_v37, %v6134_v40  ;;  %v7942_v5 = vadd.f32 %v7941_v16, %v7940_v54  ;;  %v11705_v40 = vld [vmem:[#allocation13_spill] sm:$0xff]  ;;  %v6126_v42 = vadd.f32 %v7871_v51, %v7831_v10  ;;  %v11707_v37 = vld [vmem:[#allocation19_spill] sm:$0xff]  ;;  %v7874_v16 = vadd.f32 %v11709_v45, %v11522_v27 }
 0x689   :  { %v7943_v0 = vpop.f32.mrf.mxu0  ;;  %v7907_v38 = vpop.f32.mrf.mxu1  ;;  %v7794_v2 = vadd.f32 %v11706_v14, %v11705_v40 }
 0x68a   :  { %v6815_v31 = vadd.f32 %v11542_v28, %v6800_v41  ;;  %v6779_v21 = vadd.f32 %v7942_v5, %v7902_v44  ;;  %v7908_v63 = vadd.f32 %v7907_v38, %v7906_v43  ;;  %v11708_v44 = vld [vmem:[#allocation21_spill] sm:$0xff]  ;;  %v11710_v5 = vld [vmem:[#allocation7_spill] sm:$0xff] }
 0x68b   :  { %v7944_v47 = vpop.f32.mrf.mxu0  ;;  %v7909_v25 = vpop.f32.mrf.mxu1  ;;  %v7834_v26 = vadd.f32 %v11708_v44, %v11707_v37  ;;  %v5463_v9 = vadd.f32 %v7794_v2, %v7754_v23 }
 0x68c   :  { %6823 = vst [vmem:[%s11629_s13 + $0x10] sm:$0xff] %v6815_v31  ;;  %v6801_v49 = vadd.f32 %v6779_v21, %v6135_v20  ;;  %v7945_v8 = vadd.f32 %v7944_v47, %v7943_v0  ;;  %v5472_v20 = vadd.f32 %v5460_v32, %v11710_v5 }
 0x68d   :  { %v7946_v56 = vpop.f32.mrf.mxu0  ;;  %v7910_v57 = vpop.f32.mrf.mxu1  ;;  %v6129_v31 = vadd.f32 %v7874_v16, %v7834_v26  ;;  %v5473_v61 = vadd.f32 %v5463_v9, %v11711_v30 }
 0x68e   :  { %v6816_v58 = vadd.f32 %v11542_v28, %v6801_v49  ;;  %v6784_v13 = vadd.f32 %v7945_v8, %v7905_v1  ;;  %v7911_v41 = vadd.f32 %v7910_v57, %v7909_v25  ;;  %v6138_v38 = vadd.f32 %v6126_v42, %v5472_v20 }
 0x68f   :  { %v7947_v60 = vpop.f32.mrf.mxu0  ;;  %v7912_v59 = vpop.f32.mrf.mxu1  ;;  %v6139_v46 = vadd.f32 %v6129_v31, %v5473_v61 }
 0x690   :  { %6824 = vst [vmem:[%s11629_s13 + $0x18] sm:$0xff] %v6816_v58  ;;  %v6802_v54 = vadd.f32 %v6784_v13, %v6136_v24  ;;  %v7948_v50 = vadd.f32 %v7947_v60, %v7946_v56 }
 0x691   :  { %v7949_v3 = vpop.f32.mrf.mxu0  ;;  %v7913_v19 = vpop.f32.mrf.mxu1 }
 0x692   :  { %v6817_v43 = vadd.f32 %v11542_v28, %v6802_v54  ;;  %v6787_v12 = vadd.f32 %v7948_v50, %v7908_v63  ;;  %v7914_v1 = vadd.f32 %v7913_v19, %v7912_v59 }
 0x693   :  { %v7950_v17 = vpop.f32.mrf.mxu0 }
 0x694   :  { %6825 = vst [vmem:[%s11629_s13 + $0x20] sm:$0xff] %v6817_v43  ;;  %v6803_v11 = vadd.f32 %v6787_v12, %v6137_v55  ;;  %v7951_v0 = vadd.f32 %v7950_v17, %v7949_v3 }
 0x695   :  { %v7952_v35 = vpop.f32.mrf.mxu0 }
 0x696   :  { %v6818_v27 = vadd.f32 %v11542_v28, %v6803_v11  ;;  %v6792_v21 = vadd.f32 %v7951_v0, %v7911_v41 }
 0x697   :  { %v7953_v6 = vpop.f32.mrf.mxu0 }
 0x698   :  { %6826 = vst [vmem:[%s11629_s13 + $0x28] sm:$0xff] %v6818_v27  ;;  %v6804_v18 = vadd.f32 %v6792_v21, %v6138_v38  ;;  %v7954_v34 = vadd.f32 %v7953_v6, %v7952_v35 }
 0x69a   :  { %v6819_v53 = vadd.f32 %v11542_v28, %v6804_v18  ;;  %v6795_v47 = vadd.f32 %v7954_v34, %v7914_v1 }
 0x69c   :  { %6827 = vst [vmem:[%s11629_s13 + $0x30] sm:$0xff] %v6819_v53  ;;  %v6805_v25 = vadd.f32 %v6795_v47, %v6139_v46 }
 0x69e   :  { %v6820_v33 = vadd.f32 %v11542_v28, %v6805_v25 }
 0x6a0   :  { %6828 = vst [vmem:[%s11629_s13 + $0x38] sm:$0xff] %v6820_v33 }

</bundles_post_ra>
